<compile_context>
chip_gen: v5e
topology: v5e:2x2
jax: 0.10.0
libtpu: 0.0.40
codegen_flags: <defaults>
</compile_context>

<pallas_src>
import functools
import math

import jax
import jax.numpy as jnp
from jax import lax
from jax.experimental import pallas as pl
from jax.experimental.pallas import tpu as pltpu


_UNROLL = 8            # DMA-issue unroll factor (chunk is always a multiple of 8)
_BUFFERED_1_OK = True  # flipped off if this jax build rejects pl.Buffered(1)


def _bert_emb_kernel(ids_ref,        # SMEM (rows_padded,) int32     (scalar prefetch)
                     tt_ref,         # VMEM (tile, 1) int32
                     word_hbm,       # HBM  (V, E) table dtype       (memory_space=pl.ANY)
                     pos_ref,        # VMEM (chunk, E) or (tile, E)
                     type_ref,       # VMEM (2, E)
                     gamma_ref,      # VMEM (1, E)
                     beta_ref,       # VMEM (1, E)
                     out_ref,        # VMEM (tile, E)
                     gbuf0, gbuf1,   # VMEM (chunk, E) table dtype   (gather double buffer)
                     sem,            # DMA semaphores (2,)
                     *, eps, vocab, chunk, unroll, pos_streamed):
    tile = out_ref.shape[0]
    n_chunks = tile // chunk
    row0 = pl.program_id(0) * tile
    gbufs = (gbuf0, gbuf1)

    def issue_chunk(c, slot):
        """Issue `chunk` per-row word-embedding DMAs for chunk c into gbufs[slot]."""
        base = row0 + c * chunk
        dst = gbufs[slot]

        def body(u, carry):
            r0 = u * unroll
            for j in range(unroll):                              # packed descriptor pushes
                r = r0 + j
                tok = jnp.clip(ids_ref[base + r], 0, vocab - 1)  # no HW bounds check on DMA
                pltpu.make_async_copy(word_hbm.at[pl.ds(tok, 1), :],
                                      dst.at[pl.ds(r, 1), :],
                                      sem.at[slot]).start()
            return carry

        lax.fori_loop(0, chunk // unroll, body, 0, unroll=True)

    def wait_chunk(slot):
        # One coarse wait: descriptor covers the WHOLE (chunk, E) destination, so it
        # consumes chunk*E*itemsize semaphore bytes == the sum of the issued per-row
        # copies, and names the full gather buffer as an explicit data dependence.
        pltpu.make_async_copy(word_hbm.at[pl.ds(0, chunk), :],
                              gbufs[slot],
                              sem.at[slot]).wait()

    # Invariants hoisted out of the chunk loop (loaded/cast once).
    t0 = type_ref[0:1, :].astype(jnp.float32)                    # (1, E)
    tdiff = type_ref[1:2, :].astype(jnp.float32) - t0            # (1, E)
    g = gamma_ref[...].astype(jnp.float32)                       # (1, E)
    b = beta_ref[...].astype(jnp.float32)                        # (1, E)
    if not pos_streamed:
        pos_chunk = pos_ref[...].astype(jnp.float32)             # (chunk, E), same every chunk

    issue_chunk(0, 0)
    for c in range(n_chunks):                                    # static, small trip count
        slot = c & 1
        if c + 1 < n_chunks:
            issue_chunk(c + 1, 1 - slot)                         # prefetch next chunk
        wait_chunk(slot)

        words = gbufs[slot][...].astype(jnp.float32)             # (chunk, E)
        if pos_streamed:
            pos = pos_ref[pl.ds(c * chunk, chunk), :].astype(jnp.float32)
        else:
            pos = pos_chunk
        tt = tt_ref[pl.ds(c * chunk, chunk), :].astype(jnp.float32)   # (chunk, 1)
        # token-type lookup as a lerp: exact for token_type in {0, 1}
        x = words + pos + t0 + tt * tdiff

        # LayerNorm (biased variance, matches torch.nn.LayerNorm, eps=1e-12), f32 math.
        mean = jnp.mean(x, axis=-1, keepdims=True)
        xc = x - mean
        var = jnp.mean(xc * xc, axis=-1, keepdims=True)
        y = xc * lax.rsqrt(var + eps) * g + b

        # dropout: identity (inference mode)
        out_ref[pl.ds(c * chunk, chunk), :] = y.astype(out_ref.dtype)


def _pick_tiles(seq_len, max_tile, target_chunk):
    """Return (tile, chunk, pos_streamed).

    chunk: rows gathered / computed per double-buffer step; always a multiple of 8
           (sublane rule) and, when feasible, of S so every chunk sees positions
           0..S-1 exactly.  tile: rows per grid step (a multiple of chunk).
    """
    lcm = seq_len * 8 // math.gcd(seq_len, 8)
    chunk_cap = max(8, min(max_tile, target_chunk))
    if lcm <= max_tile:
        chunk = lcm * max(1, chunk_cap // lcm)
        pos_streamed = False
    else:
        # S too large for an in-chunk positional period: stream a per-row positional
        # slab per tile instead (keeps VMEM bounded for any S).
        chunk = 8 * (chunk_cap // 8)
        pos_streamed = True
    n_chunks = max(1, max_tile // chunk)
    return chunk * n_chunks, chunk, pos_streamed


def bert_embeddings(input_ids, token_type_ids, word_table, pos_table, type_table,
                    gamma, beta, *, eps=1e-12, max_tile=512, target_chunk=64,
                    out_dtype=jnp.float32, vmem_limit_bytes=None):
    global _BUFFERED_1_OK
    B, S = input_ids.shape
    V, E = word_table.shape
    assert pos_table.shape[0] >= S, "position table shorter than sequence"

    tile, chunk, pos_streamed = _pick_tiles(S, max_tile, target_chunk)
    assert chunk % _UNROLL == 0
    assert V >= chunk, "coarse-wait descriptor aliases the first `chunk` table rows"

    rows = B * S
    n_tiles = -(-rows // tile)
    rows_padded = n_tiles * tile

    ids_flat = input_ids.reshape(rows).astype(jnp.int32)
    tt_flat = token_type_ids.reshape(rows, 1).astype(jnp.int32)
    if rows_padded != rows:
        pad = rows_padded - rows
        ids_flat = jnp.concatenate([ids_flat, jnp.zeros((pad,), jnp.int32)])
        tt_flat = jnp.concatenate([tt_flat, jnp.zeros((pad, 1), jnp.int32)])

    # Gather scratch dtype must equal the table dtype (DMA src/dst byte accounting).
    word_dtype = word_table.dtype

    if pos_streamed:
        reps = -(-rows_padded // S)
        pos_arr = jnp.tile(pos_table[:S], (reps, 1))[:rows_padded]     # (rows_padded, E)
    else:
        pos_arr = jnp.tile(pos_table[:S], (chunk // S, 1))             # (chunk, E)

    gamma2 = gamma.reshape(1, E)
    beta2 = beta.reshape(1, E)

    kernel = functools.partial(_bert_emb_kernel, eps=eps, vocab=V, chunk=chunk,
                               unroll=_UNROLL, pos_streamed=pos_streamed)

    def run(single_buffer_consts):
        const_kw = ({"pipeline_mode": pl.Buffered(1)} if single_buffer_consts else {})
        if pos_streamed:
            pos_spec = pl.BlockSpec((tile, E), lambda i, ids: (i, 0))       # changes per tile
        else:
            pos_spec = pl.BlockSpec((chunk, E), lambda i, ids: (0, 0), **const_kw)
        in_specs = [
            pl.BlockSpec((tile, 1), lambda i, ids: (i, 0)),                 # token-type ids
            pl.BlockSpec(memory_space=pl.ANY),                              # word table (HBM)
            pos_spec,                                                       # positional block
            pl.BlockSpec((2, E), lambda i, ids: (0, 0), **const_kw),        # token-type table
            pl.BlockSpec((1, E), lambda i, ids: (0, 0), **const_kw),        # LayerNorm gamma
            pl.BlockSpec((1, E), lambda i, ids: (0, 0), **const_kw),        # LayerNorm beta
        ]
        cp_kwargs = dict(dimension_semantics=("parallel",))
        if vmem_limit_bytes is not None:
            cp_kwargs["vmem_limit_bytes"] = vmem_limit_bytes
        return pl.pallas_call(
            kernel,
            out_shape=jax.ShapeDtypeStruct((rows_padded, E), out_dtype),
            grid_spec=pltpu.PrefetchScalarGridSpec(
                num_scalar_prefetch=1,                                      # ids -> SMEM
                grid=(n_tiles,),
                in_specs=in_specs,
                out_specs=pl.BlockSpec((tile, E), lambda i, ids: (i, 0)),
                scratch_shapes=[
                    pltpu.VMEM((chunk, E), word_dtype),                     # gather buffer 0
                    pltpu.VMEM((chunk, E), word_dtype),                     # gather buffer 1
                    pltpu.SemaphoreType.DMA((2,)),
                ],
            ),
            compiler_params=pltpu.CompilerParams(**cp_kwargs),
        )(ids_flat, tt_flat, word_table, pos_arr, type_table, gamma2, beta2)

    if _BUFFERED_1_OK:
        try:
            out = run(single_buffer_consts=True)
        except Exception:
            # pl.Buffered(1) not supported on this jax build -> default double buffering.
            _BUFFERED_1_OK = False
            out = run(single_buffer_consts=False)
    else:
        out = run(single_buffer_consts=False)

    return out[:rows].reshape(B, S, E)


def _reference(input_ids, token_type_ids, word_table, pos_table, type_table,
               gamma, beta, eps=1e-12):
    B, S = input_ids.shape
    pos_ids = jnp.broadcast_to(jnp.arange(S, dtype=jnp.int32)[None, :], (B, S))
    x = (word_table.astype(jnp.float32)[input_ids]
         + pos_table.astype(jnp.float32)[pos_ids]
         + type_table.astype(jnp.float32)[token_type_ids])
    mean = jnp.mean(x, axis=-1, keepdims=True)
    var = jnp.mean((x - mean) ** 2, axis=-1, keepdims=True)
    return ((x - mean) / jnp.sqrt(var + eps) * gamma.astype(jnp.float32)
            + beta.astype(jnp.float32))


if __name__ == "__main__":
    key = jax.random.PRNGKey(0)
    k_w, k_p, k_t, k_g, k_b = jax.random.split(key, 5)

    vocab_size = 256
    embedding_size = 128      # multiple of 128 -> lane-dense blocks
    max_instr_len = 24        # args.max_instr_len (covers both test sequence lengths)
    padding_idx = 0

    word_table = 0.02 * jax.random.normal(k_w, (vocab_size, embedding_size), jnp.float32)
    word_table = word_table.at[padding_idx].set(0.0)    # nn.Embedding padding_idx row
    pos_table = 0.02 * jax.random.normal(k_p, (max_instr_len, embedding_size), jnp.float32)
    type_table = 0.02 * jax.random.normal(k_t, (2, embedding_size), jnp.float32)
    gamma = 1.0 + 0.01 * jax.random.normal(k_g, (embedding_size,), jnp.float32)
    beta = 0.01 * jax.random.normal(k_b, (embedding_size,), jnp.float32)

    def check(B, S, tables, max_tile, target_chunk, atol):
        wt, pt, ty = tables
        kb = jax.random.fold_in(key, B * 1000 + S)
        input_ids = jax.random.randint(jax.random.fold_in(kb, 0), (B, S), 0,
                                       vocab_size, dtype=jnp.int32)
        token_type_ids = jax.random.randint(jax.random.fold_in(kb, 1), (B, S), 0, 2,
                                            dtype=jnp.int32)
        out = bert_embeddings(input_ids, token_type_ids, wt, pt, ty, gamma, beta,
                              max_tile=max_tile, target_chunk=target_chunk)
        out = jax.block_until_ready(out)
        ref = _reference(input_ids, token_type_ids, wt, pt, ty, gamma, beta)
        assert out.shape == (B, S, embedding_size)
        err = float(jnp.max(jnp.abs(out - ref)))
        assert err < atol, err

    f32_tabs = (word_table, pos_table, type_table)
    bf16_tabs = tuple(t.astype(jnp.bfloat16) for t in f32_tabs)

    # 1) f32 tables, chunk-periodic positions (tile=32, chunk=16, grid=3, padded rows).
    check(5, 16, f32_tabs, max_tile=32, target_chunk=16, atol=1e-5)
    # 2) bf16 tables resident in HBM (half the gather bytes / VMEM), f32 LayerNorm math.
    check(5, 16, bf16_tabs, max_tile=32, target_chunk=16, atol=1e-5)
    # 3) lcm(S, 8) > tile -> streamed per-row positional slab path (bounded VMEM).
    check(3, 24, f32_tabs, max_tile=16, target_chunk=8, atol=1e-5)

    print("KERNEL_OK")
</pallas_src>

<mosaic_0001>
module attributes {stable_mosaic.version = 11 : i64} {
  func.func @_bert_emb_kernel(%arg0: i32, %arg1: memref<96xi32, #tpu.memory_space<smem>>, %arg2: memref<32x1xi32, #tpu.memory_space<vmem>>, %arg3: memref<256x128xf32, #tpu.memory_space<any>>, %arg4: memref<16x128xf32, #tpu.memory_space<vmem>>, %arg5: memref<2x128xf32, #tpu.memory_space<vmem>>, %arg6: memref<1x128xf32, #tpu.memory_space<vmem>>, %arg7: memref<1x128xf32, #tpu.memory_space<vmem>>, %arg8: memref<32x128xf32, #tpu.memory_space<vmem>>, %arg9: memref<16x128xf32, #tpu.memory_space<vmem>>, %arg10: memref<16x128xf32, #tpu.memory_space<vmem>>, %arg11: memref<2x!tpu.dma_semaphore, #tpu.memory_space<semaphore_mem>>) attributes {dimension_semantics = [#tpu.dimension_semantics<parallel>], iteration_bounds = array<i64: 3>, scalar_prefetch = 1 : i64, scratch_operands = 3 : i64, tpu.core_type = #tpu.core_type<tc>, window_params = [{transform_indices = @transform_0, window_bounds = array<i64: 32, 1>}, {}, {pipeline_mode = #tpu.pipeline_mode<synchronous>, transform_indices = @transform_2, window_bounds = array<i64: 16, 128>}, {pipeline_mode = #tpu.pipeline_mode<synchronous>, transform_indices = @transform_3, window_bounds = array<i64: 2, 128>}, {pipeline_mode = #tpu.pipeline_mode<synchronous>, transform_indices = @transform_4, window_bounds = array<i64: 1, 128>}, {pipeline_mode = #tpu.pipeline_mode<synchronous>, transform_indices = @transform_5, window_bounds = array<i64: 1, 128>}, {transform_indices = @transform_6, window_bounds = array<i64: 32, 128>}]} {
    %c32_i32 = arith.constant 32 : i32
    %0 = arith.muli %arg0, %c32_i32 : i32
    %c0 = arith.constant 0 : index
    %c0_0 = arith.constant 0 : index
    %1 = vector.load %arg5[%c0, %c0_0] : memref<2x128xf32, #tpu.memory_space<vmem>>, vector<1x128xf32>
    %c1 = arith.constant 1 : index
    %c0_1 = arith.constant 0 : index
    %2 = vector.load %arg5[%c1, %c0_1] : memref<2x128xf32, #tpu.memory_space<vmem>>, vector<1x128xf32>
    %3 = arith.subf %2, %1 : vector<1x128xf32>
    %c0_2 = arith.constant 0 : index
    %c0_3 = arith.constant 0 : index
    %4 = vector.load %arg6[%c0_2, %c0_3] : memref<1x128xf32, #tpu.memory_space<vmem>>, vector<1x128xf32>
    %c0_4 = arith.constant 0 : index
    %c0_5 = arith.constant 0 : index
    %5 = vector.load %arg7[%c0_4, %c0_5] : memref<1x128xf32, #tpu.memory_space<vmem>>, vector<1x128xf32>
    %c0_6 = arith.constant 0 : index
    %c0_7 = arith.constant 0 : index
    %6 = vector.load %arg4[%c0_6, %c0_7] : memref<16x128xf32, #tpu.memory_space<vmem>>, vector<16x128xf32>
    %c0_i32 = arith.constant 0 : i32
    %7 = arith.addi %0, %c0_i32 : i32
    %c0_i32_8 = arith.constant 0 : i32
    %c8_i32 = arith.constant 8 : i32
    %8 = arith.muli %c0_i32_8, %c8_i32 : i32
    %c0_i32_9 = arith.constant 0 : i32
    %9 = arith.addi %8, %c0_i32_9 : i32
    %10 = arith.addi %7, %9 : i32
    %11 = arith.index_cast %10 : i32 to index
    %12 = memref.load %arg1[%11] : memref<96xi32, #tpu.memory_space<smem>>
    %c0_i32_10 = arith.constant 0 : i32
    %c255_i32 = arith.constant 255 : i32
    %13 = arith.maxsi %c0_i32_10, %12 : i32
    %14 = arith.minsi %c255_i32, %13 : i32
    %c0_i32_11 = arith.constant 0 : i32
    %c0_i32_12 = arith.constant 0 : i32
    %15 = tpu.memref_slice %arg3[%14, %c0_i32_12] : memref<256x128xf32, #tpu.memory_space<any>> -> memref<1x128xf32, #tpu.memory_space<any>>
    %c0_i32_13 = arith.constant 0 : i32
    %16 = tpu.memref_slice %arg9[%9, %c0_i32_13] : memref<16x128xf32, #tpu.memory_space<vmem>> -> memref<1x128xf32, #tpu.memory_space<vmem>>
    %17 = tpu.memref_slice %arg11[%c0_i32_11] : memref<2x!tpu.dma_semaphore, #tpu.memory_space<semaphore_mem>> -> memref<1x!tpu.dma_semaphore, #tpu.memory_space<semaphore_mem>>
    %18 = tpu.memref_squeeze %17 : memref<1x!tpu.dma_semaphore, #tpu.memory_space<semaphore_mem>> -> memref<!tpu.dma_semaphore, #tpu.memory_space<semaphore_mem>>
    tpu.enqueue_dma source(%15 : memref<1x128xf32, #tpu.memory_space<any>>) target(%16 : memref<1x128xf32, #tpu.memory_space<vmem>>) target_semaphore(%18 : memref<!tpu.dma_semaphore, #tpu.memory_space<semaphore_mem>>)
    %c1_i32 = arith.constant 1 : i32
    %19 = arith.addi %8, %c1_i32 : i32
    %20 = arith.addi %7, %19 : i32
    %21 = arith.index_cast %20 : i32 to index
    %22 = memref.load %arg1[%21] : memref<96xi32, #tpu.memory_space<smem>>
    %c0_i32_14 = arith.constant 0 : i32
    %c255_i32_15 = arith.constant 255 : i32
    %23 = arith.maxsi %c0_i32_14, %22 : i32
    %24 = arith.minsi %c255_i32_15, %23 : i32
    %c0_i32_16 = arith.constant 0 : i32
    %c0_i32_17 = arith.constant 0 : i32
    %25 = tpu.memref_slice %arg3[%24, %c0_i32_17] : memref<256x128xf32, #tpu.memory_space<any>> -> memref<1x128xf32, #tpu.memory_space<any>>
    %c0_i32_18 = arith.constant 0 : i32
    %26 = tpu.memref_slice %arg9[%19, %c0_i32_18] : memref<16x128xf32, #tpu.memory_space<vmem>> -> memref<1x128xf32, #tpu.memory_space<vmem>>
    %27 = tpu.memref_slice %arg11[%c0_i32_16] : memref<2x!tpu.dma_semaphore, #tpu.memory_space<semaphore_mem>> -> memref<1x!tpu.dma_semaphore, #tpu.memory_space<semaphore_mem>>
    %28 = tpu.memref_squeeze %27 : memref<1x!tpu.dma_semaphore, #tpu.memory_space<semaphore_mem>> -> memref<!tpu.dma_semaphore, #tpu.memory_space<semaphore_mem>>
    tpu.enqueue_dma source(%25 : memref<1x128xf32, #tpu.memory_space<any>>) target(%26 : memref<1x128xf32, #tpu.memory_space<vmem>>) target_semaphore(%28 : memref<!tpu.dma_semaphore, #tpu.memory_space<semaphore_mem>>)
    %c2_i32 = arith.constant 2 : i32
    %29 = arith.addi %8, %c2_i32 : i32
    %30 = arith.addi %7, %29 : i32
    %31 = arith.index_cast %30 : i32 to index
    %32 = memref.load %arg1[%31] : memref<96xi32, #tpu.memory_space<smem>>
    %c0_i32_19 = arith.constant 0 : i32
    %c255_i32_20 = arith.constant 255 : i32
    %33 = arith.maxsi %c0_i32_19, %32 : i32
    %34 = arith.minsi %c255_i32_20, %33 : i32
    %c0_i32_21 = arith.constant 0 : i32
    %c0_i32_22 = arith.constant 0 : i32
    %35 = tpu.memref_slice %arg3[%34, %c0_i32_22] : memref<256x128xf32, #tpu.memory_space<any>> -> memref<1x128xf32, #tpu.memory_space<any>>
    %c0_i32_23 = arith.constant 0 : i32
    %36 = tpu.memref_slice %arg9[%29, %c0_i32_23] : memref<16x128xf32, #tpu.memory_space<vmem>> -> memref<1x128xf32, #tpu.memory_space<vmem>>
    %37 = tpu.memref_slice %arg11[%c0_i32_21] : memref<2x!tpu.dma_semaphore, #tpu.memory_space<semaphore_mem>> -> memref<1x!tpu.dma_semaphore, #tpu.memory_space<semaphore_mem>>
    %38 = tpu.memref_squeeze %37 : memref<1x!tpu.dma_semaphore, #tpu.memory_space<semaphore_mem>> -> memref<!tpu.dma_semaphore, #tpu.memory_space<semaphore_mem>>
    tpu.enqueue_dma source(%35 : memref<1x128xf32, #tpu.memory_space<any>>) target(%36 : memref<1x128xf32, #tpu.memory_space<vmem>>) target_semaphore(%38 : memref<!tpu.dma_semaphore, #tpu.memory_space<semaphore_mem>>)
    %c3_i32 = arith.constant 3 : i32
    %39 = arith.addi %8, %c3_i32 : i32
    %40 = arith.addi %7, %39 : i32
    %41 = arith.index_cast %40 : i32 to index
    %42 = memref.load %arg1[%41] : memref<96xi32, #tpu.memory_space<smem>>
    %c0_i32_24 = arith.constant 0 : i32
    %c255_i32_25 = arith.constant 255 : i32
    %43 = arith.maxsi %c0_i32_24, %42 : i32
    %44 = arith.minsi %c255_i32_25, %43 : i32
    %c0_i32_26 = arith.constant 0 : i32
    %c0_i32_27 = arith.constant 0 : i32
    %45 = tpu.memref_slice %arg3[%44, %c0_i32_27] : memref<256x128xf32, #tpu.memory_space<any>> -> memref<1x128xf32, #tpu.memory_space<any>>
    %c0_i32_28 = arith.constant 0 : i32
    %46 = tpu.memref_slice %arg9[%39, %c0_i32_28] : memref<16x128xf32, #tpu.memory_space<vmem>> -> memref<1x128xf32, #tpu.memory_space<vmem>>
    %47 = tpu.memref_slice %arg11[%c0_i32_26] : memref<2x!tpu.dma_semaphore, #tpu.memory_space<semaphore_mem>> -> memref<1x!tpu.dma_semaphore, #tpu.memory_space<semaphore_mem>>
    %48 = tpu.memref_squeeze %47 : memref<1x!tpu.dma_semaphore, #tpu.memory_space<semaphore_mem>> -> memref<!tpu.dma_semaphore, #tpu.memory_space<semaphore_mem>>
    tpu.enqueue_dma source(%45 : memref<1x128xf32, #tpu.memory_space<any>>) target(%46 : memref<1x128xf32, #tpu.memory_space<vmem>>) target_semaphore(%48 : memref<!tpu.dma_semaphore, #tpu.memory_space<semaphore_mem>>)
    %c4_i32 = arith.constant 4 : i32
    %49 = arith.addi %8, %c4_i32 : i32
    %50 = arith.addi %7, %49 : i32
    %51 = arith.index_cast %50 : i32 to index
    %52 = memref.load %arg1[%51] : memref<96xi32, #tpu.memory_space<smem>>
    %c0_i32_29 = arith.constant 0 : i32
    %c255_i32_30 = arith.constant 255 : i32
    %53 = arith.maxsi %c0_i32_29, %52 : i32
    %54 = arith.minsi %c255_i32_30, %53 : i32
    %c0_i32_31 = arith.constant 0 : i32
    %c0_i32_32 = arith.constant 0 : i32
    %55 = tpu.memref_slice %arg3[%54, %c0_i32_32] : memref<256x128xf32, #tpu.memory_space<any>> -> memref<1x128xf32, #tpu.memory_space<any>>
    %c0_i32_33 = arith.constant 0 : i32
    %56 = tpu.memref_slice %arg9[%49, %c0_i32_33] : memref<16x128xf32, #tpu.memory_space<vmem>> -> memref<1x128xf32, #tpu.memory_space<vmem>>
    %57 = tpu.memref_slice %arg11[%c0_i32_31] : memref<2x!tpu.dma_semaphore, #tpu.memory_space<semaphore_mem>> -> memref<1x!tpu.dma_semaphore, #tpu.memory_space<semaphore_mem>>
    %58 = tpu.memref_squeeze %57 : memref<1x!tpu.dma_semaphore, #tpu.memory_space<semaphore_mem>> -> memref<!tpu.dma_semaphore, #tpu.memory_space<semaphore_mem>>
    tpu.enqueue_dma source(%55 : memref<1x128xf32, #tpu.memory_space<any>>) target(%56 : memref<1x128xf32, #tpu.memory_space<vmem>>) target_semaphore(%58 : memref<!tpu.dma_semaphore, #tpu.memory_space<semaphore_mem>>)
    %c5_i32 = arith.constant 5 : i32
    %59 = arith.addi %8, %c5_i32 : i32
    %60 = arith.addi %7, %59 : i32
    %61 = arith.index_cast %60 : i32 to index
    %62 = memref.load %arg1[%61] : memref<96xi32, #tpu.memory_space<smem>>
    %c0_i32_34 = arith.constant 0 : i32
    %c255_i32_35 = arith.constant 255 : i32
    %63 = arith.maxsi %c0_i32_34, %62 : i32
    %64 = arith.minsi %c255_i32_35, %63 : i32
    %c0_i32_36 = arith.constant 0 : i32
    %c0_i32_37 = arith.constant 0 : i32
    %65 = tpu.memref_slice %arg3[%64, %c0_i32_37] : memref<256x128xf32, #tpu.memory_space<any>> -> memref<1x128xf32, #tpu.memory_space<any>>
    %c0_i32_38 = arith.constant 0 : i32
    %66 = tpu.memref_slice %arg9[%59, %c0_i32_38] : memref<16x128xf32, #tpu.memory_space<vmem>> -> memref<1x128xf32, #tpu.memory_space<vmem>>
    %67 = tpu.memref_slice %arg11[%c0_i32_36] : memref<2x!tpu.dma_semaphore, #tpu.memory_space<semaphore_mem>> -> memref<1x!tpu.dma_semaphore, #tpu.memory_space<semaphore_mem>>
    %68 = tpu.memref_squeeze %67 : memref<1x!tpu.dma_semaphore, #tpu.memory_space<semaphore_mem>> -> memref<!tpu.dma_semaphore, #tpu.memory_space<semaphore_mem>>
    tpu.enqueue_dma source(%65 : memref<1x128xf32, #tpu.memory_space<any>>) target(%66 : memref<1x128xf32, #tpu.memory_space<vmem>>) target_semaphore(%68 : memref<!tpu.dma_semaphore, #tpu.memory_space<semaphore_mem>>)
    %c6_i32 = arith.constant 6 : i32
    %69 = arith.addi %8, %c6_i32 : i32
    %70 = arith.addi %7, %69 : i32
    %71 = arith.index_cast %70 : i32 to index
    %72 = memref.load %arg1[%71] : memref<96xi32, #tpu.memory_space<smem>>
    %c0_i32_39 = arith.constant 0 : i32
    %c255_i32_40 = arith.constant 255 : i32
    %73 = arith.maxsi %c0_i32_39, %72 : i32
    %74 = arith.minsi %c255_i32_40, %73 : i32
    %c0_i32_41 = arith.constant 0 : i32
    %c0_i32_42 = arith.constant 0 : i32
    %75 = tpu.memref_slice %arg3[%74, %c0_i32_42] : memref<256x128xf32, #tpu.memory_space<any>> -> memref<1x128xf32, #tpu.memory_space<any>>
    %c0_i32_43 = arith.constant 0 : i32
    %76 = tpu.memref_slice %arg9[%69, %c0_i32_43] : memref<16x128xf32, #tpu.memory_space<vmem>> -> memref<1x128xf32, #tpu.memory_space<vmem>>
    %77 = tpu.memref_slice %arg11[%c0_i32_41] : memref<2x!tpu.dma_semaphore, #tpu.memory_space<semaphore_mem>> -> memref<1x!tpu.dma_semaphore, #tpu.memory_space<semaphore_mem>>
    %78 = tpu.memref_squeeze %77 : memref<1x!tpu.dma_semaphore, #tpu.memory_space<semaphore_mem>> -> memref<!tpu.dma_semaphore, #tpu.memory_space<semaphore_mem>>
    tpu.enqueue_dma source(%75 : memref<1x128xf32, #tpu.memory_space<any>>) target(%76 : memref<1x128xf32, #tpu.memory_space<vmem>>) target_semaphore(%78 : memref<!tpu.dma_semaphore, #tpu.memory_space<semaphore_mem>>)
    %c7_i32 = arith.constant 7 : i32
    %79 = arith.addi %8, %c7_i32 : i32
    %80 = arith.addi %7, %79 : i32
    %81 = arith.index_cast %80 : i32 to index
    %82 = memref.load %arg1[%81] : memref<96xi32, #tpu.memory_space<smem>>
    %c0_i32_44 = arith.constant 0 : i32
    %c255_i32_45 = arith.constant 255 : i32
    %83 = arith.maxsi %c0_i32_44, %82 : i32
    %84 = arith.minsi %c255_i32_45, %83 : i32
    %c0_i32_46 = arith.constant 0 : i32
    %c0_i32_47 = arith.constant 0 : i32
    %85 = tpu.memref_slice %arg3[%84, %c0_i32_47] : memref<256x128xf32, #tpu.memory_space<any>> -> memref<1x128xf32, #tpu.memory_space<any>>
    %c0_i32_48 = arith.constant 0 : i32
    %86 = tpu.memref_slice %arg9[%79, %c0_i32_48] : memref<16x128xf32, #tpu.memory_space<vmem>> -> memref<1x128xf32, #tpu.memory_space<vmem>>
    %87 = tpu.memref_slice %arg11[%c0_i32_46] : memref<2x!tpu.dma_semaphore, #tpu.memory_space<semaphore_mem>> -> memref<1x!tpu.dma_semaphore, #tpu.memory_space<semaphore_mem>>
    %88 = tpu.memref_squeeze %87 : memref<1x!tpu.dma_semaphore, #tpu.memory_space<semaphore_mem>> -> memref<!tpu.dma_semaphore, #tpu.memory_space<semaphore_mem>>
    tpu.enqueue_dma source(%85 : memref<1x128xf32, #tpu.memory_space<any>>) target(%86 : memref<1x128xf32, #tpu.memory_space<vmem>>) target_semaphore(%88 : memref<!tpu.dma_semaphore, #tpu.memory_space<semaphore_mem>>)
    %c1_i32_49 = arith.constant 1 : i32
    %c8_i32_50 = arith.constant 8 : i32
    %89 = arith.muli %c1_i32_49, %c8_i32_50 : i32
    %c0_i32_51 = arith.constant 0 : i32
    %90 = arith.addi %89, %c0_i32_51 : i32
    %91 = arith.addi %7, %90 : i32
    %92 = arith.index_cast %91 : i32 to index
    %93 = memref.load %arg1[%92] : memref<96xi32, #tpu.memory_space<smem>>
    %c0_i32_52 = arith.constant 0 : i32
    %c255_i32_53 = arith.constant 255 : i32
    %94 = arith.maxsi %c0_i32_52, %93 : i32
    %95 = arith.minsi %c255_i32_53, %94 : i32
    %c0_i32_54 = arith.constant 0 : i32
    %c0_i32_55 = arith.constant 0 : i32
    %96 = tpu.memref_slice %arg3[%95, %c0_i32_55] : memref<256x128xf32, #tpu.memory_space<any>> -> memref<1x128xf32, #tpu.memory_space<any>>
    %c0_i32_56 = arith.constant 0 : i32
    %97 = tpu.memref_slice %arg9[%90, %c0_i32_56] : memref<16x128xf32, #tpu.memory_space<vmem>> -> memref<1x128xf32, #tpu.memory_space<vmem>>
    %98 = tpu.memref_slice %arg11[%c0_i32_54] : memref<2x!tpu.dma_semaphore, #tpu.memory_space<semaphore_mem>> -> memref<1x!tpu.dma_semaphore, #tpu.memory_space<semaphore_mem>>
    %99 = tpu.memref_squeeze %98 : memref<1x!tpu.dma_semaphore, #tpu.memory_space<semaphore_mem>> -> memref<!tpu.dma_semaphore, #tpu.memory_space<semaphore_mem>>
    tpu.enqueue_dma source(%96 : memref<1x128xf32, #tpu.memory_space<any>>) target(%97 : memref<1x128xf32, #tpu.memory_space<vmem>>) target_semaphore(%99 : memref<!tpu.dma_semaphore, #tpu.memory_space<semaphore_mem>>)
    %c1_i32_57 = arith.constant 1 : i32
    %100 = arith.addi %89, %c1_i32_57 : i32
    %101 = arith.addi %7, %100 : i32
    %102 = arith.index_cast %101 : i32 to index
    %103 = memref.load %arg1[%102] : memref<96xi32, #tpu.memory_space<smem>>
    %c0_i32_58 = arith.constant 0 : i32
    %c255_i32_59 = arith.constant 255 : i32
    %104 = arith.maxsi %c0_i32_58, %103 : i32
    %105 = arith.minsi %c255_i32_59, %104 : i32
    %c0_i32_60 = arith.constant 0 : i32
    %c0_i32_61 = arith.constant 0 : i32
    %106 = tpu.memref_slice %arg3[%105, %c0_i32_61] : memref<256x128xf32, #tpu.memory_space<any>> -> memref<1x128xf32, #tpu.memory_space<any>>
    %c0_i32_62 = arith.constant 0 : i32
    %107 = tpu.memref_slice %arg9[%100, %c0_i32_62] : memref<16x128xf32, #tpu.memory_space<vmem>> -> memref<1x128xf32, #tpu.memory_space<vmem>>
    %108 = tpu.memref_slice %arg11[%c0_i32_60] : memref<2x!tpu.dma_semaphore, #tpu.memory_space<semaphore_mem>> -> memref<1x!tpu.dma_semaphore, #tpu.memory_space<semaphore_mem>>
    %109 = tpu.memref_squeeze %108 : memref<1x!tpu.dma_semaphore, #tpu.memory_space<semaphore_mem>> -> memref<!tpu.dma_semaphore, #tpu.memory_space<semaphore_mem>>
    tpu.enqueue_dma source(%106 : memref<1x128xf32, #tpu.memory_space<any>>) target(%107 : memref<1x128xf32, #tpu.memory_space<vmem>>) target_semaphore(%109 : memref<!tpu.dma_semaphore, #tpu.memory_space<semaphore_mem>>)
    %c2_i32_63 = arith.constant 2 : i32
    %110 = arith.addi %89, %c2_i32_63 : i32
    %111 = arith.addi %7, %110 : i32
    %112 = arith.index_cast %111 : i32 to index
    %113 = memref.load %arg1[%112] : memref<96xi32, #tpu.memory_space<smem>>
    %c0_i32_64 = arith.constant 0 : i32
    %c255_i32_65 = arith.constant 255 : i32
    %114 = arith.maxsi %c0_i32_64, %113 : i32
    %115 = arith.minsi %c255_i32_65, %114 : i32
    %c0_i32_66 = arith.constant 0 : i32
    %c0_i32_67 = arith.constant 0 : i32
    %116 = tpu.memref_slice %arg3[%115, %c0_i32_67] : memref<256x128xf32, #tpu.memory_space<any>> -> memref<1x128xf32, #tpu.memory_space<any>>
    %c0_i32_68 = arith.constant 0 : i32
    %117 = tpu.memref_slice %arg9[%110, %c0_i32_68] : memref<16x128xf32, #tpu.memory_space<vmem>> -> memref<1x128xf32, #tpu.memory_space<vmem>>
    %118 = tpu.memref_slice %arg11[%c0_i32_66] : memref<2x!tpu.dma_semaphore, #tpu.memory_space<semaphore_mem>> -> memref<1x!tpu.dma_semaphore, #tpu.memory_space<semaphore_mem>>
    %119 = tpu.memref_squeeze %118 : memref<1x!tpu.dma_semaphore, #tpu.memory_space<semaphore_mem>> -> memref<!tpu.dma_semaphore, #tpu.memory_space<semaphore_mem>>
    tpu.enqueue_dma source(%116 : memref<1x128xf32, #tpu.memory_space<any>>) target(%117 : memref<1x128xf32, #tpu.memory_space<vmem>>) target_semaphore(%119 : memref<!tpu.dma_semaphore, #tpu.memory_space<semaphore_mem>>)
    %c3_i32_69 = arith.constant 3 : i32
    %120 = arith.addi %89, %c3_i32_69 : i32
    %121 = arith.addi %7, %120 : i32
    %122 = arith.index_cast %121 : i32 to index
    %123 = memref.load %arg1[%122] : memref<96xi32, #tpu.memory_space<smem>>
    %c0_i32_70 = arith.constant 0 : i32
    %c255_i32_71 = arith.constant 255 : i32
    %124 = arith.maxsi %c0_i32_70, %123 : i32
    %125 = arith.minsi %c255_i32_71, %124 : i32
    %c0_i32_72 = arith.constant 0 : i32
    %c0_i32_73 = arith.constant 0 : i32
    %126 = tpu.memref_slice %arg3[%125, %c0_i32_73] : memref<256x128xf32, #tpu.memory_space<any>> -> memref<1x128xf32, #tpu.memory_space<any>>
    %c0_i32_74 = arith.constant 0 : i32
    %127 = tpu.memref_slice %arg9[%120, %c0_i32_74] : memref<16x128xf32, #tpu.memory_space<vmem>> -> memref<1x128xf32, #tpu.memory_space<vmem>>
    %128 = tpu.memref_slice %arg11[%c0_i32_72] : memref<2x!tpu.dma_semaphore, #tpu.memory_space<semaphore_mem>> -> memref<1x!tpu.dma_semaphore, #tpu.memory_space<semaphore_mem>>
    %129 = tpu.memref_squeeze %128 : memref<1x!tpu.dma_semaphore, #tpu.memory_space<semaphore_mem>> -> memref<!tpu.dma_semaphore, #tpu.memory_space<semaphore_mem>>
    tpu.enqueue_dma source(%126 : memref<1x128xf32, #tpu.memory_space<any>>) target(%127 : memref<1x128xf32, #tpu.memory_space<vmem>>) target_semaphore(%129 : memref<!tpu.dma_semaphore, #tpu.memory_space<semaphore_mem>>)
    %c4_i32_75 = arith.constant 4 : i32
    %130 = arith.addi %89, %c4_i32_75 : i32
    %131 = arith.addi %7, %130 : i32
    %132 = arith.index_cast %131 : i32 to index
    %133 = memref.load %arg1[%132] : memref<96xi32, #tpu.memory_space<smem>>
    %c0_i32_76 = arith.constant 0 : i32
    %c255_i32_77 = arith.constant 255 : i32
    %134 = arith.maxsi %c0_i32_76, %133 : i32
    %135 = arith.minsi %c255_i32_77, %134 : i32
    %c0_i32_78 = arith.constant 0 : i32
    %c0_i32_79 = arith.constant 0 : i32
    %136 = tpu.memref_slice %arg3[%135, %c0_i32_79] : memref<256x128xf32, #tpu.memory_space<any>> -> memref<1x128xf32, #tpu.memory_space<any>>
    %c0_i32_80 = arith.constant 0 : i32
    %137 = tpu.memref_slice %arg9[%130, %c0_i32_80] : memref<16x128xf32, #tpu.memory_space<vmem>> -> memref<1x128xf32, #tpu.memory_space<vmem>>
    %138 = tpu.memref_slice %arg11[%c0_i32_78] : memref<2x!tpu.dma_semaphore, #tpu.memory_space<semaphore_mem>> -> memref<1x!tpu.dma_semaphore, #tpu.memory_space<semaphore_mem>>
    %139 = tpu.memref_squeeze %138 : memref<1x!tpu.dma_semaphore, #tpu.memory_space<semaphore_mem>> -> memref<!tpu.dma_semaphore, #tpu.memory_space<semaphore_mem>>
    tpu.enqueue_dma source(%136 : memref<1x128xf32, #tpu.memory_space<any>>) target(%137 : memref<1x128xf32, #tpu.memory_space<vmem>>) target_semaphore(%139 : memref<!tpu.dma_semaphore, #tpu.memory_space<semaphore_mem>>)
    %c5_i32_81 = arith.constant 5 : i32
    %140 = arith.addi %89, %c5_i32_81 : i32
    %141 = arith.addi %7, %140 : i32
    %142 = arith.index_cast %141 : i32 to index
    %143 = memref.load %arg1[%142] : memref<96xi32, #tpu.memory_space<smem>>
    %c0_i32_82 = arith.constant 0 : i32
    %c255_i32_83 = arith.constant 255 : i32
    %144 = arith.maxsi %c0_i32_82, %143 : i32
    %145 = arith.minsi %c255_i32_83, %144 : i32
    %c0_i32_84 = arith.constant 0 : i32
    %c0_i32_85 = arith.constant 0 : i32
    %146 = tpu.memref_slice %arg3[%145, %c0_i32_85] : memref<256x128xf32, #tpu.memory_space<any>> -> memref<1x128xf32, #tpu.memory_space<any>>
    %c0_i32_86 = arith.constant 0 : i32
    %147 = tpu.memref_slice %arg9[%140, %c0_i32_86] : memref<16x128xf32, #tpu.memory_space<vmem>> -> memref<1x128xf32, #tpu.memory_space<vmem>>
    %148 = tpu.memref_slice %arg11[%c0_i32_84] : memref<2x!tpu.dma_semaphore, #tpu.memory_space<semaphore_mem>> -> memref<1x!tpu.dma_semaphore, #tpu.memory_space<semaphore_mem>>
    %149 = tpu.memref_squeeze %148 : memref<1x!tpu.dma_semaphore, #tpu.memory_space<semaphore_mem>> -> memref<!tpu.dma_semaphore, #tpu.memory_space<semaphore_mem>>
    tpu.enqueue_dma source(%146 : memref<1x128xf32, #tpu.memory_space<any>>) target(%147 : memref<1x128xf32, #tpu.memory_space<vmem>>) target_semaphore(%149 : memref<!tpu.dma_semaphore, #tpu.memory_space<semaphore_mem>>)
    %c6_i32_87 = arith.constant 6 : i32
    %150 = arith.addi %89, %c6_i32_87 : i32
    %151 = arith.addi %7, %150 : i32
    %152 = arith.index_cast %151 : i32 to index
    %153 = memref.load %arg1[%152] : memref<96xi32, #tpu.memory_space<smem>>
    %c0_i32_88 = arith.constant 0 : i32
    %c255_i32_89 = arith.constant 255 : i32
    %154 = arith.maxsi %c0_i32_88, %153 : i32
    %155 = arith.minsi %c255_i32_89, %154 : i32
    %c0_i32_90 = arith.constant 0 : i32
    %c0_i32_91 = arith.constant 0 : i32
    %156 = tpu.memref_slice %arg3[%155, %c0_i32_91] : memref<256x128xf32, #tpu.memory_space<any>> -> memref<1x128xf32, #tpu.memory_space<any>>
    %c0_i32_92 = arith.constant 0 : i32
    %157 = tpu.memref_slice %arg9[%150, %c0_i32_92] : memref<16x128xf32, #tpu.memory_space<vmem>> -> memref<1x128xf32, #tpu.memory_space<vmem>>
    %158 = tpu.memref_slice %arg11[%c0_i32_90] : memref<2x!tpu.dma_semaphore, #tpu.memory_space<semaphore_mem>> -> memref<1x!tpu.dma_semaphore, #tpu.memory_space<semaphore_mem>>
    %159 = tpu.memref_squeeze %158 : memref<1x!tpu.dma_semaphore, #tpu.memory_space<semaphore_mem>> -> memref<!tpu.dma_semaphore, #tpu.memory_space<semaphore_mem>>
    tpu.enqueue_dma source(%156 : memref<1x128xf32, #tpu.memory_space<any>>) target(%157 : memref<1x128xf32, #tpu.memory_space<vmem>>) target_semaphore(%159 : memref<!tpu.dma_semaphore, #tpu.memory_space<semaphore_mem>>)
    %c7_i32_93 = arith.constant 7 : i32
    %160 = arith.addi %89, %c7_i32_93 : i32
    %161 = arith.addi %7, %160 : i32
    %162 = arith.index_cast %161 : i32 to index
    %163 = memref.load %arg1[%162] : memref<96xi32, #tpu.memory_space<smem>>
    %c0_i32_94 = arith.constant 0 : i32
    %c255_i32_95 = arith.constant 255 : i32
    %164 = arith.maxsi %c0_i32_94, %163 : i32
    %165 = arith.minsi %c255_i32_95, %164 : i32
    %c0_i32_96 = arith.constant 0 : i32
    %c0_i32_97 = arith.constant 0 : i32
    %166 = tpu.memref_slice %arg3[%165, %c0_i32_97] : memref<256x128xf32, #tpu.memory_space<any>> -> memref<1x128xf32, #tpu.memory_space<any>>
    %c0_i32_98 = arith.constant 0 : i32
    %167 = tpu.memref_slice %arg9[%160, %c0_i32_98] : memref<16x128xf32, #tpu.memory_space<vmem>> -> memref<1x128xf32, #tpu.memory_space<vmem>>
    %168 = tpu.memref_slice %arg11[%c0_i32_96] : memref<2x!tpu.dma_semaphore, #tpu.memory_space<semaphore_mem>> -> memref<1x!tpu.dma_semaphore, #tpu.memory_space<semaphore_mem>>
    %169 = tpu.memref_squeeze %168 : memref<1x!tpu.dma_semaphore, #tpu.memory_space<semaphore_mem>> -> memref<!tpu.dma_semaphore, #tpu.memory_space<semaphore_mem>>
    tpu.enqueue_dma source(%166 : memref<1x128xf32, #tpu.memory_space<any>>) target(%167 : memref<1x128xf32, #tpu.memory_space<vmem>>) target_semaphore(%169 : memref<!tpu.dma_semaphore, #tpu.memory_space<semaphore_mem>>)
    %c2_i32_99 = arith.constant 2 : i32
    %c16_i32 = arith.constant 16 : i32
    %170 = arith.addi %0, %c16_i32 : i32
    %c0_i32_100 = arith.constant 0 : i32
    %c8_i32_101 = arith.constant 8 : i32
    %171 = arith.muli %c0_i32_100, %c8_i32_101 : i32
    %c0_i32_102 = arith.constant 0 : i32
    %172 = arith.addi %171, %c0_i32_102 : i32
    %173 = arith.addi %170, %172 : i32
    %174 = arith.index_cast %173 : i32 to index
    %175 = memref.load %arg1[%174] : memref<96xi32, #tpu.memory_space<smem>>
    %c0_i32_103 = arith.constant 0 : i32
    %c255_i32_104 = arith.constant 255 : i32
    %176 = arith.maxsi %c0_i32_103, %175 : i32
    %177 = arith.minsi %c255_i32_104, %176 : i32
    %c1_i32_105 = arith.constant 1 : i32
    %c0_i32_106 = arith.constant 0 : i32
    %178 = tpu.memref_slice %arg3[%177, %c0_i32_106] : memref<256x128xf32, #tpu.memory_space<any>> -> memref<1x128xf32, #tpu.memory_space<any>>
    %c0_i32_107 = arith.constant 0 : i32
    %179 = tpu.memref_slice %arg10[%172, %c0_i32_107] : memref<16x128xf32, #tpu.memory_space<vmem>> -> memref<1x128xf32, #tpu.memory_space<vmem>>
    %180 = tpu.memref_slice %arg11[%c1_i32_105] : memref<2x!tpu.dma_semaphore, #tpu.memory_space<semaphore_mem>> -> memref<1x!tpu.dma_semaphore, #tpu.memory_space<semaphore_mem>>
    %181 = tpu.memref_squeeze %180 : memref<1x!tpu.dma_semaphore, #tpu.memory_space<semaphore_mem>> -> memref<!tpu.dma_semaphore, #tpu.memory_space<semaphore_mem>>
    tpu.enqueue_dma source(%178 : memref<1x128xf32, #tpu.memory_space<any>>) target(%179 : memref<1x128xf32, #tpu.memory_space<vmem>>) target_semaphore(%181 : memref<!tpu.dma_semaphore, #tpu.memory_space<semaphore_mem>>)
    %c1_i32_108 = arith.constant 1 : i32
    %182 = arith.addi %171, %c1_i32_108 : i32
    %183 = arith.addi %170, %182 : i32
    %184 = arith.index_cast %183 : i32 to index
    %185 = memref.load %arg1[%184] : memref<96xi32, #tpu.memory_space<smem>>
    %c0_i32_109 = arith.constant 0 : i32
    %c255_i32_110 = arith.constant 255 : i32
    %186 = arith.maxsi %c0_i32_109, %185 : i32
    %187 = arith.minsi %c255_i32_110, %186 : i32
    %c1_i32_111 = arith.constant 1 : i32
    %c0_i32_112 = arith.constant 0 : i32
    %188 = tpu.memref_slice %arg3[%187, %c0_i32_112] : memref<256x128xf32, #tpu.memory_space<any>> -> memref<1x128xf32, #tpu.memory_space<any>>
    %c0_i32_113 = arith.constant 0 : i32
    %189 = tpu.memref_slice %arg10[%182, %c0_i32_113] : memref<16x128xf32, #tpu.memory_space<vmem>> -> memref<1x128xf32, #tpu.memory_space<vmem>>
    %190 = tpu.memref_slice %arg11[%c1_i32_111] : memref<2x!tpu.dma_semaphore, #tpu.memory_space<semaphore_mem>> -> memref<1x!tpu.dma_semaphore, #tpu.memory_space<semaphore_mem>>
    %191 = tpu.memref_squeeze %190 : memref<1x!tpu.dma_semaphore, #tpu.memory_space<semaphore_mem>> -> memref<!tpu.dma_semaphore, #tpu.memory_space<semaphore_mem>>
    tpu.enqueue_dma source(%188 : memref<1x128xf32, #tpu.memory_space<any>>) target(%189 : memref<1x128xf32, #tpu.memory_space<vmem>>) target_semaphore(%191 : memref<!tpu.dma_semaphore, #tpu.memory_space<semaphore_mem>>)
    %c2_i32_114 = arith.constant 2 : i32
    %192 = arith.addi %171, %c2_i32_114 : i32
    %193 = arith.addi %170, %192 : i32
    %194 = arith.index_cast %193 : i32 to index
    %195 = memref.load %arg1[%194] : memref<96xi32, #tpu.memory_space<smem>>
    %c0_i32_115 = arith.constant 0 : i32
    %c255_i32_116 = arith.constant 255 : i32
    %196 = arith.maxsi %c0_i32_115, %195 : i32
    %197 = arith.minsi %c255_i32_116, %196 : i32
    %c1_i32_117 = arith.constant 1 : i32
    %c0_i32_118 = arith.constant 0 : i32
    %198 = tpu.memref_slice %arg3[%197, %c0_i32_118] : memref<256x128xf32, #tpu.memory_space<any>> -> memref<1x128xf32, #tpu.memory_space<any>>
    %c0_i32_119 = arith.constant 0 : i32
    %199 = tpu.memref_slice %arg10[%192, %c0_i32_119] : memref<16x128xf32, #tpu.memory_space<vmem>> -> memref<1x128xf32, #tpu.memory_space<vmem>>
    %200 = tpu.memref_slice %arg11[%c1_i32_117] : memref<2x!tpu.dma_semaphore, #tpu.memory_space<semaphore_mem>> -> memref<1x!tpu.dma_semaphore, #tpu.memory_space<semaphore_mem>>
    %201 = tpu.memref_squeeze %200 : memref<1x!tpu.dma_semaphore, #tpu.memory_space<semaphore_mem>> -> memref<!tpu.dma_semaphore, #tpu.memory_space<semaphore_mem>>
    tpu.enqueue_dma source(%198 : memref<1x128xf32, #tpu.memory_space<any>>) target(%199 : memref<1x128xf32, #tpu.memory_space<vmem>>) target_semaphore(%201 : memref<!tpu.dma_semaphore, #tpu.memory_space<semaphore_mem>>)
    %c3_i32_120 = arith.constant 3 : i32
    %202 = arith.addi %171, %c3_i32_120 : i32
    %203 = arith.addi %170, %202 : i32
    %204 = arith.index_cast %203 : i32 to index
    %205 = memref.load %arg1[%204] : memref<96xi32, #tpu.memory_space<smem>>
    %c0_i32_121 = arith.constant 0 : i32
    %c255_i32_122 = arith.constant 255 : i32
    %206 = arith.maxsi %c0_i32_121, %205 : i32
    %207 = arith.minsi %c255_i32_122, %206 : i32
    %c1_i32_123 = arith.constant 1 : i32
    %c0_i32_124 = arith.constant 0 : i32
    %208 = tpu.memref_slice %arg3[%207, %c0_i32_124] : memref<256x128xf32, #tpu.memory_space<any>> -> memref<1x128xf32, #tpu.memory_space<any>>
    %c0_i32_125 = arith.constant 0 : i32
    %209 = tpu.memref_slice %arg10[%202, %c0_i32_125] : memref<16x128xf32, #tpu.memory_space<vmem>> -> memref<1x128xf32, #tpu.memory_space<vmem>>
    %210 = tpu.memref_slice %arg11[%c1_i32_123] : memref<2x!tpu.dma_semaphore, #tpu.memory_space<semaphore_mem>> -> memref<1x!tpu.dma_semaphore, #tpu.memory_space<semaphore_mem>>
    %211 = tpu.memref_squeeze %210 : memref<1x!tpu.dma_semaphore, #tpu.memory_space<semaphore_mem>> -> memref<!tpu.dma_semaphore, #tpu.memory_space<semaphore_mem>>
    tpu.enqueue_dma source(%208 : memref<1x128xf32, #tpu.memory_space<any>>) target(%209 : memref<1x128xf32, #tpu.memory_space<vmem>>) target_semaphore(%211 : memref<!tpu.dma_semaphore, #tpu.memory_space<semaphore_mem>>)
    %c4_i32_126 = arith.constant 4 : i32
    %212 = arith.addi %171, %c4_i32_126 : i32
    %213 = arith.addi %170, %212 : i32
    %214 = arith.index_cast %213 : i32 to index
    %215 = memref.load %arg1[%214] : memref<96xi32, #tpu.memory_space<smem>>
    %c0_i32_127 = arith.constant 0 : i32
    %c255_i32_128 = arith.constant 255 : i32
    %216 = arith.maxsi %c0_i32_127, %215 : i32
    %217 = arith.minsi %c255_i32_128, %216 : i32
    %c1_i32_129 = arith.constant 1 : i32
    %c0_i32_130 = arith.constant 0 : i32
    %218 = tpu.memref_slice %arg3[%217, %c0_i32_130] : memref<256x128xf32, #tpu.memory_space<any>> -> memref<1x128xf32, #tpu.memory_space<any>>
    %c0_i32_131 = arith.constant 0 : i32
    %219 = tpu.memref_slice %arg10[%212, %c0_i32_131] : memref<16x128xf32, #tpu.memory_space<vmem>> -> memref<1x128xf32, #tpu.memory_space<vmem>>
    %220 = tpu.memref_slice %arg11[%c1_i32_129] : memref<2x!tpu.dma_semaphore, #tpu.memory_space<semaphore_mem>> -> memref<1x!tpu.dma_semaphore, #tpu.memory_space<semaphore_mem>>
    %221 = tpu.memref_squeeze %220 : memref<1x!tpu.dma_semaphore, #tpu.memory_space<semaphore_mem>> -> memref<!tpu.dma_semaphore, #tpu.memory_space<semaphore_mem>>
    tpu.enqueue_dma source(%218 : memref<1x128xf32, #tpu.memory_space<any>>) target(%219 : memref<1x128xf32, #tpu.memory_space<vmem>>) target_semaphore(%221 : memref<!tpu.dma_semaphore, #tpu.memory_space<semaphore_mem>>)
    %c5_i32_132 = arith.constant 5 : i32
    %222 = arith.addi %171, %c5_i32_132 : i32
    %223 = arith.addi %170, %222 : i32
    %224 = arith.index_cast %223 : i32 to index
    %225 = memref.load %arg1[%224] : memref<96xi32, #tpu.memory_space<smem>>
    %c0_i32_133 = arith.constant 0 : i32
    %c255_i32_134 = arith.constant 255 : i32
    %226 = arith.maxsi %c0_i32_133, %225 : i32
    %227 = arith.minsi %c255_i32_134, %226 : i32
    %c1_i32_135 = arith.constant 1 : i32
    %c0_i32_136 = arith.constant 0 : i32
    %228 = tpu.memref_slice %arg3[%227, %c0_i32_136] : memref<256x128xf32, #tpu.memory_space<any>> -> memref<1x128xf32, #tpu.memory_space<any>>
    %c0_i32_137 = arith.constant 0 : i32
    %229 = tpu.memref_slice %arg10[%222, %c0_i32_137] : memref<16x128xf32, #tpu.memory_space<vmem>> -> memref<1x128xf32, #tpu.memory_space<vmem>>
    %230 = tpu.memref_slice %arg11[%c1_i32_135] : memref<2x!tpu.dma_semaphore, #tpu.memory_space<semaphore_mem>> -> memref<1x!tpu.dma_semaphore, #tpu.memory_space<semaphore_mem>>
    %231 = tpu.memref_squeeze %230 : memref<1x!tpu.dma_semaphore, #tpu.memory_space<semaphore_mem>> -> memref<!tpu.dma_semaphore, #tpu.memory_space<semaphore_mem>>
    tpu.enqueue_dma source(%228 : memref<1x128xf32, #tpu.memory_space<any>>) target(%229 : memref<1x128xf32, #tpu.memory_space<vmem>>) target_semaphore(%231 : memref<!tpu.dma_semaphore, #tpu.memory_space<semaphore_mem>>)
    %c6_i32_138 = arith.constant 6 : i32
    %232 = arith.addi %171, %c6_i32_138 : i32
    %233 = arith.addi %170, %232 : i32
    %234 = arith.index_cast %233 : i32 to index
    %235 = memref.load %arg1[%234] : memref<96xi32, #tpu.memory_space<smem>>
    %c0_i32_139 = arith.constant 0 : i32
    %c255_i32_140 = arith.constant 255 : i32
    %236 = arith.maxsi %c0_i32_139, %235 : i32
    %237 = arith.minsi %c255_i32_140, %236 : i32
    %c1_i32_141 = arith.constant 1 : i32
    %c0_i32_142 = arith.constant 0 : i32
    %238 = tpu.memref_slice %arg3[%237, %c0_i32_142] : memref<256x128xf32, #tpu.memory_space<any>> -> memref<1x128xf32, #tpu.memory_space<any>>
    %c0_i32_143 = arith.constant 0 : i32
    %239 = tpu.memref_slice %arg10[%232, %c0_i32_143] : memref<16x128xf32, #tpu.memory_space<vmem>> -> memref<1x128xf32, #tpu.memory_space<vmem>>
    %240 = tpu.memref_slice %arg11[%c1_i32_141] : memref<2x!tpu.dma_semaphore, #tpu.memory_space<semaphore_mem>> -> memref<1x!tpu.dma_semaphore, #tpu.memory_space<semaphore_mem>>
    %241 = tpu.memref_squeeze %240 : memref<1x!tpu.dma_semaphore, #tpu.memory_space<semaphore_mem>> -> memref<!tpu.dma_semaphore, #tpu.memory_space<semaphore_mem>>
    tpu.enqueue_dma source(%238 : memref<1x128xf32, #tpu.memory_space<any>>) target(%239 : memref<1x128xf32, #tpu.memory_space<vmem>>) target_semaphore(%241 : memref<!tpu.dma_semaphore, #tpu.memory_space<semaphore_mem>>)
    %c7_i32_144 = arith.constant 7 : i32
    %242 = arith.addi %171, %c7_i32_144 : i32
    %243 = arith.addi %170, %242 : i32
    %244 = arith.index_cast %243 : i32 to index
    %245 = memref.load %arg1[%244] : memref<96xi32, #tpu.memory_space<smem>>
    %c0_i32_145 = arith.constant 0 : i32
    %c255_i32_146 = arith.constant 255 : i32
    %246 = arith.maxsi %c0_i32_145, %245 : i32
    %247 = arith.minsi %c255_i32_146, %246 : i32
    %c1_i32_147 = arith.constant 1 : i32
    %c0_i32_148 = arith.constant 0 : i32
    %248 = tpu.memref_slice %arg3[%247, %c0_i32_148] : memref<256x128xf32, #tpu.memory_space<any>> -> memref<1x128xf32, #tpu.memory_space<any>>
    %c0_i32_149 = arith.constant 0 : i32
    %249 = tpu.memref_slice %arg10[%242, %c0_i32_149] : memref<16x128xf32, #tpu.memory_space<vmem>> -> memref<1x128xf32, #tpu.memory_space<vmem>>
    %250 = tpu.memref_slice %arg11[%c1_i32_147] : memref<2x!tpu.dma_semaphore, #tpu.memory_space<semaphore_mem>> -> memref<1x!tpu.dma_semaphore, #tpu.memory_space<semaphore_mem>>
    %251 = tpu.memref_squeeze %250 : memref<1x!tpu.dma_semaphore, #tpu.memory_space<semaphore_mem>> -> memref<!tpu.dma_semaphore, #tpu.memory_space<semaphore_mem>>
    tpu.enqueue_dma source(%248 : memref<1x128xf32, #tpu.memory_space<any>>) target(%249 : memref<1x128xf32, #tpu.memory_space<vmem>>) target_semaphore(%251 : memref<!tpu.dma_semaphore, #tpu.memory_space<semaphore_mem>>)
    %c1_i32_150 = arith.constant 1 : i32
    %c8_i32_151 = arith.constant 8 : i32
    %252 = arith.muli %c1_i32_150, %c8_i32_151 : i32
    %c0_i32_152 = arith.constant 0 : i32
    %253 = arith.addi %252, %c0_i32_152 : i32
    %254 = arith.addi %170, %253 : i32
    %255 = arith.index_cast %254 : i32 to index
    %256 = memref.load %arg1[%255] : memref<96xi32, #tpu.memory_space<smem>>
    %c0_i32_153 = arith.constant 0 : i32
    %c255_i32_154 = arith.constant 255 : i32
    %257 = arith.maxsi %c0_i32_153, %256 : i32
    %258 = arith.minsi %c255_i32_154, %257 : i32
    %c1_i32_155 = arith.constant 1 : i32
    %c0_i32_156 = arith.constant 0 : i32
    %259 = tpu.memref_slice %arg3[%258, %c0_i32_156] : memref<256x128xf32, #tpu.memory_space<any>> -> memref<1x128xf32, #tpu.memory_space<any>>
    %c0_i32_157 = arith.constant 0 : i32
    %260 = tpu.memref_slice %arg10[%253, %c0_i32_157] : memref<16x128xf32, #tpu.memory_space<vmem>> -> memref<1x128xf32, #tpu.memory_space<vmem>>
    %261 = tpu.memref_slice %arg11[%c1_i32_155] : memref<2x!tpu.dma_semaphore, #tpu.memory_space<semaphore_mem>> -> memref<1x!tpu.dma_semaphore, #tpu.memory_space<semaphore_mem>>
    %262 = tpu.memref_squeeze %261 : memref<1x!tpu.dma_semaphore, #tpu.memory_space<semaphore_mem>> -> memref<!tpu.dma_semaphore, #tpu.memory_space<semaphore_mem>>
    tpu.enqueue_dma source(%259 : memref<1x128xf32, #tpu.memory_space<any>>) target(%260 : memref<1x128xf32, #tpu.memory_space<vmem>>) target_semaphore(%262 : memref<!tpu.dma_semaphore, #tpu.memory_space<semaphore_mem>>)
    %c1_i32_158 = arith.constant 1 : i32
    %263 = arith.addi %252, %c1_i32_158 : i32
    %264 = arith.addi %170, %263 : i32
    %265 = arith.index_cast %264 : i32 to index
    %266 = memref.load %arg1[%265] : memref<96xi32, #tpu.memory_space<smem>>
    %c0_i32_159 = arith.constant 0 : i32
    %c255_i32_160 = arith.constant 255 : i32
    %267 = arith.maxsi %c0_i32_159, %266 : i32
    %268 = arith.minsi %c255_i32_160, %267 : i32
    %c1_i32_161 = arith.constant 1 : i32
    %c0_i32_162 = arith.constant 0 : i32
    %269 = tpu.memref_slice %arg3[%268, %c0_i32_162] : memref<256x128xf32, #tpu.memory_space<any>> -> memref<1x128xf32, #tpu.memory_space<any>>
    %c0_i32_163 = arith.constant 0 : i32
    %270 = tpu.memref_slice %arg10[%263, %c0_i32_163] : memref<16x128xf32, #tpu.memory_space<vmem>> -> memref<1x128xf32, #tpu.memory_space<vmem>>
    %271 = tpu.memref_slice %arg11[%c1_i32_161] : memref<2x!tpu.dma_semaphore, #tpu.memory_space<semaphore_mem>> -> memref<1x!tpu.dma_semaphore, #tpu.memory_space<semaphore_mem>>
    %272 = tpu.memref_squeeze %271 : memref<1x!tpu.dma_semaphore, #tpu.memory_space<semaphore_mem>> -> memref<!tpu.dma_semaphore, #tpu.memory_space<semaphore_mem>>
    tpu.enqueue_dma source(%269 : memref<1x128xf32, #tpu.memory_space<any>>) target(%270 : memref<1x128xf32, #tpu.memory_space<vmem>>) target_semaphore(%272 : memref<!tpu.dma_semaphore, #tpu.memory_space<semaphore_mem>>)
    %c2_i32_164 = arith.constant 2 : i32
    %273 = arith.addi %252, %c2_i32_164 : i32
    %274 = arith.addi %170, %273 : i32
    %275 = arith.index_cast %274 : i32 to index
    %276 = memref.load %arg1[%275] : memref<96xi32, #tpu.memory_space<smem>>
    %c0_i32_165 = arith.constant 0 : i32
    %c255_i32_166 = arith.constant 255 : i32
    %277 = arith.maxsi %c0_i32_165, %276 : i32
    %278 = arith.minsi %c255_i32_166, %277 : i32
    %c1_i32_167 = arith.constant 1 : i32
    %c0_i32_168 = arith.constant 0 : i32
    %279 = tpu.memref_slice %arg3[%278, %c0_i32_168] : memref<256x128xf32, #tpu.memory_space<any>> -> memref<1x128xf32, #tpu.memory_space<any>>
    %c0_i32_169 = arith.constant 0 : i32
    %280 = tpu.memref_slice %arg10[%273, %c0_i32_169] : memref<16x128xf32, #tpu.memory_space<vmem>> -> memref<1x128xf32, #tpu.memory_space<vmem>>
    %281 = tpu.memref_slice %arg11[%c1_i32_167] : memref<2x!tpu.dma_semaphore, #tpu.memory_space<semaphore_mem>> -> memref<1x!tpu.dma_semaphore, #tpu.memory_space<semaphore_mem>>
    %282 = tpu.memref_squeeze %281 : memref<1x!tpu.dma_semaphore, #tpu.memory_space<semaphore_mem>> -> memref<!tpu.dma_semaphore, #tpu.memory_space<semaphore_mem>>
    tpu.enqueue_dma source(%279 : memref<1x128xf32, #tpu.memory_space<any>>) target(%280 : memref<1x128xf32, #tpu.memory_space<vmem>>) target_semaphore(%282 : memref<!tpu.dma_semaphore, #tpu.memory_space<semaphore_mem>>)
    %c3_i32_170 = arith.constant 3 : i32
    %283 = arith.addi %252, %c3_i32_170 : i32
    %284 = arith.addi %170, %283 : i32
    %285 = arith.index_cast %284 : i32 to index
    %286 = memref.load %arg1[%285] : memref<96xi32, #tpu.memory_space<smem>>
    %c0_i32_171 = arith.constant 0 : i32
    %c255_i32_172 = arith.constant 255 : i32
    %287 = arith.maxsi %c0_i32_171, %286 : i32
    %288 = arith.minsi %c255_i32_172, %287 : i32
    %c1_i32_173 = arith.constant 1 : i32
    %c0_i32_174 = arith.constant 0 : i32
    %289 = tpu.memref_slice %arg3[%288, %c0_i32_174] : memref<256x128xf32, #tpu.memory_space<any>> -> memref<1x128xf32, #tpu.memory_space<any>>
    %c0_i32_175 = arith.constant 0 : i32
    %290 = tpu.memref_slice %arg10[%283, %c0_i32_175] : memref<16x128xf32, #tpu.memory_space<vmem>> -> memref<1x128xf32, #tpu.memory_space<vmem>>
    %291 = tpu.memref_slice %arg11[%c1_i32_173] : memref<2x!tpu.dma_semaphore, #tpu.memory_space<semaphore_mem>> -> memref<1x!tpu.dma_semaphore, #tpu.memory_space<semaphore_mem>>
    %292 = tpu.memref_squeeze %291 : memref<1x!tpu.dma_semaphore, #tpu.memory_space<semaphore_mem>> -> memref<!tpu.dma_semaphore, #tpu.memory_space<semaphore_mem>>
    tpu.enqueue_dma source(%289 : memref<1x128xf32, #tpu.memory_space<any>>) target(%290 : memref<1x128xf32, #tpu.memory_space<vmem>>) target_semaphore(%292 : memref<!tpu.dma_semaphore, #tpu.memory_space<semaphore_mem>>)
    %c4_i32_176 = arith.constant 4 : i32
    %293 = arith.addi %252, %c4_i32_176 : i32
    %294 = arith.addi %170, %293 : i32
    %295 = arith.index_cast %294 : i32 to index
    %296 = memref.load %arg1[%295] : memref<96xi32, #tpu.memory_space<smem>>
    %c0_i32_177 = arith.constant 0 : i32
    %c255_i32_178 = arith.constant 255 : i32
    %297 = arith.maxsi %c0_i32_177, %296 : i32
    %298 = arith.minsi %c255_i32_178, %297 : i32
    %c1_i32_179 = arith.constant 1 : i32
    %c0_i32_180 = arith.constant 0 : i32
    %299 = tpu.memref_slice %arg3[%298, %c0_i32_180] : memref<256x128xf32, #tpu.memory_space<any>> -> memref<1x128xf32, #tpu.memory_space<any>>
    %c0_i32_181 = arith.constant 0 : i32
    %300 = tpu.memref_slice %arg10[%293, %c0_i32_181] : memref<16x128xf32, #tpu.memory_space<vmem>> -> memref<1x128xf32, #tpu.memory_space<vmem>>
    %301 = tpu.memref_slice %arg11[%c1_i32_179] : memref<2x!tpu.dma_semaphore, #tpu.memory_space<semaphore_mem>> -> memref<1x!tpu.dma_semaphore, #tpu.memory_space<semaphore_mem>>
    %302 = tpu.memref_squeeze %301 : memref<1x!tpu.dma_semaphore, #tpu.memory_space<semaphore_mem>> -> memref<!tpu.dma_semaphore, #tpu.memory_space<semaphore_mem>>
    tpu.enqueue_dma source(%299 : memref<1x128xf32, #tpu.memory_space<any>>) target(%300 : memref<1x128xf32, #tpu.memory_space<vmem>>) target_semaphore(%302 : memref<!tpu.dma_semaphore, #tpu.memory_space<semaphore_mem>>)
    %c5_i32_182 = arith.constant 5 : i32
    %303 = arith.addi %252, %c5_i32_182 : i32
    %304 = arith.addi %170, %303 : i32
    %305 = arith.index_cast %304 : i32 to index
    %306 = memref.load %arg1[%305] : memref<96xi32, #tpu.memory_space<smem>>
    %c0_i32_183 = arith.constant 0 : i32
    %c255_i32_184 = arith.constant 255 : i32
    %307 = arith.maxsi %c0_i32_183, %306 : i32
    %308 = arith.minsi %c255_i32_184, %307 : i32
    %c1_i32_185 = arith.constant 1 : i32
    %c0_i32_186 = arith.constant 0 : i32
    %309 = tpu.memref_slice %arg3[%308, %c0_i32_186] : memref<256x128xf32, #tpu.memory_space<any>> -> memref<1x128xf32, #tpu.memory_space<any>>
    %c0_i32_187 = arith.constant 0 : i32
    %310 = tpu.memref_slice %arg10[%303, %c0_i32_187] : memref<16x128xf32, #tpu.memory_space<vmem>> -> memref<1x128xf32, #tpu.memory_space<vmem>>
    %311 = tpu.memref_slice %arg11[%c1_i32_185] : memref<2x!tpu.dma_semaphore, #tpu.memory_space<semaphore_mem>> -> memref<1x!tpu.dma_semaphore, #tpu.memory_space<semaphore_mem>>
    %312 = tpu.memref_squeeze %311 : memref<1x!tpu.dma_semaphore, #tpu.memory_space<semaphore_mem>> -> memref<!tpu.dma_semaphore, #tpu.memory_space<semaphore_mem>>
    tpu.enqueue_dma source(%309 : memref<1x128xf32, #tpu.memory_space<any>>) target(%310 : memref<1x128xf32, #tpu.memory_space<vmem>>) target_semaphore(%312 : memref<!tpu.dma_semaphore, #tpu.memory_space<semaphore_mem>>)
    %c6_i32_188 = arith.constant 6 : i32
    %313 = arith.addi %252, %c6_i32_188 : i32
    %314 = arith.addi %170, %313 : i32
    %315 = arith.index_cast %314 : i32 to index
    %316 = memref.load %arg1[%315] : memref<96xi32, #tpu.memory_space<smem>>
    %c0_i32_189 = arith.constant 0 : i32
    %c255_i32_190 = arith.constant 255 : i32
    %317 = arith.maxsi %c0_i32_189, %316 : i32
    %318 = arith.minsi %c255_i32_190, %317 : i32
    %c1_i32_191 = arith.constant 1 : i32
    %c0_i32_192 = arith.constant 0 : i32
    %319 = tpu.memref_slice %arg3[%318, %c0_i32_192] : memref<256x128xf32, #tpu.memory_space<any>> -> memref<1x128xf32, #tpu.memory_space<any>>
    %c0_i32_193 = arith.constant 0 : i32
    %320 = tpu.memref_slice %arg10[%313, %c0_i32_193] : memref<16x128xf32, #tpu.memory_space<vmem>> -> memref<1x128xf32, #tpu.memory_space<vmem>>
    %321 = tpu.memref_slice %arg11[%c1_i32_191] : memref<2x!tpu.dma_semaphore, #tpu.memory_space<semaphore_mem>> -> memref<1x!tpu.dma_semaphore, #tpu.memory_space<semaphore_mem>>
    %322 = tpu.memref_squeeze %321 : memref<1x!tpu.dma_semaphore, #tpu.memory_space<semaphore_mem>> -> memref<!tpu.dma_semaphore, #tpu.memory_space<semaphore_mem>>
    tpu.enqueue_dma source(%319 : memref<1x128xf32, #tpu.memory_space<any>>) target(%320 : memref<1x128xf32, #tpu.memory_space<vmem>>) target_semaphore(%322 : memref<!tpu.dma_semaphore, #tpu.memory_space<semaphore_mem>>)
    %c7_i32_194 = arith.constant 7 : i32
    %323 = arith.addi %252, %c7_i32_194 : i32
    %324 = arith.addi %170, %323 : i32
    %325 = arith.index_cast %324 : i32 to index
    %326 = memref.load %arg1[%325] : memref<96xi32, #tpu.memory_space<smem>>
    %c0_i32_195 = arith.constant 0 : i32
    %c255_i32_196 = arith.constant 255 : i32
    %327 = arith.maxsi %c0_i32_195, %326 : i32
    %328 = arith.minsi %c255_i32_196, %327 : i32
    %c1_i32_197 = arith.constant 1 : i32
    %c0_i32_198 = arith.constant 0 : i32
    %329 = tpu.memref_slice %arg3[%328, %c0_i32_198] : memref<256x128xf32, #tpu.memory_space<any>> -> memref<1x128xf32, #tpu.memory_space<any>>
    %c0_i32_199 = arith.constant 0 : i32
    %330 = tpu.memref_slice %arg10[%323, %c0_i32_199] : memref<16x128xf32, #tpu.memory_space<vmem>> -> memref<1x128xf32, #tpu.memory_space<vmem>>
    %331 = tpu.memref_slice %arg11[%c1_i32_197] : memref<2x!tpu.dma_semaphore, #tpu.memory_space<semaphore_mem>> -> memref<1x!tpu.dma_semaphore, #tpu.memory_space<semaphore_mem>>
    %332 = tpu.memref_squeeze %331 : memref<1x!tpu.dma_semaphore, #tpu.memory_space<semaphore_mem>> -> memref<!tpu.dma_semaphore, #tpu.memory_space<semaphore_mem>>
    tpu.enqueue_dma source(%329 : memref<1x128xf32, #tpu.memory_space<any>>) target(%330 : memref<1x128xf32, #tpu.memory_space<vmem>>) target_semaphore(%332 : memref<!tpu.dma_semaphore, #tpu.memory_space<semaphore_mem>>)
    %c2_i32_200 = arith.constant 2 : i32
    %c0_i32_201 = arith.constant 0 : i32
    %c0_i32_202 = arith.constant 0 : i32
    %c0_i32_203 = arith.constant 0 : i32
    %333 = tpu.memref_slice %arg3[%c0_i32_202, %c0_i32_203] : memref<256x128xf32, #tpu.memory_space<any>> -> memref<16x128xf32, #tpu.memory_space<any>>
    %334 = tpu.memref_slice %arg11[%c0_i32_201] : memref<2x!tpu.dma_semaphore, #tpu.memory_space<semaphore_mem>> -> memref<1x!tpu.dma_semaphore, #tpu.memory_space<semaphore_mem>>
    %335 = tpu.memref_squeeze %334 : memref<1x!tpu.dma_semaphore, #tpu.memory_space<semaphore_mem>> -> memref<!tpu.dma_semaphore, #tpu.memory_space<semaphore_mem>>
    tpu.wait_dma2 semaphore(%335 : memref<!tpu.dma_semaphore, #tpu.memory_space<semaphore_mem>>) src(%333 : memref<16x128xf32, #tpu.memory_space<any>>) dst(%arg9 : memref<16x128xf32, #tpu.memory_space<vmem>>)
    %c0_204 = arith.constant 0 : index
    %c0_205 = arith.constant 0 : index
    %336 = vector.load %arg9[%c0_204, %c0_205] : memref<16x128xf32, #tpu.memory_space<vmem>>, vector<16x128xf32>
    %c0_206 = arith.constant 0 : index
    %c0_207 = arith.constant 0 : index
    %337 = vector.load %arg2[%c0_206, %c0_207] : memref<32x1xi32, #tpu.memory_space<vmem>>, vector<16x1xi32>
    %338 = arith.sitofp %337 : vector<16x1xi32> to vector<16x1xf32>
    %339 = arith.addf %336, %6 : vector<16x128xf32>
    %340 = vector.broadcast %1 : vector<1x128xf32> to vector<16x128xf32>
    %341 = arith.addf %339, %340 : vector<16x128xf32>
    %342 = vector.broadcast %338 : vector<16x1xf32> to vector<16x128xf32>
    %343 = vector.broadcast %3 : vector<1x128xf32> to vector<16x128xf32>
    %344 = arith.mulf %342, %343 : vector<16x128xf32>
    %345 = arith.addf %341, %344 : vector<16x128xf32>
    %cst = arith.constant dense<0.000000e+00> : vector<16xf32>
    %346 = vector.multi_reduction <add>, %345, %cst [1] : vector<16x128xf32> to vector<16xf32>
    %347 = vector.shape_cast %346 : vector<16xf32> to vector<16x1xf32>
    %cst_208 = arith.constant 1.280000e+02 : f32
    %348 = vector.broadcast %cst_208 : f32 to vector<16x1xf32>
    %349 = arith.divf %347, %348 : vector<16x1xf32>
    %350 = vector.broadcast %349 : vector<16x1xf32> to vector<16x128xf32>
    %351 = arith.subf %345, %350 : vector<16x128xf32>
    %352 = arith.mulf %351, %351 : vector<16x128xf32>
    %cst_209 = arith.constant dense<0.000000e+00> : vector<16xf32>
    %353 = vector.multi_reduction <add>, %352, %cst_209 [1] : vector<16x128xf32> to vector<16xf32>
    %354 = vector.shape_cast %353 : vector<16xf32> to vector<16x1xf32>
    %cst_210 = arith.constant 1.280000e+02 : f32
    %355 = vector.broadcast %cst_210 : f32 to vector<16x1xf32>
    %356 = arith.divf %354, %355 : vector<16x1xf32>
    %cst_211 = arith.constant 9.99999996E-13 : f32
    %357 = vector.broadcast %cst_211 : f32 to vector<16x1xf32>
    %358 = arith.addf %356, %357 : vector<16x1xf32>
    %359 = math.rsqrt %358 : vector<16x1xf32>
    %360 = vector.broadcast %359 : vector<16x1xf32> to vector<16x128xf32>
    %361 = arith.mulf %351, %360 : vector<16x128xf32>
    %362 = vector.broadcast %4 : vector<1x128xf32> to vector<16x128xf32>
    %363 = arith.mulf %361, %362 : vector<16x128xf32>
    %364 = vector.broadcast %5 : vector<1x128xf32> to vector<16x128xf32>
    %365 = arith.addf %363, %364 : vector<16x128xf32>
    %c0_212 = arith.constant 0 : index
    %c0_213 = arith.constant 0 : index
    %366 = vector.load %arg8[%c0_212, %c0_213] : memref<32x128xf32, #tpu.memory_space<vmem>>, vector<16x128xf32>
    tpu.vector_store %arg8[%c0_212, %c0_213], %365 {strides = array<i32>} : memref<32x128xf32, #tpu.memory_space<vmem>>, vector<16x128xf32>,
    %c1_i32_214 = arith.constant 1 : i32
    %c0_i32_215 = arith.constant 0 : i32
    %c0_i32_216 = arith.constant 0 : i32
    %367 = tpu.memref_slice %arg3[%c0_i32_215, %c0_i32_216] : memref<256x128xf32, #tpu.memory_space<any>> -> memref<16x128xf32, #tpu.memory_space<any>>
    %368 = tpu.memref_slice %arg11[%c1_i32_214] : memref<2x!tpu.dma_semaphore, #tpu.memory_space<semaphore_mem>> -> memref<1x!tpu.dma_semaphore, #tpu.memory_space<semaphore_mem>>
    %369 = tpu.memref_squeeze %368 : memref<1x!tpu.dma_semaphore, #tpu.memory_space<semaphore_mem>> -> memref<!tpu.dma_semaphore, #tpu.memory_space<semaphore_mem>>
    tpu.wait_dma2 semaphore(%369 : memref<!tpu.dma_semaphore, #tpu.memory_space<semaphore_mem>>) src(%367 : memref<16x128xf32, #tpu.memory_space<any>>) dst(%arg10 : memref<16x128xf32, #tpu.memory_space<vmem>>)
    %c0_217 = arith.constant 0 : index
    %c0_218 = arith.constant 0 : index
    %370 = vector.load %arg10[%c0_217, %c0_218] : memref<16x128xf32, #tpu.memory_space<vmem>>, vector<16x128xf32>
    %c16 = arith.constant 16 : index
    %c0_219 = arith.constant 0 : index
    %371 = vector.load %arg2[%c16, %c0_219] : memref<32x1xi32, #tpu.memory_space<vmem>>, vector<16x1xi32>
    %372 = arith.sitofp %371 : vector<16x1xi32> to vector<16x1xf32>
    %373 = arith.addf %370, %6 : vector<16x128xf32>
    %374 = vector.broadcast %1 : vector<1x128xf32> to vector<16x128xf32>
    %375 = arith.addf %373, %374 : vector<16x128xf32>
    %376 = vector.broadcast %372 : vector<16x1xf32> to vector<16x128xf32>
    %377 = vector.broadcast %3 : vector<1x128xf32> to vector<16x128xf32>
    %378 = arith.mulf %376, %377 : vector<16x128xf32>
    %379 = arith.addf %375, %378 : vector<16x128xf32>
    %cst_220 = arith.constant dense<0.000000e+00> : vector<16xf32>
    %380 = vector.multi_reduction <add>, %379, %cst_220 [1] : vector<16x128xf32> to vector<16xf32>
    %381 = vector.shape_cast %380 : vector<16xf32> to vector<16x1xf32>
    %cst_221 = arith.constant 1.280000e+02 : f32
    %382 = vector.broadcast %cst_221 : f32 to vector<16x1xf32>
    %383 = arith.divf %381, %382 : vector<16x1xf32>
    %384 = vector.broadcast %383 : vector<16x1xf32> to vector<16x128xf32>
    %385 = arith.subf %379, %384 : vector<16x128xf32>
    %386 = arith.mulf %385, %385 : vector<16x128xf32>
    %cst_222 = arith.constant dense<0.000000e+00> : vector<16xf32>
    %387 = vector.multi_reduction <add>, %386, %cst_222 [1] : vector<16x128xf32> to vector<16xf32>
    %388 = vector.shape_cast %387 : vector<16xf32> to vector<16x1xf32>
    %cst_223 = arith.constant 1.280000e+02 : f32
    %389 = vector.broadcast %cst_223 : f32 to vector<16x1xf32>
    %390 = arith.divf %388, %389 : vector<16x1xf32>
    %cst_224 = arith.constant 9.99999996E-13 : f32
    %391 = vector.broadcast %cst_224 : f32 to vector<16x1xf32>
    %392 = arith.addf %390, %391 : vector<16x1xf32>
    %393 = math.rsqrt %392 : vector<16x1xf32>
    %394 = vector.broadcast %393 : vector<16x1xf32> to vector<16x128xf32>
    %395 = arith.mulf %385, %394 : vector<16x128xf32>
    %396 = vector.broadcast %4 : vector<1x128xf32> to vector<16x128xf32>
    %397 = arith.mulf %395, %396 : vector<16x128xf32>
    %398 = vector.broadcast %5 : vector<1x128xf32> to vector<16x128xf32>
    %399 = arith.addf %397, %398 : vector<16x128xf32>
    %c16_225 = arith.constant 16 : index
    %c0_226 = arith.constant 0 : index
    %400 = vector.load %arg8[%c16_225, %c0_226] : memref<32x128xf32, #tpu.memory_space<vmem>>, vector<16x128xf32>
    tpu.vector_store %arg8[%c16_225, %c0_226], %399 {strides = array<i32>} : memref<32x128xf32, #tpu.memory_space<vmem>>, vector<16x128xf32>,
    return
  }
  func.func @transform_0(%arg0: i32, %arg1: memref<96xi32, #tpu.memory_space<smem>>) -> (i32, i32) {
    %c0_i32 = arith.constant 0 : i32
    %c0_i32_0 = arith.constant 0 : i32
    return %arg0, %c0_i32 : i32, i32
  }
  func.func @transform_2(%arg0: i32, %arg1: memref<96xi32, #tpu.memory_space<smem>>) -> (i32, i32) {
    %c0_i32 = arith.constant 0 : i32
    %c0_i32_0 = arith.constant 0 : i32
    %c0_i32_1 = arith.constant 0 : i32
    return %c0_i32, %c0_i32_0 : i32, i32
  }
  func.func @transform_3(%arg0: i32, %arg1: memref<96xi32, #tpu.memory_space<smem>>) -> (i32, i32) {
    %c0_i32 = arith.constant 0 : i32
    %c0_i32_0 = arith.constant 0 : i32
    %c0_i32_1 = arith.constant 0 : i32
    return %c0_i32, %c0_i32_0 : i32, i32
  }
  func.func @transform_4(%arg0: i32, %arg1: memref<96xi32, #tpu.memory_space<smem>>) -> (i32, i32) {
    %c0_i32 = arith.constant 0 : i32
    %c0_i32_0 = arith.constant 0 : i32
    %c0_i32_1 = arith.constant 0 : i32
    return %c0_i32, %c0_i32_0 : i32, i32
  }
  func.func @transform_5(%arg0: i32, %arg1: memref<96xi32, #tpu.memory_space<smem>>) -> (i32, i32) {
    %c0_i32 = arith.constant 0 : i32
    %c0_i32_0 = arith.constant 0 : i32
    %c0_i32_1 = arith.constant 0 : i32
    return %c0_i32, %c0_i32_0 : i32, i32
  }
  func.func @transform_6(%arg0: i32, %arg1: memref<96xi32, #tpu.memory_space<smem>>) -> (i32, i32) {
    %c0_i32 = arith.constant 0 : i32
    %c0_i32_0 = arith.constant 0 : i32
    return %arg0, %c0_i32 : i32, i32
  }
}

module attributes {stable_mosaic.version = 11 : i64} {
  func.func @_bert_emb_kernel(%arg0: i32, %arg1: memref<96xi32, #tpu.memory_space<smem>>, %arg2: memref<32x1xi32, #tpu.memory_space<vmem>>, %arg3: memref<256x128xf32, #tpu.memory_space<any>>, %arg4: memref<16x128xf32, #tpu.memory_space<vmem>>, %arg5: memref<2x128xf32, #tpu.memory_space<vmem>>, %arg6: memref<1x128xf32, #tpu.memory_space<vmem>>, %arg7: memref<1x128xf32, #tpu.memory_space<vmem>>, %arg8: memref<32x128xf32, #tpu.memory_space<vmem>>, %arg9: memref<16x128xf32, #tpu.memory_space<vmem>>, %arg10: memref<16x128xf32, #tpu.memory_space<vmem>>, %arg11: memref<2x!tpu.dma_semaphore, #tpu.memory_space<semaphore_mem>>) attributes {dimension_semantics = [#tpu.dimension_semantics<parallel>], iteration_bounds = array<i64: 3>, scalar_prefetch = 1 : i64, scratch_operands = 3 : i64, tpu.core_type = #tpu.core_type<tc>, window_params = [{transform_indices = @transform_0, window_bounds = array<i64: 32, 1>}, {}, {pipeline_mode = #tpu.pipeline_mode<synchronous>, transform_indices = @transform_2, window_bounds = array<i64: 16, 128>}, {pipeline_mode = #tpu.pipeline_mode<synchronous>, transform_indices = @transform_3, window_bounds = array<i64: 2, 128>}, {pipeline_mode = #tpu.pipeline_mode<synchronous>, transform_indices = @transform_4, window_bounds = array<i64: 1, 128>}, {pipeline_mode = #tpu.pipeline_mode<synchronous>, transform_indices = @transform_5, window_bounds = array<i64: 1, 128>}, {transform_indices = @transform_6, window_bounds = array<i64: 32, 128>}]} {
    %c32_i32 = arith.constant 32 : i32
    %0 = arith.muli %arg0, %c32_i32 : i32
    %c0 = arith.constant 0 : index
    %c0_0 = arith.constant 0 : index
    %1 = vector.load %arg5[%c0, %c0_0] : memref<2x128xf32, #tpu.memory_space<vmem>>, vector<1x128xf32>
    %c1 = arith.constant 1 : index
    %c0_1 = arith.constant 0 : index
    %2 = vector.load %arg5[%c1, %c0_1] : memref<2x128xf32, #tpu.memory_space<vmem>>, vector<1x128xf32>
    %3 = arith.subf %2, %1 : vector<1x128xf32>
    %c0_2 = arith.constant 0 : index
    %c0_3 = arith.constant 0 : index
    %4 = vector.load %arg6[%c0_2, %c0_3] : memref<1x128xf32, #tpu.memory_space<vmem>>, vector<1x128xf32>
    %c0_4 = arith.constant 0 : index
    %c0_5 = arith.constant 0 : index
    %5 = vector.load %arg7[%c0_4, %c0_5] : memref<1x128xf32, #tpu.memory_space<vmem>>, vector<1x128xf32>
    %c0_6 = arith.constant 0 : index
    %c0_7 = arith.constant 0 : index
    %6 = vector.load %arg4[%c0_6, %c0_7] : memref<16x128xf32, #tpu.memory_space<vmem>>, vector<16x128xf32>
    %c0_i32 = arith.constant 0 : i32
    %7 = arith.addi %0, %c0_i32 : i32
    %c0_i32_8 = arith.constant 0 : i32
    %c8_i32 = arith.constant 8 : i32
    %8 = arith.muli %c0_i32_8, %c8_i32 : i32
    %c0_i32_9 = arith.constant 0 : i32
    %9 = arith.addi %8, %c0_i32_9 : i32
    %10 = arith.addi %7, %9 : i32
    %11 = arith.index_cast %10 : i32 to index
    %12 = memref.load %arg1[%11] : memref<96xi32, #tpu.memory_space<smem>>
    %c0_i32_10 = arith.constant 0 : i32
    %c255_i32 = arith.constant 255 : i32
    %13 = arith.maxsi %c0_i32_10, %12 : i32
    %14 = arith.minsi %c255_i32, %13 : i32
    %c0_i32_11 = arith.constant 0 : i32
    %c0_i32_12 = arith.constant 0 : i32
    %15 = tpu.memref_slice %arg3[%14, %c0_i32_12] : memref<256x128xf32, #tpu.memory_space<any>> -> memref<1x128xf32, #tpu.memory_space<any>>
    %c0_i32_13 = arith.constant 0 : i32
    %16 = tpu.memref_slice %arg9[%9, %c0_i32_13] : memref<16x128xf32, #tpu.memory_space<vmem>> -> memref<1x128xf32, #tpu.memory_space<vmem>>
    %17 = tpu.memref_slice %arg11[%c0_i32_11] : memref<2x!tpu.dma_semaphore, #tpu.memory_space<semaphore_mem>> -> memref<1x!tpu.dma_semaphore, #tpu.memory_space<semaphore_mem>>
    %18 = tpu.memref_squeeze %17 : memref<1x!tpu.dma_semaphore, #tpu.memory_space<semaphore_mem>> -> memref<!tpu.dma_semaphore, #tpu.memory_space<semaphore_mem>>
    tpu.enqueue_dma source(%15 : memref<1x128xf32, #tpu.memory_space<any>>) target(%16 : memref<1x128xf32, #tpu.memory_space<vmem>>) target_semaphore(%18 : memref<!tpu.dma_semaphore, #tpu.memory_space<semaphore_mem>>)
    %c1_i32 = arith.constant 1 : i32
    %19 = arith.addi %8, %c1_i32 : i32
    %20 = arith.addi %7, %19 : i32
    %21 = arith.index_cast %20 : i32 to index
    %22 = memref.load %arg1[%21] : memref<96xi32, #tpu.memory_space<smem>>
    %c0_i32_14 = arith.constant 0 : i32
    %c255_i32_15 = arith.constant 255 : i32
    %23 = arith.maxsi %c0_i32_14, %22 : i32
    %24 = arith.minsi %c255_i32_15, %23 : i32
    %c0_i32_16 = arith.constant 0 : i32
    %c0_i32_17 = arith.constant 0 : i32
    %25 = tpu.memref_slice %arg3[%24, %c0_i32_17] : memref<256x128xf32, #tpu.memory_space<any>> -> memref<1x128xf32, #tpu.memory_space<any>>
    %c0_i32_18 = arith.constant 0 : i32
    %26 = tpu.memref_slice %arg9[%19, %c0_i32_18] : memref<16x128xf32, #tpu.memory_space<vmem>> -> memref<1x128xf32, #tpu.memory_space<vmem>>
    %27 = tpu.memref_slice %arg11[%c0_i32_16] : memref<2x!tpu.dma_semaphore, #tpu.memory_space<semaphore_mem>> -> memref<1x!tpu.dma_semaphore, #tpu.memory_space<semaphore_mem>>
    %28 = tpu.memref_squeeze %27 : memref<1x!tpu.dma_semaphore, #tpu.memory_space<semaphore_mem>> -> memref<!tpu.dma_semaphore, #tpu.memory_space<semaphore_mem>>
    tpu.enqueue_dma source(%25 : memref<1x128xf32, #tpu.memory_space<any>>) target(%26 : memref<1x128xf32, #tpu.memory_space<vmem>>) target_semaphore(%28 : memref<!tpu.dma_semaphore, #tpu.memory_space<semaphore_mem>>)
    %c2_i32 = arith.constant 2 : i32
    %29 = arith.addi %8, %c2_i32 : i32
    %30 = arith.addi %7, %29 : i32
    %31 = arith.index_cast %30 : i32 to index
    %32 = memref.load %arg1[%31] : memref<96xi32, #tpu.memory_space<smem>>
    %c0_i32_19 = arith.constant 0 : i32
    %c255_i32_20 = arith.constant 255 : i32
    %33 = arith.maxsi %c0_i32_19, %32 : i32
    %34 = arith.minsi %c255_i32_20, %33 : i32
    %c0_i32_21 = arith.constant 0 : i32
    %c0_i32_22 = arith.constant 0 : i32
    %35 = tpu.memref_slice %arg3[%34, %c0_i32_22] : memref<256x128xf32, #tpu.memory_space<any>> -> memref<1x128xf32, #tpu.memory_space<any>>
    %c0_i32_23 = arith.constant 0 : i32
    %36 = tpu.memref_slice %arg9[%29, %c0_i32_23] : memref<16x128xf32, #tpu.memory_space<vmem>> -> memref<1x128xf32, #tpu.memory_space<vmem>>
    %37 = tpu.memref_slice %arg11[%c0_i32_21] : memref<2x!tpu.dma_semaphore, #tpu.memory_space<semaphore_mem>> -> memref<1x!tpu.dma_semaphore, #tpu.memory_space<semaphore_mem>>
    %38 = tpu.memref_squeeze %37 : memref<1x!tpu.dma_semaphore, #tpu.memory_space<semaphore_mem>> -> memref<!tpu.dma_semaphore, #tpu.memory_space<semaphore_mem>>
    tpu.enqueue_dma source(%35 : memref<1x128xf32, #tpu.memory_space<any>>) target(%36 : memref<1x128xf32, #tpu.memory_space<vmem>>) target_semaphore(%38 : memref<!tpu.dma_semaphore, #tpu.memory_space<semaphore_mem>>)
    %c3_i32 = arith.constant 3 : i32
    %39 = arith.addi %8, %c3_i32 : i32
    %40 = arith.addi %7, %39 : i32
    %41 = arith.index_cast %40 : i32 to index
    %42 = memref.load %arg1[%41] : memref<96xi32, #tpu.memory_space<smem>>
    %c0_i32_24 = arith.constant 0 : i32
    %c255_i32_25 = arith.constant 255 : i32
    %43 = arith.maxsi %c0_i32_24, %42 : i32
    %44 = arith.minsi %c255_i32_25, %43 : i32
    %c0_i32_26 = arith.constant 0 : i32
    %c0_i32_27 = arith.constant 0 : i32
    %45 = tpu.memref_slice %arg3[%44, %c0_i32_27] : memref<256x128xf32, #tpu.memory_space<any>> -> memref<1x128xf32, #tpu.memory_space<any>>
    %c0_i32_28 = arith.constant 0 : i32
    %46 = tpu.memref_slice %arg9[%39, %c0_i32_28] : memref<16x128xf32, #tpu.memory_space<vmem>> -> memref<1x128xf32, #tpu.memory_space<vmem>>
    %47 = tpu.memref_slice %arg11[%c0_i32_26] : memref<2x!tpu.dma_semaphore, #tpu.memory_space<semaphore_mem>> -> memref<1x!tpu.dma_semaphore, #tpu.memory_space<semaphore_mem>>
    %48 = tpu.memref_squeeze %47 : memref<1x!tpu.dma_semaphore, #tpu.memory_space<semaphore_mem>> -> memref<!tpu.dma_semaphore, #tpu.memory_space<semaphore_mem>>
    tpu.enqueue_dma source(%45 : memref<1x128xf32, #tpu.memory_space<any>>) target(%46 : memref<1x128xf32, #tpu.memory_space<vmem>>) target_semaphore(%48 : memref<!tpu.dma_semaphore, #tpu.memory_space<semaphore_mem>>)
    %c4_i32 = arith.constant 4 : i32
    %49 = arith.addi %8, %c4_i32 : i32
    %50 = arith.addi %7, %49 : i32
    %51 = arith.index_cast %50 : i32 to index
    %52 = memref.load %arg1[%51] : memref<96xi32, #tpu.memory_space<smem>>
    %c0_i32_29 = arith.constant 0 : i32
    %c255_i32_30 = arith.constant 255 : i32
    %53 = arith.maxsi %c0_i32_29, %52 : i32
    %54 = arith.minsi %c255_i32_30, %53 : i32
    %c0_i32_31 = arith.constant 0 : i32
    %c0_i32_32 = arith.constant 0 : i32
    %55 = tpu.memref_slice %arg3[%54, %c0_i32_32] : memref<256x128xf32, #tpu.memory_space<any>> -> memref<1x128xf32, #tpu.memory_space<any>>
    %c0_i32_33 = arith.constant 0 : i32
    %56 = tpu.memref_slice %arg9[%49, %c0_i32_33] : memref<16x128xf32, #tpu.memory_space<vmem>> -> memref<1x128xf32, #tpu.memory_space<vmem>>
    %57 = tpu.memref_slice %arg11[%c0_i32_31] : memref<2x!tpu.dma_semaphore, #tpu.memory_space<semaphore_mem>> -> memref<1x!tpu.dma_semaphore, #tpu.memory_space<semaphore_mem>>
    %58 = tpu.memref_squeeze %57 : memref<1x!tpu.dma_semaphore, #tpu.memory_space<semaphore_mem>> -> memref<!tpu.dma_semaphore, #tpu.memory_space<semaphore_mem>>
    tpu.enqueue_dma source(%55 : memref<1x128xf32, #tpu.memory_space<any>>) target(%56 : memref<1x128xf32, #tpu.memory_space<vmem>>) target_semaphore(%58 : memref<!tpu.dma_semaphore, #tpu.memory_space<semaphore_mem>>)
    %c5_i32 = arith.constant 5 : i32
    %59 = arith.addi %8, %c5_i32 : i32
    %60 = arith.addi %7, %59 : i32
    %61 = arith.index_cast %60 : i32 to index
    %62 = memref.load %arg1[%61] : memref<96xi32, #tpu.memory_space<smem>>
    %c0_i32_34 = arith.constant 0 : i32
    %c255_i32_35 = arith.constant 255 : i32
    %63 = arith.maxsi %c0_i32_34, %62 : i32
    %64 = arith.minsi %c255_i32_35, %63 : i32
    %c0_i32_36 = arith.constant 0 : i32
    %c0_i32_37 = arith.constant 0 : i32
    %65 = tpu.memref_slice %arg3[%64, %c0_i32_37] : memref<256x128xf32, #tpu.memory_space<any>> -> memref<1x128xf32, #tpu.memory_space<any>>
    %c0_i32_38 = arith.constant 0 : i32
    %66 = tpu.memref_slice %arg9[%59, %c0_i32_38] : memref<16x128xf32, #tpu.memory_space<vmem>> -> memref<1x128xf32, #tpu.memory_space<vmem>>
    %67 = tpu.memref_slice %arg11[%c0_i32_36] : memref<2x!tpu.dma_semaphore, #tpu.memory_space<semaphore_mem>> -> memref<1x!tpu.dma_semaphore, #tpu.memory_space<semaphore_mem>>
    %68 = tpu.memref_squeeze %67 : memref<1x!tpu.dma_semaphore, #tpu.memory_space<semaphore_mem>> -> memref<!tpu.dma_semaphore, #tpu.memory_space<semaphore_mem>>
    tpu.enqueue_dma source(%65 : memref<1x128xf32, #tpu.memory_space<any>>) target(%66 : memref<1x128xf32, #tpu.memory_space<vmem>>) target_semaphore(%68 : memref<!tpu.dma_semaphore, #tpu.memory_space<semaphore_mem>>)
    %c6_i32 = arith.constant 6 : i32
    %69 = arith.addi %8, %c6_i32 : i32
    %70 = arith.addi %7, %69 : i32
    %71 = arith.index_cast %70 : i32 to index
    %72 = memref.load %arg1[%71] : memref<96xi32, #tpu.memory_space<smem>>
    %c0_i32_39 = arith.constant 0 : i32
    %c255_i32_40 = arith.constant 255 : i32
    %73 = arith.maxsi %c0_i32_39, %72 : i32
    %74 = arith.minsi %c255_i32_40, %73 : i32
    %c0_i32_41 = arith.constant 0 : i32
    %c0_i32_42 = arith.constant 0 : i32
    %75 = tpu.memref_slice %arg3[%74, %c0_i32_42] : memref<256x128xf32, #tpu.memory_space<any>> -> memref<1x128xf32, #tpu.memory_space<any>>
    %c0_i32_43 = arith.constant 0 : i32
    %76 = tpu.memref_slice %arg9[%69, %c0_i32_43] : memref<16x128xf32, #tpu.memory_space<vmem>> -> memref<1x128xf32, #tpu.memory_space<vmem>>
    %77 = tpu.memref_slice %arg11[%c0_i32_41] : memref<2x!tpu.dma_semaphore, #tpu.memory_space<semaphore_mem>> -> memref<1x!tpu.dma_semaphore, #tpu.memory_space<semaphore_mem>>
    %78 = tpu.memref_squeeze %77 : memref<1x!tpu.dma_semaphore, #tpu.memory_space<semaphore_mem>> -> memref<!tpu.dma_semaphore, #tpu.memory_space<semaphore_mem>>
    tpu.enqueue_dma source(%75 : memref<1x128xf32, #tpu.memory_space<any>>) target(%76 : memref<1x128xf32, #tpu.memory_space<vmem>>) target_semaphore(%78 : memref<!tpu.dma_semaphore, #tpu.memory_space<semaphore_mem>>)
    %c7_i32 = arith.constant 7 : i32
    %79 = arith.addi %8, %c7_i32 : i32
    %80 = arith.addi %7, %79 : i32
    %81 = arith.index_cast %80 : i32 to index
    %82 = memref.load %arg1[%81] : memref<96xi32, #tpu.memory_space<smem>>
    %c0_i32_44 = arith.constant 0 : i32
    %c255_i32_45 = arith.constant 255 : i32
    %83 = arith.maxsi %c0_i32_44, %82 : i32
    %84 = arith.minsi %c255_i32_45, %83 : i32
    %c0_i32_46 = arith.constant 0 : i32
    %c0_i32_47 = arith.constant 0 : i32
    %85 = tpu.memref_slice %arg3[%84, %c0_i32_47] : memref<256x128xf32, #tpu.memory_space<any>> -> memref<1x128xf32, #tpu.memory_space<any>>
    %c0_i32_48 = arith.constant 0 : i32
    %86 = tpu.memref_slice %arg9[%79, %c0_i32_48] : memref<16x128xf32, #tpu.memory_space<vmem>> -> memref<1x128xf32, #tpu.memory_space<vmem>>
    %87 = tpu.memref_slice %arg11[%c0_i32_46] : memref<2x!tpu.dma_semaphore, #tpu.memory_space<semaphore_mem>> -> memref<1x!tpu.dma_semaphore, #tpu.memory_space<semaphore_mem>>
    %88 = tpu.memref_squeeze %87 : memref<1x!tpu.dma_semaphore, #tpu.memory_space<semaphore_mem>> -> memref<!tpu.dma_semaphore, #tpu.memory_space<semaphore_mem>>
    tpu.enqueue_dma source(%85 : memref<1x128xf32, #tpu.memory_space<any>>) target(%86 : memref<1x128xf32, #tpu.memory_space<vmem>>) target_semaphore(%88 : memref<!tpu.dma_semaphore, #tpu.memory_space<semaphore_mem>>)
    %c1_i32_49 = arith.constant 1 : i32
    %c8_i32_50 = arith.constant 8 : i32
    %89 = arith.muli %c1_i32_49, %c8_i32_50 : i32
    %c0_i32_51 = arith.constant 0 : i32
    %90 = arith.addi %89, %c0_i32_51 : i32
    %91 = arith.addi %7, %90 : i32
    %92 = arith.index_cast %91 : i32 to index
    %93 = memref.load %arg1[%92] : memref<96xi32, #tpu.memory_space<smem>>
    %c0_i32_52 = arith.constant 0 : i32
    %c255_i32_53 = arith.constant 255 : i32
    %94 = arith.maxsi %c0_i32_52, %93 : i32
    %95 = arith.minsi %c255_i32_53, %94 : i32
    %c0_i32_54 = arith.constant 0 : i32
    %c0_i32_55 = arith.constant 0 : i32
    %96 = tpu.memref_slice %arg3[%95, %c0_i32_55] : memref<256x128xf32, #tpu.memory_space<any>> -> memref<1x128xf32, #tpu.memory_space<any>>
    %c0_i32_56 = arith.constant 0 : i32
    %97 = tpu.memref_slice %arg9[%90, %c0_i32_56] : memref<16x128xf32, #tpu.memory_space<vmem>> -> memref<1x128xf32, #tpu.memory_space<vmem>>
    %98 = tpu.memref_slice %arg11[%c0_i32_54] : memref<2x!tpu.dma_semaphore, #tpu.memory_space<semaphore_mem>> -> memref<1x!tpu.dma_semaphore, #tpu.memory_space<semaphore_mem>>
    %99 = tpu.memref_squeeze %98 : memref<1x!tpu.dma_semaphore, #tpu.memory_space<semaphore_mem>> -> memref<!tpu.dma_semaphore, #tpu.memory_space<semaphore_mem>>
    tpu.enqueue_dma source(%96 : memref<1x128xf32, #tpu.memory_space<any>>) target(%97 : memref<1x128xf32, #tpu.memory_space<vmem>>) target_semaphore(%99 : memref<!tpu.dma_semaphore, #tpu.memory_space<semaphore_mem>>)
    %c1_i32_57 = arith.constant 1 : i32
    %100 = arith.addi %89, %c1_i32_57 : i32
    %101 = arith.addi %7, %100 : i32
    %102 = arith.index_cast %101 : i32 to index
    %103 = memref.load %arg1[%102] : memref<96xi32, #tpu.memory_space<smem>>
    %c0_i32_58 = arith.constant 0 : i32
    %c255_i32_59 = arith.constant 255 : i32
    %104 = arith.maxsi %c0_i32_58, %103 : i32
    %105 = arith.minsi %c255_i32_59, %104 : i32
    %c0_i32_60 = arith.constant 0 : i32
    %c0_i32_61 = arith.constant 0 : i32
    %106 = tpu.memref_slice %arg3[%105, %c0_i32_61] : memref<256x128xf32, #tpu.memory_space<any>> -> memref<1x128xf32, #tpu.memory_space<any>>
    %c0_i32_62 = arith.constant 0 : i32
    %107 = tpu.memref_slice %arg9[%100, %c0_i32_62] : memref<16x128xf32, #tpu.memory_space<vmem>> -> memref<1x128xf32, #tpu.memory_space<vmem>>
    %108 = tpu.memref_slice %arg11[%c0_i32_60] : memref<2x!tpu.dma_semaphore, #tpu.memory_space<semaphore_mem>> -> memref<1x!tpu.dma_semaphore, #tpu.memory_space<semaphore_mem>>
    %109 = tpu.memref_squeeze %108 : memref<1x!tpu.dma_semaphore, #tpu.memory_space<semaphore_mem>> -> memref<!tpu.dma_semaphore, #tpu.memory_space<semaphore_mem>>
    tpu.enqueue_dma source(%106 : memref<1x128xf32, #tpu.memory_space<any>>) target(%107 : memref<1x128xf32, #tpu.memory_space<vmem>>) target_semaphore(%109 : memref<!tpu.dma_semaphore, #tpu.memory_space<semaphore_mem>>)
    %c2_i32_63 = arith.constant 2 : i32
    %110 = arith.addi %89, %c2_i32_63 : i32
    %111 = arith.addi %7, %110 : i32
    %112 = arith.index_cast %111 : i32 to index
    %113 = memref.load %arg1[%112] : memref<96xi32, #tpu.memory_space<smem>>
    %c0_i32_64 = arith.constant 0 : i32
    %c255_i32_65 = arith.constant 255 : i32
    %114 = arith.maxsi %c0_i32_64, %113 : i32
    %115 = arith.minsi %c255_i32_65, %114 : i32
    %c0_i32_66 = arith.constant 0 : i32
    %c0_i32_67 = arith.constant 0 : i32
    %116 = tpu.memref_slice %arg3[%115, %c0_i32_67] : memref<256x128xf32, #tpu.memory_space<any>> -> memref<1x128xf32, #tpu.memory_space<any>>
    %c0_i32_68 = arith.constant 0 : i32
    %117 = tpu.memref_slice %arg9[%110, %c0_i32_68] : memref<16x128xf32, #tpu.memory_space<vmem>> -> memref<1x128xf32, #tpu.memory_space<vmem>>
    %118 = tpu.memref_slice %arg11[%c0_i32_66] : memref<2x!tpu.dma_semaphore, #tpu.memory_space<semaphore_mem>> -> memref<1x!tpu.dma_semaphore, #tpu.memory_space<semaphore_mem>>
    %119 = tpu.memref_squeeze %118 : memref<1x!tpu.dma_semaphore, #tpu.memory_space<semaphore_mem>> -> memref<!tpu.dma_semaphore, #tpu.memory_space<semaphore_mem>>
    tpu.enqueue_dma source(%116 : memref<1x128xf32, #tpu.memory_space<any>>) target(%117 : memref<1x128xf32, #tpu.memory_space<vmem>>) target_semaphore(%119 : memref<!tpu.dma_semaphore, #tpu.memory_space<semaphore_mem>>)
    %c3_i32_69 = arith.constant 3 : i32
    %120 = arith.addi %89, %c3_i32_69 : i32
    %121 = arith.addi %7, %120 : i32
    %122 = arith.index_cast %121 : i32 to index
    %123 = memref.load %arg1[%122] : memref<96xi32, #tpu.memory_space<smem>>
    %c0_i32_70 = arith.constant 0 : i32
    %c255_i32_71 = arith.constant 255 : i32
    %124 = arith.maxsi %c0_i32_70, %123 : i32
    %125 = arith.minsi %c255_i32_71, %124 : i32
    %c0_i32_72 = arith.constant 0 : i32
    %c0_i32_73 = arith.constant 0 : i32
    %126 = tpu.memref_slice %arg3[%125, %c0_i32_73] : memref<256x128xf32, #tpu.memory_space<any>> -> memref<1x128xf32, #tpu.memory_space<any>>
    %c0_i32_74 = arith.constant 0 : i32
    %127 = tpu.memref_slice %arg9[%120, %c0_i32_74] : memref<16x128xf32, #tpu.memory_space<vmem>> -> memref<1x128xf32, #tpu.memory_space<vmem>>
    %128 = tpu.memref_slice %arg11[%c0_i32_72] : memref<2x!tpu.dma_semaphore, #tpu.memory_space<semaphore_mem>> -> memref<1x!tpu.dma_semaphore, #tpu.memory_space<semaphore_mem>>
    %129 = tpu.memref_squeeze %128 : memref<1x!tpu.dma_semaphore, #tpu.memory_space<semaphore_mem>> -> memref<!tpu.dma_semaphore, #tpu.memory_space<semaphore_mem>>
    tpu.enqueue_dma source(%126 : memref<1x128xf32, #tpu.memory_space<any>>) target(%127 : memref<1x128xf32, #tpu.memory_space<vmem>>) target_semaphore(%129 : memref<!tpu.dma_semaphore, #tpu.memory_space<semaphore_mem>>)
    %c4_i32_75 = arith.constant 4 : i32
    %130 = arith.addi %89, %c4_i32_75 : i32
    %131 = arith.addi %7, %130 : i32
    %132 = arith.index_cast %131 : i32 to index
    %133 = memref.load %arg1[%132] : memref<96xi32, #tpu.memory_space<smem>>
    %c0_i32_76 = arith.constant 0 : i32
    %c255_i32_77 = arith.constant 255 : i32
    %134 = arith.maxsi %c0_i32_76, %133 : i32
    %135 = arith.minsi %c255_i32_77, %134 : i32
    %c0_i32_78 = arith.constant 0 : i32
    %c0_i32_79 = arith.constant 0 : i32
    %136 = tpu.memref_slice %arg3[%135, %c0_i32_79] : memref<256x128xf32, #tpu.memory_space<any>> -> memref<1x128xf32, #tpu.memory_space<any>>
    %c0_i32_80 = arith.constant 0 : i32
    %137 = tpu.memref_slice %arg9[%130, %c0_i32_80] : memref<16x128xf32, #tpu.memory_space<vmem>> -> memref<1x128xf32, #tpu.memory_space<vmem>>
    %138 = tpu.memref_slice %arg11[%c0_i32_78] : memref<2x!tpu.dma_semaphore, #tpu.memory_space<semaphore_mem>> -> memref<1x!tpu.dma_semaphore, #tpu.memory_space<semaphore_mem>>
    %139 = tpu.memref_squeeze %138 : memref<1x!tpu.dma_semaphore, #tpu.memory_space<semaphore_mem>> -> memref<!tpu.dma_semaphore, #tpu.memory_space<semaphore_mem>>
    tpu.enqueue_dma source(%136 : memref<1x128xf32, #tpu.memory_space<any>>) target(%137 : memref<1x128xf32, #tpu.memory_space<vmem>>) target_semaphore(%139 : memref<!tpu.dma_semaphore, #tpu.memory_space<semaphore_mem>>)
    %c5_i32_81 = arith.constant 5 : i32
    %140 = arith.addi %89, %c5_i32_81 : i32
    %141 = arith.addi %7, %140 : i32
    %142 = arith.index_cast %141 : i32 to index
    %143 = memref.load %arg1[%142] : memref<96xi32, #tpu.memory_space<smem>>
    %c0_i32_82 = arith.constant 0 : i32
    %c255_i32_83 = arith.constant 255 : i32
    %144 = arith.maxsi %c0_i32_82, %143 : i32
    %145 = arith.minsi %c255_i32_83, %144 : i32
    %c0_i32_84 = arith.constant 0 : i32
    %c0_i32_85 = arith.constant 0 : i32
    %146 = tpu.memref_slice %arg3[%145, %c0_i32_85] : memref<256x128xf32, #tpu.memory_space<any>> -> memref<1x128xf32, #tpu.memory_space<any>>
    %c0_i32_86 = arith.constant 0 : i32
    %147 = tpu.memref_slice %arg9[%140, %c0_i32_86] : memref<16x128xf32, #tpu.memory_space<vmem>> -> memref<1x128xf32, #tpu.memory_space<vmem>>
    %148 = tpu.memref_slice %arg11[%c0_i32_84] : memref<2x!tpu.dma_semaphore, #tpu.memory_space<semaphore_mem>> -> memref<1x!tpu.dma_semaphore, #tpu.memory_space<semaphore_mem>>
    %149 = tpu.memref_squeeze %148 : memref<1x!tpu.dma_semaphore, #tpu.memory_space<semaphore_mem>> -> memref<!tpu.dma_semaphore, #tpu.memory_space<semaphore_mem>>
    tpu.enqueue_dma source(%146 : memref<1x128xf32, #tpu.memory_space<any>>) target(%147 : memref<1x128xf32, #tpu.memory_space<vmem>>) target_semaphore(%149 : memref<!tpu.dma_semaphore, #tpu.memory_space<semaphore_mem>>)
    %c6_i32_87 = arith.constant 6 : i32
    %150 = arith.addi %89, %c6_i32_87 : i32
    %151 = arith.addi %7, %150 : i32
    %152 = arith.index_cast %151 : i32 to index
    %153 = memref.load %arg1[%152] : memref<96xi32, #tpu.memory_space<smem>>
    %c0_i32_88 = arith.constant 0 : i32
    %c255_i32_89 = arith.constant 255 : i32
    %154 = arith.maxsi %c0_i32_88, %153 : i32
    %155 = arith.minsi %c255_i32_89, %154 : i32
    %c0_i32_90 = arith.constant 0 : i32
    %c0_i32_91 = arith.constant 0 : i32
    %156 = tpu.memref_slice %arg3[%155, %c0_i32_91] : memref<256x128xf32, #tpu.memory_space<any>> -> memref<1x128xf32, #tpu.memory_space<any>>
    %c0_i32_92 = arith.constant 0 : i32
    %157 = tpu.memref_slice %arg9[%150, %c0_i32_92] : memref<16x128xf32, #tpu.memory_space<vmem>> -> memref<1x128xf32, #tpu.memory_space<vmem>>
    %158 = tpu.memref_slice %arg11[%c0_i32_90] : memref<2x!tpu.dma_semaphore, #tpu.memory_space<semaphore_mem>> -> memref<1x!tpu.dma_semaphore, #tpu.memory_space<semaphore_mem>>
    %159 = tpu.memref_squeeze %158 : memref<1x!tpu.dma_semaphore, #tpu.memory_space<semaphore_mem>> -> memref<!tpu.dma_semaphore, #tpu.memory_space<semaphore_mem>>
    tpu.enqueue_dma source(%156 : memref<1x128xf32, #tpu.memory_space<any>>) target(%157 : memref<1x128xf32, #tpu.memory_space<vmem>>) target_semaphore(%159 : memref<!tpu.dma_semaphore, #tpu.memory_space<semaphore_mem>>)
    %c7_i32_93 = arith.constant 7 : i32
    %160 = arith.addi %89, %c7_i32_93 : i32
    %161 = arith.addi %7, %160 : i32
    %162 = arith.index_cast %161 : i32 to index
    %163 = memref.load %arg1[%162] : memref<96xi32, #tpu.memory_space<smem>>
    %c0_i32_94 = arith.constant 0 : i32
    %c255_i32_95 = arith.constant 255 : i32
    %164 = arith.maxsi %c0_i32_94, %163 : i32
    %165 = arith.minsi %c255_i32_95, %164 : i32
    %c0_i32_96 = arith.constant 0 : i32
    %c0_i32_97 = arith.constant 0 : i32
    %166 = tpu.memref_slice %arg3[%165, %c0_i32_97] : memref<256x128xf32, #tpu.memory_space<any>> -> memref<1x128xf32, #tpu.memory_space<any>>
    %c0_i32_98 = arith.constant 0 : i32
    %167 = tpu.memref_slice %arg9[%160, %c0_i32_98] : memref<16x128xf32, #tpu.memory_space<vmem>> -> memref<1x128xf32, #tpu.memory_space<vmem>>
    %168 = tpu.memref_slice %arg11[%c0_i32_96] : memref<2x!tpu.dma_semaphore, #tpu.memory_space<semaphore_mem>> -> memref<1x!tpu.dma_semaphore, #tpu.memory_space<semaphore_mem>>
    %169 = tpu.memref_squeeze %168 : memref<1x!tpu.dma_semaphore, #tpu.memory_space<semaphore_mem>> -> memref<!tpu.dma_semaphore, #tpu.memory_space<semaphore_mem>>
    tpu.enqueue_dma source(%166 : memref<1x128xf32, #tpu.memory_space<any>>) target(%167 : memref<1x128xf32, #tpu.memory_space<vmem>>) target_semaphore(%169 : memref<!tpu.dma_semaphore, #tpu.memory_space<semaphore_mem>>)
    %c2_i32_99 = arith.constant 2 : i32
    %c16_i32 = arith.constant 16 : i32
    %170 = arith.addi %0, %c16_i32 : i32
    %c0_i32_100 = arith.constant 0 : i32
    %c8_i32_101 = arith.constant 8 : i32
    %171 = arith.muli %c0_i32_100, %c8_i32_101 : i32
    %c0_i32_102 = arith.constant 0 : i32
    %172 = arith.addi %171, %c0_i32_102 : i32
    %173 = arith.addi %170, %172 : i32
    %174 = arith.index_cast %173 : i32 to index
    %175 = memref.load %arg1[%174] : memref<96xi32, #tpu.memory_space<smem>>
    %c0_i32_103 = arith.constant 0 : i32
    %c255_i32_104 = arith.constant 255 : i32
    %176 = arith.maxsi %c0_i32_103, %175 : i32
    %177 = arith.minsi %c255_i32_104, %176 : i32
    %c1_i32_105 = arith.constant 1 : i32
    %c0_i32_106 = arith.constant 0 : i32
    %178 = tpu.memref_slice %arg3[%177, %c0_i32_106] : memref<256x128xf32, #tpu.memory_space<any>> -> memref<1x128xf32, #tpu.memory_space<any>>
    %c0_i32_107 = arith.constant 0 : i32
    %179 = tpu.memref_slice %arg10[%172, %c0_i32_107] : memref<16x128xf32, #tpu.memory_space<vmem>> -> memref<1x128xf32, #tpu.memory_space<vmem>>
    %180 = tpu.memref_slice %arg11[%c1_i32_105] : memref<2x!tpu.dma_semaphore, #tpu.memory_space<semaphore_mem>> -> memref<1x!tpu.dma_semaphore, #tpu.memory_space<semaphore_mem>>
    %181 = tpu.memref_squeeze %180 : memref<1x!tpu.dma_semaphore, #tpu.memory_space<semaphore_mem>> -> memref<!tpu.dma_semaphore, #tpu.memory_space<semaphore_mem>>
    tpu.enqueue_dma source(%178 : memref<1x128xf32, #tpu.memory_space<any>>) target(%179 : memref<1x128xf32, #tpu.memory_space<vmem>>) target_semaphore(%181 : memref<!tpu.dma_semaphore, #tpu.memory_space<semaphore_mem>>)
    %c1_i32_108 = arith.constant 1 : i32
    %182 = arith.addi %171, %c1_i32_108 : i32
    %183 = arith.addi %170, %182 : i32
    %184 = arith.index_cast %183 : i32 to index
    %185 = memref.load %arg1[%184] : memref<96xi32, #tpu.memory_space<smem>>
    %c0_i32_109 = arith.constant 0 : i32
    %c255_i32_110 = arith.constant 255 : i32
    %186 = arith.maxsi %c0_i32_109, %185 : i32
    %187 = arith.minsi %c255_i32_110, %186 : i32
    %c1_i32_111 = arith.constant 1 : i32
    %c0_i32_112 = arith.constant 0 : i32
    %188 = tpu.memref_slice %arg3[%187, %c0_i32_112] : memref<256x128xf32, #tpu.memory_space<any>> -> memref<1x128xf32, #tpu.memory_space<any>>
    %c0_i32_113 = arith.constant 0 : i32
    %189 = tpu.memref_slice %arg10[%182, %c0_i32_113] : memref<16x128xf32, #tpu.memory_space<vmem>> -> memref<1x128xf32, #tpu.memory_space<vmem>>
    %190 = tpu.memref_slice %arg11[%c1_i32_111] : memref<2x!tpu.dma_semaphore, #tpu.memory_space<semaphore_mem>> -> memref<1x!tpu.dma_semaphore, #tpu.memory_space<semaphore_mem>>
    %191 = tpu.memref_squeeze %190 : memref<1x!tpu.dma_semaphore, #tpu.memory_space<semaphore_mem>> -> memref<!tpu.dma_semaphore, #tpu.memory_space<semaphore_mem>>
    tpu.enqueue_dma source(%188 : memref<1x128xf32, #tpu.memory_space<any>>) target(%189 : memref<1x128xf32, #tpu.memory_space<vmem>>) target_semaphore(%191 : memref<!tpu.dma_semaphore, #tpu.memory_space<semaphore_mem>>)
    %c2_i32_114 = arith.constant 2 : i32
    %192 = arith.addi %171, %c2_i32_114 : i32
    %193 = arith.addi %170, %192 : i32
    %194 = arith.index_cast %193 : i32 to index
    %195 = memref.load %arg1[%194] : memref<96xi32, #tpu.memory_space<smem>>
    %c0_i32_115 = arith.constant 0 : i32
    %c255_i32_116 = arith.constant 255 : i32
    %196 = arith.maxsi %c0_i32_115, %195 : i32
    %197 = arith.minsi %c255_i32_116, %196 : i32
    %c1_i32_117 = arith.constant 1 : i32
    %c0_i32_118 = arith.constant 0 : i32
    %198 = tpu.memref_slice %arg3[%197, %c0_i32_118] : memref<256x128xf32, #tpu.memory_space<any>> -> memref<1x128xf32, #tpu.memory_space<any>>
    %c0_i32_119 = arith.constant 0 : i32
    %199 = tpu.memref_slice %arg10[%192, %c0_i32_119] : memref<16x128xf32, #tpu.memory_space<vmem>> -> memref<1x128xf32, #tpu.memory_space<vmem>>
    %200 = tpu.memref_slice %arg11[%c1_i32_117] : memref<2x!tpu.dma_semaphore, #tpu.memory_space<semaphore_mem>> -> memref<1x!tpu.dma_semaphore, #tpu.memory_space<semaphore_mem>>
    %201 = tpu.memref_squeeze %200 : memref<1x!tpu.dma_semaphore, #tpu.memory_space<semaphore_mem>> -> memref<!tpu.dma_semaphore, #tpu.memory_space<semaphore_mem>>
    tpu.enqueue_dma source(%198 : memref<1x128xf32, #tpu.memory_space<any>>) target(%199 : memref<1x128xf32, #tpu.memory_space<vmem>>) target_semaphore(%201 : memref<!tpu.dma_semaphore, #tpu.memory_space<semaphore_mem>>)
    %c3_i32_120 = arith.constant 3 : i32
    %202 = arith.addi %171, %c3_i32_120 : i32
    %203 = arith.addi %170, %202 : i32
    %204 = arith.index_cast %203 : i32 to index
    %205 = memref.load %arg1[%204] : memref<96xi32, #tpu.memory_space<smem>>
    %c0_i32_121 = arith.constant 0 : i32
    %c255_i32_122 = arith.constant 255 : i32
    %206 = arith.maxsi %c0_i32_121, %205 : i32
    %207 = arith.minsi %c255_i32_122, %206 : i32
    %c1_i32_123 = arith.constant 1 : i32
    %c0_i32_124 = arith.constant 0 : i32
    %208 = tpu.memref_slice %arg3[%207, %c0_i32_124] : memref<256x128xf32, #tpu.memory_space<any>> -> memref<1x128xf32, #tpu.memory_space<any>>
    %c0_i32_125 = arith.constant 0 : i32
    %209 = tpu.memref_slice %arg10[%202, %c0_i32_125] : memref<16x128xf32, #tpu.memory_space<vmem>> -> memref<1x128xf32, #tpu.memory_space<vmem>>
    %210 = tpu.memref_slice %arg11[%c1_i32_123] : memref<2x!tpu.dma_semaphore, #tpu.memory_space<semaphore_mem>> -> memref<1x!tpu.dma_semaphore, #tpu.memory_space<semaphore_mem>>
    %211 = tpu.memref_squeeze %210 : memref<1x!tpu.dma_semaphore, #tpu.memory_space<semaphore_mem>> -> memref<!tpu.dma_semaphore, #tpu.memory_space<semaphore_mem>>
    tpu.enqueue_dma source(%208 : memref<1x128xf32, #tpu.memory_space<any>>) target(%209 : memref<1x128xf32, #tpu.memory_space<vmem>>) target_semaphore(%211 : memref<!tpu.dma_semaphore, #tpu.memory_space<semaphore_mem>>)
    %c4_i32_126 = arith.constant 4 : i32
    %212 = arith.addi %171, %c4_i32_126 : i32
    %213 = arith.addi %170, %212 : i32
    %214 = arith.index_cast %213 : i32 to index
    %215 = memref.load %arg1[%214] : memref<96xi32, #tpu.memory_space<smem>>
    %c0_i32_127 = arith.constant 0 : i32
    %c255_i32_128 = arith.constant 255 : i32
    %216 = arith.maxsi %c0_i32_127, %215 : i32
    %217 = arith.minsi %c255_i32_128, %216 : i32
    %c1_i32_129 = arith.constant 1 : i32
    %c0_i32_130 = arith.constant 0 : i32
    %218 = tpu.memref_slice %arg3[%217, %c0_i32_130] : memref<256x128xf32, #tpu.memory_space<any>> -> memref<1x128xf32, #tpu.memory_space<any>>
    %c0_i32_131 = arith.constant 0 : i32
    %219 = tpu.memref_slice %arg10[%212, %c0_i32_131] : memref<16x128xf32, #tpu.memory_space<vmem>> -> memref<1x128xf32, #tpu.memory_space<vmem>>
    %220 = tpu.memref_slice %arg11[%c1_i32_129] : memref<2x!tpu.dma_semaphore, #tpu.memory_space<semaphore_mem>> -> memref<1x!tpu.dma_semaphore, #tpu.memory_space<semaphore_mem>>
    %221 = tpu.memref_squeeze %220 : memref<1x!tpu.dma_semaphore, #tpu.memory_space<semaphore_mem>> -> memref<!tpu.dma_semaphore, #tpu.memory_space<semaphore_mem>>
    tpu.enqueue_dma source(%218 : memref<1x128xf32, #tpu.memory_space<any>>) target(%219 : memref<1x128xf32, #tpu.memory_space<vmem>>) target_semaphore(%221 : memref<!tpu.dma_semaphore, #tpu.memory_space<semaphore_mem>>)
    %c5_i32_132 = arith.constant 5 : i32
    %222 = arith.addi %171, %c5_i32_132 : i32
    %223 = arith.addi %170, %222 : i32
    %224 = arith.index_cast %223 : i32 to index
    %225 = memref.load %arg1[%224] : memref<96xi32, #tpu.memory_space<smem>>
    %c0_i32_133 = arith.constant 0 : i32
    %c255_i32_134 = arith.constant 255 : i32
    %226 = arith.maxsi %c0_i32_133, %225 : i32
    %227 = arith.minsi %c255_i32_134, %226 : i32
    %c1_i32_135 = arith.constant 1 : i32
    %c0_i32_136 = arith.constant 0 : i32
    %228 = tpu.memref_slice %arg3[%227, %c0_i32_136] : memref<256x128xf32, #tpu.memory_space<any>> -> memref<1x128xf32, #tpu.memory_space<any>>
    %c0_i32_137 = arith.constant 0 : i32
    %229 = tpu.memref_slice %arg10[%222, %c0_i32_137] : memref<16x128xf32, #tpu.memory_space<vmem>> -> memref<1x128xf32, #tpu.memory_space<vmem>>
    %230 = tpu.memref_slice %arg11[%c1_i32_135] : memref<2x!tpu.dma_semaphore, #tpu.memory_space<semaphore_mem>> -> memref<1x!tpu.dma_semaphore, #tpu.memory_space<semaphore_mem>>
    %231 = tpu.memref_squeeze %230 : memref<1x!tpu.dma_semaphore, #tpu.memory_space<semaphore_mem>> -> memref<!tpu.dma_semaphore, #tpu.memory_space<semaphore_mem>>
    tpu.enqueue_dma source(%228 : memref<1x128xf32, #tpu.memory_space<any>>) target(%229 : memref<1x128xf32, #tpu.memory_space<vmem>>) target_semaphore(%231 : memref<!tpu.dma_semaphore, #tpu.memory_space<semaphore_mem>>)
    %c6_i32_138 = arith.constant 6 : i32
    %232 = arith.addi %171, %c6_i32_138 : i32
    %233 = arith.addi %170, %232 : i32
    %234 = arith.index_cast %233 : i32 to index
    %235 = memref.load %arg1[%234] : memref<96xi32, #tpu.memory_space<smem>>
    %c0_i32_139 = arith.constant 0 : i32
    %c255_i32_140 = arith.constant 255 : i32
    %236 = arith.maxsi %c0_i32_139, %235 : i32
    %237 = arith.minsi %c255_i32_140, %236 : i32
    %c1_i32_141 = arith.constant 1 : i32
    %c0_i32_142 = arith.constant 0 : i32
    %238 = tpu.memref_slice %arg3[%237, %c0_i32_142] : memref<256x128xf32, #tpu.memory_space<any>> -> memref<1x128xf32, #tpu.memory_space<any>>
    %c0_i32_143 = arith.constant 0 : i32
    %239 = tpu.memref_slice %arg10[%232, %c0_i32_143] : memref<16x128xf32, #tpu.memory_space<vmem>> -> memref<1x128xf32, #tpu.memory_space<vmem>>
    %240 = tpu.memref_slice %arg11[%c1_i32_141] : memref<2x!tpu.dma_semaphore, #tpu.memory_space<semaphore_mem>> -> memref<1x!tpu.dma_semaphore, #tpu.memory_space<semaphore_mem>>
    %241 = tpu.memref_squeeze %240 : memref<1x!tpu.dma_semaphore, #tpu.memory_space<semaphore_mem>> -> memref<!tpu.dma_semaphore, #tpu.memory_space<semaphore_mem>>
    tpu.enqueue_dma source(%238 : memref<1x128xf32, #tpu.memory_space<any>>) target(%239 : memref<1x128xf32, #tpu.memory_space<vmem>>) target_semaphore(%241 : memref<!tpu.dma_semaphore, #tpu.memory_space<semaphore_mem>>)
    %c7_i32_144 = arith.constant 7 : i32
    %242 = arith.addi %171, %c7_i32_144 : i32
    %243 = arith.addi %170, %242 : i32
    %244 = arith.index_cast %243 : i32 to index
    %245 = memref.load %arg1[%244] : memref<96xi32, #tpu.memory_space<smem>>
    %c0_i32_145 = arith.constant 0 : i32
    %c255_i32_146 = arith.constant 255 : i32
    %246 = arith.maxsi %c0_i32_145, %245 : i32
    %247 = arith.minsi %c255_i32_146, %246 : i32
    %c1_i32_147 = arith.constant 1 : i32
    %c0_i32_148 = arith.constant 0 : i32
    %248 = tpu.memref_slice %arg3[%247, %c0_i32_148] : memref<256x128xf32, #tpu.memory_space<any>> -> memref<1x128xf32, #tpu.memory_space<any>>
    %c0_i32_149 = arith.constant 0 : i32
    %249 = tpu.memref_slice %arg10[%242, %c0_i32_149] : memref<16x128xf32, #tpu.memory_space<vmem>> -> memref<1x128xf32, #tpu.memory_space<vmem>>
    %250 = tpu.memref_slice %arg11[%c1_i32_147] : memref<2x!tpu.dma_semaphore, #tpu.memory_space<semaphore_mem>> -> memref<1x!tpu.dma_semaphore, #tpu.memory_space<semaphore_mem>>
    %251 = tpu.memref_squeeze %250 : memref<1x!tpu.dma_semaphore, #tpu.memory_space<semaphore_mem>> -> memref<!tpu.dma_semaphore, #tpu.memory_space<semaphore_mem>>
    tpu.enqueue_dma source(%248 : memref<1x128xf32, #tpu.memory_space<any>>) target(%249 : memref<1x128xf32, #tpu.memory_space<vmem>>) target_semaphore(%251 : memref<!tpu.dma_semaphore, #tpu.memory_space<semaphore_mem>>)
    %c1_i32_150 = arith.constant 1 : i32
    %c8_i32_151 = arith.constant 8 : i32
    %252 = arith.muli %c1_i32_150, %c8_i32_151 : i32
    %c0_i32_152 = arith.constant 0 : i32
    %253 = arith.addi %252, %c0_i32_152 : i32
    %254 = arith.addi %170, %253 : i32
    %255 = arith.index_cast %254 : i32 to index
    %256 = memref.load %arg1[%255] : memref<96xi32, #tpu.memory_space<smem>>
    %c0_i32_153 = arith.constant 0 : i32
    %c255_i32_154 = arith.constant 255 : i32
    %257 = arith.maxsi %c0_i32_153, %256 : i32
    %258 = arith.minsi %c255_i32_154, %257 : i32
    %c1_i32_155 = arith.constant 1 : i32
    %c0_i32_156 = arith.constant 0 : i32
    %259 = tpu.memref_slice %arg3[%258, %c0_i32_156] : memref<256x128xf32, #tpu.memory_space<any>> -> memref<1x128xf32, #tpu.memory_space<any>>
    %c0_i32_157 = arith.constant 0 : i32
    %260 = tpu.memref_slice %arg10[%253, %c0_i32_157] : memref<16x128xf32, #tpu.memory_space<vmem>> -> memref<1x128xf32, #tpu.memory_space<vmem>>
    %261 = tpu.memref_slice %arg11[%c1_i32_155] : memref<2x!tpu.dma_semaphore, #tpu.memory_space<semaphore_mem>> -> memref<1x!tpu.dma_semaphore, #tpu.memory_space<semaphore_mem>>
    %262 = tpu.memref_squeeze %261 : memref<1x!tpu.dma_semaphore, #tpu.memory_space<semaphore_mem>> -> memref<!tpu.dma_semaphore, #tpu.memory_space<semaphore_mem>>
    tpu.enqueue_dma source(%259 : memref<1x128xf32, #tpu.memory_space<any>>) target(%260 : memref<1x128xf32, #tpu.memory_space<vmem>>) target_semaphore(%262 : memref<!tpu.dma_semaphore, #tpu.memory_space<semaphore_mem>>)
    %c1_i32_158 = arith.constant 1 : i32
    %263 = arith.addi %252, %c1_i32_158 : i32
    %264 = arith.addi %170, %263 : i32
    %265 = arith.index_cast %264 : i32 to index
    %266 = memref.load %arg1[%265] : memref<96xi32, #tpu.memory_space<smem>>
    %c0_i32_159 = arith.constant 0 : i32
    %c255_i32_160 = arith.constant 255 : i32
    %267 = arith.maxsi %c0_i32_159, %266 : i32
    %268 = arith.minsi %c255_i32_160, %267 : i32
    %c1_i32_161 = arith.constant 1 : i32
    %c0_i32_162 = arith.constant 0 : i32
    %269 = tpu.memref_slice %arg3[%268, %c0_i32_162] : memref<256x128xf32, #tpu.memory_space<any>> -> memref<1x128xf32, #tpu.memory_space<any>>
    %c0_i32_163 = arith.constant 0 : i32
    %270 = tpu.memref_slice %arg10[%263, %c0_i32_163] : memref<16x128xf32, #tpu.memory_space<vmem>> -> memref<1x128xf32, #tpu.memory_space<vmem>>
    %271 = tpu.memref_slice %arg11[%c1_i32_161] : memref<2x!tpu.dma_semaphore, #tpu.memory_space<semaphore_mem>> -> memref<1x!tpu.dma_semaphore, #tpu.memory_space<semaphore_mem>>
    %272 = tpu.memref_squeeze %271 : memref<1x!tpu.dma_semaphore, #tpu.memory_space<semaphore_mem>> -> memref<!tpu.dma_semaphore, #tpu.memory_space<semaphore_mem>>
    tpu.enqueue_dma source(%269 : memref<1x128xf32, #tpu.memory_space<any>>) target(%270 : memref<1x128xf32, #tpu.memory_space<vmem>>) target_semaphore(%272 : memref<!tpu.dma_semaphore, #tpu.memory_space<semaphore_mem>>)
    %c2_i32_164 = arith.constant 2 : i32
    %273 = arith.addi %252, %c2_i32_164 : i32
    %274 = arith.addi %170, %273 : i32
    %275 = arith.index_cast %274 : i32 to index
    %276 = memref.load %arg1[%275] : memref<96xi32, #tpu.memory_space<smem>>
    %c0_i32_165 = arith.constant 0 : i32
    %c255_i32_166 = arith.constant 255 : i32
    %277 = arith.maxsi %c0_i32_165, %276 : i32
    %278 = arith.minsi %c255_i32_166, %277 : i32
    %c1_i32_167 = arith.constant 1 : i32
    %c0_i32_168 = arith.constant 0 : i32
    %279 = tpu.memref_slice %arg3[%278, %c0_i32_168] : memref<256x128xf32, #tpu.memory_space<any>> -> memref<1x128xf32, #tpu.memory_space<any>>
    %c0_i32_169 = arith.constant 0 : i32
    %280 = tpu.memref_slice %arg10[%273, %c0_i32_169] : memref<16x128xf32, #tpu.memory_space<vmem>> -> memref<1x128xf32, #tpu.memory_space<vmem>>
    %281 = tpu.memref_slice %arg11[%c1_i32_167] : memref<2x!tpu.dma_semaphore, #tpu.memory_space<semaphore_mem>> -> memref<1x!tpu.dma_semaphore, #tpu.memory_space<semaphore_mem>>
    %282 = tpu.memref_squeeze %281 : memref<1x!tpu.dma_semaphore, #tpu.memory_space<semaphore_mem>> -> memref<!tpu.dma_semaphore, #tpu.memory_space<semaphore_mem>>
    tpu.enqueue_dma source(%279 : memref<1x128xf32, #tpu.memory_space<any>>) target(%280 : memref<1x128xf32, #tpu.memory_space<vmem>>) target_semaphore(%282 : memref<!tpu.dma_semaphore, #tpu.memory_space<semaphore_mem>>)
    %c3_i32_170 = arith.constant 3 : i32
    %283 = arith.addi %252, %c3_i32_170 : i32
    %284 = arith.addi %170, %283 : i32
    %285 = arith.index_cast %284 : i32 to index
    %286 = memref.load %arg1[%285] : memref<96xi32, #tpu.memory_space<smem>>
    %c0_i32_171 = arith.constant 0 : i32
    %c255_i32_172 = arith.constant 255 : i32
    %287 = arith.maxsi %c0_i32_171, %286 : i32
    %288 = arith.minsi %c255_i32_172, %287 : i32
    %c1_i32_173 = arith.constant 1 : i32
    %c0_i32_174 = arith.constant 0 : i32
    %289 = tpu.memref_slice %arg3[%288, %c0_i32_174] : memref<256x128xf32, #tpu.memory_space<any>> -> memref<1x128xf32, #tpu.memory_space<any>>
    %c0_i32_175 = arith.constant 0 : i32
    %290 = tpu.memref_slice %arg10[%283, %c0_i32_175] : memref<16x128xf32, #tpu.memory_space<vmem>> -> memref<1x128xf32, #tpu.memory_space<vmem>>
    %291 = tpu.memref_slice %arg11[%c1_i32_173] : memref<2x!tpu.dma_semaphore, #tpu.memory_space<semaphore_mem>> -> memref<1x!tpu.dma_semaphore, #tpu.memory_space<semaphore_mem>>
    %292 = tpu.memref_squeeze %291 : memref<1x!tpu.dma_semaphore, #tpu.memory_space<semaphore_mem>> -> memref<!tpu.dma_semaphore, #tpu.memory_space<semaphore_mem>>
    tpu.enqueue_dma source(%289 : memref<1x128xf32, #tpu.memory_space<any>>) target(%290 : memref<1x128xf32, #tpu.memory_space<vmem>>) target_semaphore(%292 : memref<!tpu.dma_semaphore, #tpu.memory_space<semaphore_mem>>)
    %c4_i32_176 = arith.constant 4 : i32
    %293 = arith.addi %252, %c4_i32_176 : i32
    %294 = arith.addi %170, %293 : i32
    %295 = arith.index_cast %294 : i32 to index
    %296 = memref.load %arg1[%295] : memref<96xi32, #tpu.memory_space<smem>>
    %c0_i32_177 = arith.constant 0 : i32
    %c255_i32_178 = arith.constant 255 : i32
    %297 = arith.maxsi %c0_i32_177, %296 : i32
    %298 = arith.minsi %c255_i32_178, %297 : i32
    %c1_i32_179 = arith.constant 1 : i32
    %c0_i32_180 = arith.constant 0 : i32
    %299 = tpu.memref_slice %arg3[%298, %c0_i32_180] : memref<256x128xf32, #tpu.memory_space<any>> -> memref<1x128xf32, #tpu.memory_space<any>>
    %c0_i32_181 = arith.constant 0 : i32
    %300 = tpu.memref_slice %arg10[%293, %c0_i32_181] : memref<16x128xf32, #tpu.memory_space<vmem>> -> memref<1x128xf32, #tpu.memory_space<vmem>>
    %301 = tpu.memref_slice %arg11[%c1_i32_179] : memref<2x!tpu.dma_semaphore, #tpu.memory_space<semaphore_mem>> -> memref<1x!tpu.dma_semaphore, #tpu.memory_space<semaphore_mem>>
    %302 = tpu.memref_squeeze %301 : memref<1x!tpu.dma_semaphore, #tpu.memory_space<semaphore_mem>> -> memref<!tpu.dma_semaphore, #tpu.memory_space<semaphore_mem>>
    tpu.enqueue_dma source(%299 : memref<1x128xf32, #tpu.memory_space<any>>) target(%300 : memref<1x128xf32, #tpu.memory_space<vmem>>) target_semaphore(%302 : memref<!tpu.dma_semaphore, #tpu.memory_space<semaphore_mem>>)
    %c5_i32_182 = arith.constant 5 : i32
    %303 = arith.addi %252, %c5_i32_182 : i32
    %304 = arith.addi %170, %303 : i32
    %305 = arith.index_cast %304 : i32 to index
    %306 = memref.load %arg1[%305] : memref<96xi32, #tpu.memory_space<smem>>
    %c0_i32_183 = arith.constant 0 : i32
    %c255_i32_184 = arith.constant 255 : i32
    %307 = arith.maxsi %c0_i32_183, %306 : i32
    %308 = arith.minsi %c255_i32_184, %307 : i32
    %c1_i32_185 = arith.constant 1 : i32
    %c0_i32_186 = arith.constant 0 : i32
    %309 = tpu.memref_slice %arg3[%308, %c0_i32_186] : memref<256x128xf32, #tpu.memory_space<any>> -> memref<1x128xf32, #tpu.memory_space<any>>
    %c0_i32_187 = arith.constant 0 : i32
    %310 = tpu.memref_slice %arg10[%303, %c0_i32_187] : memref<16x128xf32, #tpu.memory_space<vmem>> -> memref<1x128xf32, #tpu.memory_space<vmem>>
    %311 = tpu.memref_slice %arg11[%c1_i32_185] : memref<2x!tpu.dma_semaphore, #tpu.memory_space<semaphore_mem>> -> memref<1x!tpu.dma_semaphore, #tpu.memory_space<semaphore_mem>>
    %312 = tpu.memref_squeeze %311 : memref<1x!tpu.dma_semaphore, #tpu.memory_space<semaphore_mem>> -> memref<!tpu.dma_semaphore, #tpu.memory_space<semaphore_mem>>
    tpu.enqueue_dma source(%309 : memref<1x128xf32, #tpu.memory_space<any>>) target(%310 : memref<1x128xf32, #tpu.memory_space<vmem>>) target_semaphore(%312 : memref<!tpu.dma_semaphore, #tpu.memory_space<semaphore_mem>>)
    %c6_i32_188 = arith.constant 6 : i32
    %313 = arith.addi %252, %c6_i32_188 : i32
    %314 = arith.addi %170, %313 : i32
    %315 = arith.index_cast %314 : i32 to index
    %316 = memref.load %arg1[%315] : memref<96xi32, #tpu.memory_space<smem>>
    %c0_i32_189 = arith.constant 0 : i32
    %c255_i32_190 = arith.constant 255 : i32
    %317 = arith.maxsi %c0_i32_189, %316 : i32
    %318 = arith.minsi %c255_i32_190, %317 : i32
    %c1_i32_191 = arith.constant 1 : i32
    %c0_i32_192 = arith.constant 0 : i32
    %319 = tpu.memref_slice %arg3[%318, %c0_i32_192] : memref<256x128xf32, #tpu.memory_space<any>> -> memref<1x128xf32, #tpu.memory_space<any>>
    %c0_i32_193 = arith.constant 0 : i32
    %320 = tpu.memref_slice %arg10[%313, %c0_i32_193] : memref<16x128xf32, #tpu.memory_space<vmem>> -> memref<1x128xf32, #tpu.memory_space<vmem>>
    %321 = tpu.memref_slice %arg11[%c1_i32_191] : memref<2x!tpu.dma_semaphore, #tpu.memory_space<semaphore_mem>> -> memref<1x!tpu.dma_semaphore, #tpu.memory_space<semaphore_mem>>
    %322 = tpu.memref_squeeze %321 : memref<1x!tpu.dma_semaphore, #tpu.memory_space<semaphore_mem>> -> memref<!tpu.dma_semaphore, #tpu.memory_space<semaphore_mem>>
    tpu.enqueue_dma source(%319 : memref<1x128xf32, #tpu.memory_space<any>>) target(%320 : memref<1x128xf32, #tpu.memory_space<vmem>>) target_semaphore(%322 : memref<!tpu.dma_semaphore, #tpu.memory_space<semaphore_mem>>)
    %c7_i32_194 = arith.constant 7 : i32
    %323 = arith.addi %252, %c7_i32_194 : i32
    %324 = arith.addi %170, %323 : i32
    %325 = arith.index_cast %324 : i32 to index
    %326 = memref.load %arg1[%325] : memref<96xi32, #tpu.memory_space<smem>>
    %c0_i32_195 = arith.constant 0 : i32
    %c255_i32_196 = arith.constant 255 : i32
    %327 = arith.maxsi %c0_i32_195, %326 : i32
    %328 = arith.minsi %c255_i32_196, %327 : i32
    %c1_i32_197 = arith.constant 1 : i32
    %c0_i32_198 = arith.constant 0 : i32
    %329 = tpu.memref_slice %arg3[%328, %c0_i32_198] : memref<256x128xf32, #tpu.memory_space<any>> -> memref<1x128xf32, #tpu.memory_space<any>>
    %c0_i32_199 = arith.constant 0 : i32
    %330 = tpu.memref_slice %arg10[%323, %c0_i32_199] : memref<16x128xf32, #tpu.memory_space<vmem>> -> memref<1x128xf32, #tpu.memory_space<vmem>>
    %331 = tpu.memref_slice %arg11[%c1_i32_197] : memref<2x!tpu.dma_semaphore, #tpu.memory_space<semaphore_mem>> -> memref<1x!tpu.dma_semaphore, #tpu.memory_space<semaphore_mem>>
    %332 = tpu.memref_squeeze %331 : memref<1x!tpu.dma_semaphore, #tpu.memory_space<semaphore_mem>> -> memref<!tpu.dma_semaphore, #tpu.memory_space<semaphore_mem>>
    tpu.enqueue_dma source(%329 : memref<1x128xf32, #tpu.memory_space<any>>) target(%330 : memref<1x128xf32, #tpu.memory_space<vmem>>) target_semaphore(%332 : memref<!tpu.dma_semaphore, #tpu.memory_space<semaphore_mem>>)
    %c2_i32_200 = arith.constant 2 : i32
    %c0_i32_201 = arith.constant 0 : i32
    %c0_i32_202 = arith.constant 0 : i32
    %c0_i32_203 = arith.constant 0 : i32
    %333 = tpu.memref_slice %arg3[%c0_i32_202, %c0_i32_203] : memref<256x128xf32, #tpu.memory_space<any>> -> memref<16x128xf32, #tpu.memory_space<any>>
    %334 = tpu.memref_slice %arg11[%c0_i32_201] : memref<2x!tpu.dma_semaphore, #tpu.memory_space<semaphore_mem>> -> memref<1x!tpu.dma_semaphore, #tpu.memory_space<semaphore_mem>>
    %335 = tpu.memref_squeeze %334 : memref<1x!tpu.dma_semaphore, #tpu.memory_space<semaphore_mem>> -> memref<!tpu.dma_semaphore, #tpu.memory_space<semaphore_mem>>
    tpu.wait_dma2 semaphore(%335 : memref<!tpu.dma_semaphore, #tpu.memory_space<semaphore_mem>>) src(%333 : memref<16x128xf32, #tpu.memory_space<any>>) dst(%arg9 : memref<16x128xf32, #tpu.memory_space<vmem>>)
    %c0_204 = arith.constant 0 : index
    %c0_205 = arith.constant 0 : index
    %336 = vector.load %arg9[%c0_204, %c0_205] : memref<16x128xf32, #tpu.memory_space<vmem>>, vector<16x128xf32>
    %c0_206 = arith.constant 0 : index
    %c0_207 = arith.constant 0 : index
    %337 = vector.load %arg2[%c0_206, %c0_207] : memref<32x1xi32, #tpu.memory_space<vmem>>, vector<16x1xi32>
    %338 = arith.sitofp %337 : vector<16x1xi32> to vector<16x1xf32>
    %339 = arith.addf %336, %6 : vector<16x128xf32>
    %340 = vector.broadcast %1 : vector<1x128xf32> to vector<16x128xf32>
    %341 = arith.addf %339, %340 : vector<16x128xf32>
    %342 = vector.broadcast %338 : vector<16x1xf32> to vector<16x128xf32>
    %343 = vector.broadcast %3 : vector<1x128xf32> to vector<16x128xf32>
    %344 = arith.mulf %342, %343 : vector<16x128xf32>
    %345 = arith.addf %341, %344 : vector<16x128xf32>
    %cst = arith.constant dense<0.000000e+00> : vector<16xf32>
    %346 = vector.multi_reduction <add>, %345, %cst [1] : vector<16x128xf32> to vector<16xf32>
    %347 = vector.shape_cast %346 : vector<16xf32> to vector<16x1xf32>
    %cst_208 = arith.constant 1.280000e+02 : f32
    %348 = vector.broadcast %cst_208 : f32 to vector<16x1xf32>
    %349 = arith.divf %347, %348 : vector<16x1xf32>
    %350 = vector.broadcast %349 : vector<16x1xf32> to vector<16x128xf32>
    %351 = arith.subf %345, %350 : vector<16x128xf32>
    %352 = arith.mulf %351, %351 : vector<16x128xf32>
    %cst_209 = arith.constant dense<0.000000e+00> : vector<16xf32>
    %353 = vector.multi_reduction <add>, %352, %cst_209 [1] : vector<16x128xf32> to vector<16xf32>
    %354 = vector.shape_cast %353 : vector<16xf32> to vector<16x1xf32>
    %cst_210 = arith.constant 1.280000e+02 : f32
    %355 = vector.broadcast %cst_210 : f32 to vector<16x1xf32>
    %356 = arith.divf %354, %355 : vector<16x1xf32>
    %cst_211 = arith.constant 9.99999996E-13 : f32
    %357 = vector.broadcast %cst_211 : f32 to vector<16x1xf32>
    %358 = arith.addf %356, %357 : vector<16x1xf32>
    %359 = math.rsqrt %358 : vector<16x1xf32>
    %360 = vector.broadcast %359 : vector<16x1xf32> to vector<16x128xf32>
    %361 = arith.mulf %351, %360 : vector<16x128xf32>
    %362 = vector.broadcast %4 : vector<1x128xf32> to vector<16x128xf32>
    %363 = arith.mulf %361, %362 : vector<16x128xf32>
    %364 = vector.broadcast %5 : vector<1x128xf32> to vector<16x128xf32>
    %365 = arith.addf %363, %364 : vector<16x128xf32>
    %c0_212 = arith.constant 0 : index
    %c0_213 = arith.constant 0 : index
    %366 = vector.load %arg8[%c0_212, %c0_213] : memref<32x128xf32, #tpu.memory_space<vmem>>, vector<16x128xf32>
    tpu.vector_store %arg8[%c0_212, %c0_213], %365 {strides = array<i32>} : memref<32x128xf32, #tpu.memory_space<vmem>>, vector<16x128xf32>,
    %c1_i32_214 = arith.constant 1 : i32
    %c0_i32_215 = arith.constant 0 : i32
    %c0_i32_216 = arith.constant 0 : i32
    %367 = tpu.memref_slice %arg3[%c0_i32_215, %c0_i32_216] : memref<256x128xf32, #tpu.memory_space<any>> -> memref<16x128xf32, #tpu.memory_space<any>>
    %368 = tpu.memref_slice %arg11[%c1_i32_214] : memref<2x!tpu.dma_semaphore, #tpu.memory_space<semaphore_mem>> -> memref<1x!tpu.dma_semaphore, #tpu.memory_space<semaphore_mem>>
    %369 = tpu.memref_squeeze %368 : memref<1x!tpu.dma_semaphore, #tpu.memory_space<semaphore_mem>> -> memref<!tpu.dma_semaphore, #tpu.memory_space<semaphore_mem>>
    tpu.wait_dma2 semaphore(%369 : memref<!tpu.dma_semaphore, #tpu.memory_space<semaphore_mem>>) src(%367 : memref<16x128xf32, #tpu.memory_space<any>>) dst(%arg10 : memref<16x128xf32, #tpu.memory_space<vmem>>)
    %c0_217 = arith.constant 0 : index
    %c0_218 = arith.constant 0 : index
    %370 = vector.load %arg10[%c0_217, %c0_218] : memref<16x128xf32, #tpu.memory_space<vmem>>, vector<16x128xf32>
    %c16 = arith.constant 16 : index
    %c0_219 = arith.constant 0 : index
    %371 = vector.load %arg2[%c16, %c0_219] : memref<32x1xi32, #tpu.memory_space<vmem>>, vector<16x1xi32>
    %372 = arith.sitofp %371 : vector<16x1xi32> to vector<16x1xf32>
    %373 = arith.addf %370, %6 : vector<16x128xf32>
    %374 = vector.broadcast %1 : vector<1x128xf32> to vector<16x128xf32>
    %375 = arith.addf %373, %374 : vector<16x128xf32>
    %376 = vector.broadcast %372 : vector<16x1xf32> to vector<16x128xf32>
    %377 = vector.broadcast %3 : vector<1x128xf32> to vector<16x128xf32>
    %378 = arith.mulf %376, %377 : vector<16x128xf32>
    %379 = arith.addf %375, %378 : vector<16x128xf32>
    %cst_220 = arith.constant dense<0.000000e+00> : vector<16xf32>
    %380 = vector.multi_reduction <add>, %379, %cst_220 [1] : vector<16x128xf32> to vector<16xf32>
    %381 = vector.shape_cast %380 : vector<16xf32> to vector<16x1xf32>
    %cst_221 = arith.constant 1.280000e+02 : f32
    %382 = vector.broadcast %cst_221 : f32 to vector<16x1xf32>
    %383 = arith.divf %381, %382 : vector<16x1xf32>
    %384 = vector.broadcast %383 : vector<16x1xf32> to vector<16x128xf32>
    %385 = arith.subf %379, %384 : vector<16x128xf32>
    %386 = arith.mulf %385, %385 : vector<16x128xf32>
    %cst_222 = arith.constant dense<0.000000e+00> : vector<16xf32>
    %387 = vector.multi_reduction <add>, %386, %cst_222 [1] : vector<16x128xf32> to vector<16xf32>
    %388 = vector.shape_cast %387 : vector<16xf32> to vector<16x1xf32>
    %cst_223 = arith.constant 1.280000e+02 : f32
    %389 = vector.broadcast %cst_223 : f32 to vector<16x1xf32>
    %390 = arith.divf %388, %389 : vector<16x1xf32>
    %cst_224 = arith.constant 9.99999996E-13 : f32
    %391 = vector.broadcast %cst_224 : f32 to vector<16x1xf32>
    %392 = arith.addf %390, %391 : vector<16x1xf32>
    %393 = math.rsqrt %392 : vector<16x1xf32>
    %394 = vector.broadcast %393 : vector<16x1xf32> to vector<16x128xf32>
    %395 = arith.mulf %385, %394 : vector<16x128xf32>
    %396 = vector.broadcast %4 : vector<1x128xf32> to vector<16x128xf32>
    %397 = arith.mulf %395, %396 : vector<16x128xf32>
    %398 = vector.broadcast %5 : vector<1x128xf32> to vector<16x128xf32>
    %399 = arith.addf %397, %398 : vector<16x128xf32>
    %c16_225 = arith.constant 16 : index
    %c0_226 = arith.constant 0 : index
    %400 = vector.load %arg8[%c16_225, %c0_226] : memref<32x128xf32, #tpu.memory_space<vmem>>, vector<16x128xf32>
    tpu.vector_store %arg8[%c16_225, %c0_226], %399 {strides = array<i32>} : memref<32x128xf32, #tpu.memory_space<vmem>>, vector<16x128xf32>,
    return
  }
  func.func @transform_0(%arg0: i32, %arg1: memref<96xi32, #tpu.memory_space<smem>>) -> (i32, i32) {
    %c0_i32 = arith.constant 0 : i32
    %c0_i32_0 = arith.constant 0 : i32
    return %arg0, %c0_i32 : i32, i32
  }
  func.func @transform_2(%arg0: i32, %arg1: memref<96xi32, #tpu.memory_space<smem>>) -> (i32, i32) {
    %c0_i32 = arith.constant 0 : i32
    %c0_i32_0 = arith.constant 0 : i32
    %c0_i32_1 = arith.constant 0 : i32
    return %c0_i32, %c0_i32_0 : i32, i32
  }
  func.func @transform_3(%arg0: i32, %arg1: memref<96xi32, #tpu.memory_space<smem>>) -> (i32, i32) {
    %c0_i32 = arith.constant 0 : i32
    %c0_i32_0 = arith.constant 0 : i32
    %c0_i32_1 = arith.constant 0 : i32
    return %c0_i32, %c0_i32_0 : i32, i32
  }
  func.func @transform_4(%arg0: i32, %arg1: memref<96xi32, #tpu.memory_space<smem>>) -> (i32, i32) {
    %c0_i32 = arith.constant 0 : i32
    %c0_i32_0 = arith.constant 0 : i32
    %c0_i32_1 = arith.constant 0 : i32
    return %c0_i32, %c0_i32_0 : i32, i32
  }
  func.func @transform_5(%arg0: i32, %arg1: memref<96xi32, #tpu.memory_space<smem>>) -> (i32, i32) {
    %c0_i32 = arith.constant 0 : i32
    %c0_i32_0 = arith.constant 0 : i32
    %c0_i32_1 = arith.constant 0 : i32
    return %c0_i32, %c0_i32_0 : i32, i32
  }
  func.func @transform_6(%arg0: i32, %arg1: memref<96xi32, #tpu.memory_space<smem>>) -> (i32, i32) {
    %c0_i32 = arith.constant 0 : i32
    %c0_i32_0 = arith.constant 0 : i32
    return %arg0, %c0_i32 : i32, i32
  }
}

</mosaic_0001>

<bundles_post_ra>
// kernel: tpu_custom_call.1
= control target key start
LH: loop header
LB: loop body
LE: loop exit
PB: predicated region body
PF: predicated region fallthrough
CT: control target
= control target key end

     0   :  { %s2375_s27 = smov [#allocation6]   ;;  %s3148_s0 = inlined_call_operand.vmem [shape: s32[96], index: 0, kind: input, shape index: {}]   ;;  %s3149_s1 = inlined_call_operand.vmem [shape: s32[96,1], index: 1, kind: input, shape index: {}]   ;;  %s3150_s2 = inlined_call_operand.hbm [shape: f32[256,128], index: 2, kind: input, shape index: {}]   ;;  %s3151_s3 = inlined_call_operand.vmem [shape: f32[16,128], index: 3, kind: input, shape index: {}]   ;;  %s3152_s4 = inlined_call_operand.vmem [shape: f32[2,128], index: 4, kind: input, shape index: {}]   ;;  %s3153_s5 = inlined_call_operand.vmem [shape: f32[1,128], index: 5, kind: input, shape index: {}]   ;;  %s3154_s6 = inlined_call_operand.vmem [shape: f32[1,128], index: 6, kind: input, shape index: {}]   ;;  %s3155_s7 = inlined_call_operand.hbm [shape: f32[96,128], index: 7, kind: output, shape index: {}]  }
   0x1   :  { %3160 = sst [smem:[#allocation82_spill]] %s3149_s1  ;;  %s13_s26 = sshll.u32 %s3148_s0, 4  ;;  %s14_s26 = int_to_ptr.vmem [resolvable:$true] %s13_s26 }
   0x2   :  { %3161 = sst [smem:[#allocation83_spill]] %s3151_s3 }
   0x3   :  { %3162 = sst [smem:[#allocation84_spill]] %s3152_s4 }
   0x4   :  { %3163 = sst [smem:[#allocation85_spill]] %s3153_s5 }
   0x5   :  { %16 = dma.vmem_to_smem %s14_s26, 16, %s2375_s27, [#allocation5] }
   0x6   :  { %2349 = dma.done.wait [#allocation5], 16 }
   0x7   :  { %2350 = vsyncadd [#allocation5], 4294967280 }
   0x8   :  { %19 = sfence }
   0x9   :  { %20 = vsyncpa [#allocation8], 0 }
   0xa   :  { %22 = vsyncpa [#allocation8 + $0x1], 0  ;;  %s2455_s28 = smov 0   ;;  %s2457_s29 = smov 0  }
   0xb   :  { %s2459_s30 = smov 0   ;;  %s2461_s8 = smov 0  }
   0xc LB: > { %s2476_s0 = sadd.s32 4294967295, %s2373_s8   ;;  %s1197_s9 = sadd.s32 4294967294, %s2373_s8   ;;  %s2373_s8 = sphi %s2461_s8, %s3183_s8   ;;  %s2369_s30 = sphi %s2459_s30, %s3182_s30   ;;  %s2365_s29 = sphi %s2457_s29, %s3181_s29   ;;  %s2361_s28 = sphi %s2455_s28, %s3180_s28  }
   0xd   : > { %s2480_s10 = sadd.s32 1, %s2373_s8   ;;  %s145_s11 = sadd.s32 1, %s2369_s30 }
   0xe   : > { %s142_s12 = ssub.s32 %s2373_s8, %s2480_s10  ;;  %p155_p0 = scmp.ne.s32.totalorder %s2369_s30, %s2365_s29 }
   0xf   : > { %p143_p1 = scmp.eq.s32.totalorder %s142_s12, 0  ;;  %p156_p2 = scmp.eq.s32.totalorder %s2476_s0, 2 }
  0x10   : > { %p161_p3 = scmp.ne.s32.totalorder %s2365_s29, %s2361_s28  ;;  %p162_p4 = scmp.eq.s32.totalorder %s1197_s9, 2 }
  0x11   : > { %s2491_s13 = scalar_select %p143_p1, %s2369_s30, %s145_s11  }
  0x12   : > { %p2493_p5 = por %p156_p2, %p155_p0  ;;  %p2497_p6 = por %p162_p4, %p161_p3 }
  0x13   : > { %p1200_p7 = scmp.ge.s32.totalorder %s2373_s8, 1  ;;  %p201_p8 = scmp.lt.s32.totalorder %s2373_s8, 4 }
  0x15   : > { %p202_p9 = pnand %p1200_p7, %p201_p8 }
  0x17   : > { %205 = sbr.rel (%p202_p9) target bundleno = 1338 (0x53a), region = 40 }
  0x1c   : > { %s3156_s16 = sand.u32 1, %s2365_s29   ;;  %s1202_s17 = sshll.u32 %s2476_s0, 2  ;;  %v2529_v4 = vld [vmem:[%s3154_s6] sm:$0x1] }
  0x1d   : > { %s3166_s4 = sld [smem:[#allocation84_spill]]  ;;  %s2517_s22 = sshll.u32 %s3156_s16, 5 }
  0x1e   : > { %p230_p10 = scmp.lt.s32.totalorder %s1202_s17, 11  ;;  %s3167_s5 = sld [smem:[#allocation85_spill]] }
  0x1f   : > { %s2532_s27 = sshll.u32 %s2476_s0, 5  ;;  %s3168_s3 = sld [smem:[#allocation83_spill]] }
  0x20   : > { %s3185_s17 = smov (!%p230_p10, %s1202_s17), 11  ;;  %s244_s19 = sld [smem:[#allocation6 + %s2532_s27]] }
  0x21   : > { %s1203_s20 = sshll.u32 %s3185_s17, 3  ;;  %s2376_s21 = smov [#allocation2]  }
  0x22   : > { %s2545_s0 = sshll.u32 %s2376_s21, 4  ;;  %s3170_s1 = sld [smem:[#allocation82_spill]] }
  0x23   : > { %v2508_v0 = vld [vmem:[%s3166_s4] sm:$0x1]  ;;  %v2513_v1 = vld [vmem:[%s3166_s4 + $0x1] sm:$0x1]  ;;  %3169 = sst [smem:[#allocation79_spill]] %s2545_s0  ;;  %s263_s26 = sadd.s32 1, %s2532_s27 }
  0x24   : > { %v239_v2 = vsub.f32 %v2513_v1, %v2508_v0  ;;  %v2524_v3 = vld [vmem:[%s3167_s5] sm:$0x1]  ;;  %s2554_s9 = sld [smem:[#allocation6 + %s263_s26]]  ;;  %s2377_s11 = smov [#allocation2 + $0x1]  }
  0x25   : > { %v2537_v5 = vld [vmem:[%s3168_s3] sm:$0xff]  ;;  %v2542_v6 = vld [vmem:[%s3168_s3 + $0x8] sm:$0xff]  ;;  %s2556_s12 = sshll.u32 %s2377_s11, 4  ;;  %s284_s17 = sadd.s32 2, %s2532_s27 }
  0x26   : > { %3171 = sst [smem:[#allocation80_spill]] %s2556_s12  ;;  %p245_p11 = scmp.gt.s32.totalorder %s244_s19, 0 }
  0x27   : > { %p1205_p12 = scmp.lt.s32.totalorder %s244_s19, 255  ;;  %s285_s18 = sld [smem:[#allocation6 + %s284_s17]] }
  0x28   : > { %s2550_s25 = scalar_lea.vmem %s3170_s1, %s1203_s20  ;;  %s3187_s19 = smov (!%p245_p11, %s244_s19), 0 }
  0x29   : > { %s2378_s21 = smov [#allocation2 + $0x2]   ;;  %s305_s20 = sadd.s32 3, %s2532_s27 }
  0x2a   : > { %s2560_s23 = sshll.u32 %s2378_s21, 4  ;;  %s3189_s19 = smov (!%p1205_p12, %s3187_s19), 255 }
  0x2b   : > { %3172 = sst [smem:[#allocation81_spill]] %s2560_s23  ;;  %p265_p13 = scmp.gt.s32.totalorder %s2554_s9, 0 }
  0x2c   : > { %p1210_p0 = scmp.lt.s32.totalorder %s2554_s9, 255  ;;  %s249_s11 = scalar_lea.hbm %s3150_s2, %s3189_s19 }
  0x2d   : > { %s257_s16 = sshll.u32 %s249_s11, 4  ;;  %p286_p1 = scmp.gt.s32.totalorder %s285_s18, 0  ;;  %s258_s16 = int_to_ptr.hbm [resolvable:$true] %s257_s16 }
  0x2e   : > { %p1215_p2 = scmp.lt.s32.totalorder %s285_s18, 255  ;;  %s1537_s12 = sshra.s32 %s258_s16, 4  ;;  %s1538_s12 = int_to_ptr.hbm [resolvable:$true] %s1537_s12 }
  0x2f   : > { %s1539_s17 = scalar_lea.hbm %s1538_s12, 1  ;;  %s2572_s1 = scalar_lea.hbm %s3150_s2, 256 }
  0x30   : > { %p1540_p3 = scmp.ne.s32.totalorder %s1538_s12, %s1539_s17  ;;  %p1542_p4 = scmp.lt.s32.totalorder %s1538_s12, %s3150_s2 }
  0x31   : > { %p1543_p7 = scmp.lt.s32.totalorder %s2572_s1, %s1539_s17 }
  0x33   : > { %p1544_p8 = por %p1543_p7, %p1542_p4 }
  0x35   : > { %p1545_p9 = pnand %p1544_p8, %p1540_p3 }
  0x37   : > { %1548 = shalt.err (!%p1545_p9)  }
  0x38   : > { %s3173_s19 = sld [smem:[#allocation79_spill]] }
  0x39   : > { %s266_s0 = scalar_select %p265_p13, %s2554_s9, 0 }
  0x3a   : > { %s287_s26 = scalar_select %p286_p1, %s285_s18, 0 }
  0x3b   : > { %s3191_s0 = smov (!%p1210_p0, %s266_s0), 255  ;;  %s2590_s11 = sld [smem:[#allocation6 + %s305_s20]] }
  0x3c   : > { %s3193_s26 = smov (!%p1215_p2, %s287_s26), 255  ;;  %s269_s12 = scalar_lea.hbm %s3150_s2, %s3191_s0 }
  0x3d   : > { %s278_s17 = sshll.u32 %s269_s12, 4  ;;  %s279_s17 = int_to_ptr.hbm [resolvable:$true] %s278_s17 }
  0x3e   : > { %s3174_s24 = int_to_ptr.vmem [resolvable:$true] %s3173_s19  ;;  %s1561_s23 = sshra.s32 %s279_s17, 4  ;;  %s1562_s23 = int_to_ptr.hbm [resolvable:$true] %s1561_s23 }
  0x3f   : > { %262 = dma.hbm_to_vmem [thread:$0]  %s258_s16, 16, %s3174_s24, [#allocation4] }
  0x40   : > { %s290_s16 = scalar_lea.hbm %s3150_s2, %s3193_s26  ;;  %s1563_s5 = scalar_lea.hbm %s1562_s23, 1 }
  0x41   : > { %s299_s24 = sshll.u32 %s290_s16, 4  ;;  %p1564_p10 = scmp.ne.s32.totalorder %s1562_s23, %s1563_s5  ;;  %s300_s24 = int_to_ptr.hbm [resolvable:$true] %s299_s24 }
  0x42   : > { %p1566_p11 = scmp.lt.s32.totalorder %s1562_s23, %s3150_s2  ;;  %p1567_p12 = scmp.lt.s32.totalorder %s2572_s1, %s1563_s5 }
  0x44   : > { %p1568_p13 = por %p1567_p12, %p1566_p11 }
  0x46   : > { %p1569_p0 = pnand %p1568_p13, %p1564_p10 }
  0x48   : > { %1572 = shalt.err (!%p1569_p0)  }
  0x49   : > { %s3175_s20 = sld [smem:[#allocation80_spill]]  ;;  %s1585_s26 = sshra.s32 %s300_s24, 4  ;;  %s1586_s26 = int_to_ptr.hbm [resolvable:$true] %s1585_s26 }
  0x4a   : > { %s1587_s3 = scalar_lea.hbm %s1586_s26, 1  ;;  %p1590_p2 = scmp.lt.s32.totalorder %s1586_s26, %s3150_s2 }
  0x4b   : > { %p1588_p1 = scmp.ne.s32.totalorder %s1586_s26, %s1587_s3  ;;  %p1591_p3 = scmp.lt.s32.totalorder %s2572_s1, %s1587_s3 }
  0x4d   : > { %p1592_p4 = por %p1591_p3, %p1590_p2 }
  0x4f   : > { %s3176_s0 = int_to_ptr.vmem [resolvable:$true] %s3175_s20  ;;  %p1593_p7 = pnand %p1592_p4, %p1588_p1 }
  0x50   : > { %283 = dma.hbm_to_vmem [thread:$0]  %s279_s17, 16, %s3176_s0, [#allocation4] }
  0x51   : > { %1596 = shalt.err (!%p1593_p7)  }
  0x52   : > { %s3177_s5 = sld [smem:[#allocation81_spill]]  ;;  %p307_p8 = scmp.gt.s32.totalorder %s2590_s11, 0 }
  0x53   : > { %p1220_p9 = scmp.lt.s32.totalorder %s2590_s11, 255  ;;  %s326_s17 = sadd.s32 4, %s2532_s27 }
  0x54   : > { %s3195_s11 = smov (!%p307_p8, %s2590_s11), 0  ;;  %s2379_s21 = smov [#allocation2 + $0x3]  }
  0x55   : > { %s322_s19 = sshll.u32 %s2379_s21, 4  ;;  %s327_s16 = sld [smem:[#allocation6 + %s326_s17]]  ;;  %s323_s19 = int_to_ptr.vmem [resolvable:$true] %s322_s19 }
  0x56   : > { %s3197_s11 = smov (!%p1220_p9, %s3195_s11), 255  ;;  %s347_s9 = sadd.s32 5, %s2532_s27 }
  0x57   : > { %s311_s0 = scalar_lea.hbm %s3150_s2, %s3197_s11  ;;  %s2380_s3 = smov [#allocation2 + $0x4]  }
  0x58   : > { %s3178_s23 = int_to_ptr.vmem [resolvable:$true] %s3177_s5  ;;  %s320_s26 = sshll.u32 %s311_s0, 4  ;;  %s321_s26 = int_to_ptr.hbm [resolvable:$true] %s320_s26 }
  0x59   : > { %304 = dma.hbm_to_vmem [thread:$0]  %s300_s24, 16, %s3178_s23, [#allocation4] }
  0x5a   : > { %s2615_s4 = sshll.u32 %s2380_s3, 4  ;;  %s2617_s24 = sld [smem:[#allocation6 + %s347_s9]]  ;;  %s344_s4 = int_to_ptr.vmem [resolvable:$true] %s2615_s4 }
  0x5b   : > { %s1609_s12 = sshra.s32 %s321_s26, 4  ;;  %s1610_s12 = int_to_ptr.hbm [resolvable:$true] %s1609_s12 }
  0x5c   : > { %s1611_s5 = scalar_lea.hbm %s1610_s12, 1  ;;  %p1614_p11 = scmp.lt.s32.totalorder %s1610_s12, %s3150_s2 }
  0x5d   : > { %p1612_p10 = scmp.ne.s32.totalorder %s1610_s12, %s1611_s5  ;;  %p1615_p12 = scmp.lt.s32.totalorder %s2572_s1, %s1611_s5 }
  0x5f   : > { %p1616_p13 = por %p1615_p12, %p1614_p11 }
  0x61   : > { %p1617_p0 = pnand %p1616_p13, %p1612_p10 }
  0x63   : > { %1620 = shalt.err (!%p1617_p0)  }
  0x64   : > { %325 = dma.hbm_to_vmem [thread:$0]  %s321_s26, 16, %s323_s19, [#allocation4] }
  0x65   : > { %p328_p1 = scmp.gt.s32.totalorder %s327_s16, 0  ;;  %p1225_p2 = scmp.lt.s32.totalorder %s327_s16, 255 }
  0x66   : > { %s368_s11 = sadd.s32 6, %s2532_s27  ;;  %s2381_s21 = smov [#allocation2 + $0x5]  }
  0x67   : > { %s3199_s16 = smov (!%p328_p1, %s327_s16), 0  ;;  %s2624_s9 = sshll.u32 %s2381_s21, 4  ;;  %s365_s9 = int_to_ptr.vmem [resolvable:$true] %s2624_s9 }
  0x68   : > { %s2626_s18 = sld [smem:[#allocation6 + %s368_s11]]  ;;  %s3201_s16 = smov (!%p1225_p2, %s3199_s16), 255 }
  0x69   : > { %p349_p3 = scmp.gt.s32.totalorder %s2617_s24, 0  ;;  %s332_s0 = scalar_lea.hbm %s3150_s2, %s3201_s16 }
  0x6a   : > { %p1230_p4 = scmp.lt.s32.totalorder %s2617_s24, 255  ;;  %s341_s26 = sshll.u32 %s332_s0, 4  ;;  %s342_s26 = int_to_ptr.hbm [resolvable:$true] %s341_s26 }
  0x6b   : > { %s1633_s3 = sshra.s32 %s342_s26, 4  ;;  %s1634_s3 = int_to_ptr.hbm [resolvable:$true] %s1633_s3 }
  0x6c   : > { %s1635_s12 = scalar_lea.hbm %s1634_s3, 1  ;;  %p1638_p8 = scmp.lt.s32.totalorder %s1634_s3, %s3150_s2 }
  0x6d   : > { %p1636_p7 = scmp.ne.s32.totalorder %s1634_s3, %s1635_s12  ;;  %p1639_p9 = scmp.lt.s32.totalorder %s2572_s1, %s1635_s12 }
  0x6f   : > { %p1640_p10 = por %p1639_p9, %p1638_p8 }
  0x71   : > { %p1641_p11 = pnand %p1640_p10, %p1636_p7 }
  0x73   : > { %1644 = shalt.err (!%p1641_p11)  }
  0x74   : > { %346 = dma.hbm_to_vmem [thread:$0]  %s342_s26, 16, %s344_s4, [#allocation4] }
  0x75   : > { %s350_s16 = scalar_select %p349_p3, %s2617_s24, 0 }
  0x76   : > { %p370_p12 = scmp.gt.s32.totalorder %s2626_s18, 0  ;;  %s2382_s17 = smov [#allocation2 + $0x6]  }
  0x77   : > { %s2643_s11 = sshll.u32 %s2382_s17, 4  ;;  %s3203_s16 = smov (!%p1230_p4, %s350_s16), 255  ;;  %s386_s11 = int_to_ptr.vmem [resolvable:$true] %s2643_s11 }
  0x78   : > { %s371_s21 = scalar_select %p370_p12, %s2626_s18, 0 }
  0x79   : > { %s353_s4 = scalar_lea.hbm %s3150_s2, %s3203_s16  ;;  %p1235_p13 = scmp.lt.s32.totalorder %s2626_s18, 255 }
  0x7a   : > { %s362_s0 = sshll.u32 %s353_s4, 4  ;;  %s389_s26 = sadd.s32 7, %s2532_s27  ;;  %s363_s0 = int_to_ptr.hbm [resolvable:$true] %s362_s0 }
  0x7b   : > { %s2653_s3 = sld [smem:[#allocation6 + %s389_s26]]  ;;  %s1657_s12 = sshra.s32 %s363_s0, 4  ;;  %s1658_s12 = int_to_ptr.hbm [resolvable:$true] %s1657_s12 }
  0x7c   : > { %s1659_s5 = scalar_lea.hbm %s1658_s12, 1  ;;  %p1662_p1 = scmp.lt.s32.totalorder %s1658_s12, %s3150_s2 }
  0x7d   : > { %p1660_p0 = scmp.ne.s32.totalorder %s1658_s12, %s1659_s5  ;;  %p1663_p2 = scmp.lt.s32.totalorder %s2572_s1, %s1659_s5 }
  0x7f   : > { %p1664_p3 = por %p1663_p2, %p1662_p1 }
  0x81   : > { %p1665_p4 = pnand %p1664_p3, %p1660_p0 }
  0x83   : > { %1668 = shalt.err (!%p1665_p4)  }
  0x84   : > { %367 = dma.hbm_to_vmem [thread:$0]  %s363_s0, 16, %s365_s9, [#allocation4] }
  0x85   : > { %s3205_s21 = smov (!%p1235_p13, %s371_s21), 255  ;;  %s410_s19 = sadd.s32 8, %s2532_s27 }
  0x86   : > { %s374_s20 = scalar_lea.hbm %s3150_s2, %s3205_s21  ;;  %s2383_s26 = smov [#allocation2 + $0x7]  }
  0x87   : > { %s383_s4 = sshll.u32 %s374_s20, 4  ;;  %s2668_s12 = sshll.u32 %s2383_s26, 4  ;;  %s384_s4 = int_to_ptr.hbm [resolvable:$true] %s383_s4  ;;  %s407_s12 = int_to_ptr.vmem [resolvable:$true] %s2668_s12 }
  0x88   : > { %p391_p7 = scmp.gt.s32.totalorder %s2653_s3, 0  ;;  %s1681_s5 = sshra.s32 %s384_s4, 4  ;;  %s1682_s5 = int_to_ptr.hbm [resolvable:$true] %s1681_s5 }
  0x89   : > { %s1683_s23 = scalar_lea.hbm %s1682_s5, 1  ;;  %p1686_p9 = scmp.lt.s32.totalorder %s1682_s5, %s3150_s2 }
  0x8a   : > { %p1684_p8 = scmp.ne.s32.totalorder %s1682_s5, %s1683_s23  ;;  %p1687_p10 = scmp.lt.s32.totalorder %s2572_s1, %s1683_s23 }
  0x8c   : > { %p1688_p11 = por %p1687_p10, %p1686_p9 }
  0x8e   : > { %p1689_p12 = pnand %p1688_p11, %p1684_p8 }
  0x90   : > { %1692 = shalt.err (!%p1689_p12)  }
  0x91   : > { %388 = dma.hbm_to_vmem [thread:$0]  %s384_s4, 16, %s386_s11, [#allocation4] }
  0x92   : > { %s392_s18 = scalar_select %p391_p7, %s2653_s3, 0 }
  0x93   : > { %p1240_p13 = scmp.lt.s32.totalorder %s2653_s3, 255  ;;  %s411_s21 = sld [smem:[#allocation6 + %s410_s19]] }
  0x94   : > { %s431_s0 = sadd.s32 9, %s2532_s27  ;;  %s2384_s24 = smov [#allocation2 + $0x8]  }
  0x95   : > { %s3207_s18 = smov (!%p1240_p13, %s392_s18), 255  ;;  %s2678_s16 = sshll.u32 %s2384_s24, 4  ;;  %s428_s16 = int_to_ptr.vmem [resolvable:$true] %s2678_s16 }
  0x96   : > { %s2680_s20 = sld [smem:[#allocation6 + %s431_s0]]  ;;  %s395_s11 = scalar_lea.hbm %s3150_s2, %s3207_s18 }
  0x97   : > { %s404_s4 = sshll.u32 %s395_s11, 4  ;;  %s405_s4 = int_to_ptr.hbm [resolvable:$true] %s404_s4 }
  0x98   : > { %s1705_s3 = sshra.s32 %s405_s4, 4  ;;  %s1706_s3 = int_to_ptr.hbm [resolvable:$true] %s1705_s3 }
  0x99   : > { %p412_p0 = scmp.gt.s32.totalorder %s411_s21, 0  ;;  %s1707_s19 = scalar_lea.hbm %s1706_s3, 1 }
  0x9a   : > { %p1708_p1 = scmp.ne.s32.totalorder %s1706_s3, %s1707_s19  ;;  %p1710_p2 = scmp.lt.s32.totalorder %s1706_s3, %s3150_s2 }
  0x9b   : > { %p1711_p3 = scmp.lt.s32.totalorder %s2572_s1, %s1707_s19 }
  0x9d   : > { %p1712_p4 = por %p1711_p3, %p1710_p2 }
  0x9f   : > { %p1713_p7 = pnand %p1712_p4, %p1708_p1 }
  0xa1   : > { %1716 = shalt.err (!%p1713_p7)  }
  0xa2   : > { %409 = dma.hbm_to_vmem [thread:$0]  %s405_s4, 16, %s407_s12, [#allocation4] }
  0xa3   : > { %s413_s9 = scalar_select %p412_p0, %s411_s21, 0 }
  0xa4   : > { %p1245_p8 = scmp.lt.s32.totalorder %s411_s21, 255  ;;  %p433_p9 = scmp.gt.s32.totalorder %s2680_s20, 0 }
  0xa5   : > { %p1250_p10 = scmp.lt.s32.totalorder %s2680_s20, 255  ;;  %s2385_s5 = smov [#allocation2 + $0x9]  }
  0xa6   : > { %s3209_s9 = smov (!%p1245_p8, %s413_s9), 255  ;;  %s2697_s11 = sshll.u32 %s2385_s5, 4  ;;  %s449_s11 = int_to_ptr.vmem [resolvable:$true] %s2697_s11 }
  0xa7   : > { %s434_s18 = scalar_select %p433_p9, %s2680_s20, 0 }
  0xa8   : > { %s416_s26 = scalar_lea.hbm %s3150_s2, %s3209_s9  ;;  %s452_s12 = sadd.s32 10, %s2532_s27 }
  0xa9   : > { %s425_s3 = sshll.u32 %s416_s26, 4  ;;  %s2700_s4 = sld [smem:[#allocation6 + %s452_s12]]  ;;  %s426_s3 = int_to_ptr.hbm [resolvable:$true] %s425_s3 }
  0xaa   : > { %s1729_s19 = sshra.s32 %s426_s3, 4  ;;  %s1730_s19 = int_to_ptr.hbm [resolvable:$true] %s1729_s19 }
  0xab   : > { %s1731_s21 = scalar_lea.hbm %s1730_s19, 1  ;;  %p1734_p12 = scmp.lt.s32.totalorder %s1730_s19, %s3150_s2 }
  0xac   : > { %p1732_p11 = scmp.ne.s32.totalorder %s1730_s19, %s1731_s21  ;;  %p1735_p13 = scmp.lt.s32.totalorder %s2572_s1, %s1731_s21 }
  0xae   : > { %p1736_p0 = por %p1735_p13, %p1734_p12 }
  0xb0   : > { %p1737_p1 = pnand %p1736_p0, %p1732_p11 }
  0xb2   : > { %1740 = shalt.err (!%p1737_p1)  }
  0xb3   : > { %430 = dma.hbm_to_vmem [thread:$0]  %s426_s3, 16, %s428_s16, [#allocation4] }
  0xb4   : > { %s3211_s18 = smov (!%p1250_p10, %s434_s18), 255  ;;  %s473_s26 = sadd.s32 11, %s2532_s27 }
  0xb5   : > { %s437_s24 = scalar_lea.hbm %s3150_s2, %s3211_s18  ;;  %s2386_s12 = smov [#allocation2 + $0xa]  }
  0xb6   : > { %s446_s5 = sshll.u32 %s437_s24, 4  ;;  %s2715_s19 = sshll.u32 %s2386_s12, 4  ;;  %s447_s5 = int_to_ptr.hbm [resolvable:$true] %s446_s5  ;;  %s470_s19 = int_to_ptr.vmem [resolvable:$true] %s2715_s19 }
  0xb7   : > { %p454_p2 = scmp.gt.s32.totalorder %s2700_s4, 0  ;;  %s1753_s21 = sshra.s32 %s447_s5, 4  ;;  %s1754_s21 = int_to_ptr.hbm [resolvable:$true] %s1753_s21 }
  0xb8   : > { %s1755_s23 = scalar_lea.hbm %s1754_s21, 1  ;;  %p1758_p4 = scmp.lt.s32.totalorder %s1754_s21, %s3150_s2 }
  0xb9   : > { %p1756_p3 = scmp.ne.s32.totalorder %s1754_s21, %s1755_s23  ;;  %p1759_p7 = scmp.lt.s32.totalorder %s2572_s1, %s1755_s23 }
  0xbb   : > { %p1760_p8 = por %p1759_p7, %p1758_p4 }
  0xbd   : > { %p1761_p9 = pnand %p1760_p8, %p1756_p3 }
  0xbf   : > { %1764 = shalt.err (!%p1761_p9)  }
  0xc0   : > { %451 = dma.hbm_to_vmem [thread:$0]  %s447_s5, 16, %s449_s11, [#allocation4] }
  0xc1   : > { %s455_s20 = scalar_select %p454_p2, %s2700_s4, 0 }
  0xc2   : > { %p1255_p10 = scmp.lt.s32.totalorder %s2700_s4, 255  ;;  %s474_s18 = sld [smem:[#allocation6 + %s473_s26]] }
  0xc3   : > { %s494_s3 = sadd.s32 12, %s2532_s27  ;;  %s2387_s9 = smov [#allocation2 + $0xb]  }
  0xc4   : > { %s3213_s20 = smov (!%p1255_p10, %s455_s20), 255  ;;  %s2725_s0 = sshll.u32 %s2387_s9, 4  ;;  %s491_s0 = int_to_ptr.vmem [resolvable:$true] %s2725_s0 }
  0xc5   : > { %s2727_s24 = sld [smem:[#allocation6 + %s494_s3]]  ;;  %s458_s11 = scalar_lea.hbm %s3150_s2, %s3213_s20 }
  0xc6   : > { %s467_s5 = sshll.u32 %s458_s11, 4  ;;  %s468_s5 = int_to_ptr.hbm [resolvable:$true] %s467_s5 }
  0xc7   : > { %s1777_s4 = sshra.s32 %s468_s5, 4  ;;  %s1778_s4 = int_to_ptr.hbm [resolvable:$true] %s1777_s4 }
  0xc8   : > { %p475_p11 = scmp.gt.s32.totalorder %s474_s18, 0  ;;  %s1779_s26 = scalar_lea.hbm %s1778_s4, 1 }
  0xc9   : > { %p1780_p12 = scmp.ne.s32.totalorder %s1778_s4, %s1779_s26  ;;  %p1782_p13 = scmp.lt.s32.totalorder %s1778_s4, %s3150_s2 }
  0xca   : > { %p1783_p0 = scmp.lt.s32.totalorder %s2572_s1, %s1779_s26 }
  0xcc   : > { %p1784_p1 = por %p1783_p0, %p1782_p13 }
  0xce   : > { %p1785_p2 = pnand %p1784_p1, %p1780_p12 }
  0xd0   : > { %1788 = shalt.err (!%p1785_p2)  }
  0xd1   : > { %472 = dma.hbm_to_vmem [thread:$0]  %s468_s5, 16, %s470_s19, [#allocation4] }
  0xd2   : > { %s476_s16 = scalar_select %p475_p11, %s474_s18, 0 }
  0xd3   : > { %p1260_p3 = scmp.lt.s32.totalorder %s474_s18, 255  ;;  %p496_p4 = scmp.gt.s32.totalorder %s2727_s24, 0 }
  0xd4   : > { %p1265_p7 = scmp.lt.s32.totalorder %s2727_s24, 255  ;;  %s2388_s21 = smov [#allocation2 + $0xc]  }
  0xd5   : > { %s3215_s16 = smov (!%p1260_p3, %s476_s16), 255  ;;  %s2744_s11 = sshll.u32 %s2388_s21, 4  ;;  %s512_s11 = int_to_ptr.vmem [resolvable:$true] %s2744_s11 }
  0xd6   : > { %s497_s20 = scalar_select %p496_p4, %s2727_s24, 0 }
  0xd7   : > { %s479_s12 = scalar_lea.hbm %s3150_s2, %s3215_s16  ;;  %s515_s19 = sadd.s32 13, %s2532_s27 }
  0xd8   : > { %s488_s4 = sshll.u32 %s479_s12, 4  ;;  %s2747_s5 = sld [smem:[#allocation6 + %s515_s19]]  ;;  %s489_s4 = int_to_ptr.hbm [resolvable:$true] %s488_s4 }
  0xd9   : > { %s1801_s26 = sshra.s32 %s489_s4, 4  ;;  %s1802_s26 = int_to_ptr.hbm [resolvable:$true] %s1801_s26 }
  0xda   : > { %s1803_s18 = scalar_lea.hbm %s1802_s26, 1  ;;  %p1806_p9 = scmp.lt.s32.totalorder %s1802_s26, %s3150_s2 }
  0xdb   : > { %p1804_p8 = scmp.ne.s32.totalorder %s1802_s26, %s1803_s18  ;;  %p1807_p10 = scmp.lt.s32.totalorder %s2572_s1, %s1803_s18 }
  0xdd   : > { %p1808_p11 = por %p1807_p10, %p1806_p9 }
  0xdf   : > { %p1809_p12 = pnand %p1808_p11, %p1804_p8 }
  0xe1   : > { %1812 = shalt.err (!%p1809_p12)  }
  0xe2   : > { %493 = dma.hbm_to_vmem [thread:$0]  %s489_s4, 16, %s491_s0, [#allocation4] }
  0xe3   : > { %s3217_s20 = smov (!%p1265_p7, %s497_s20), 255  ;;  %s536_s12 = sadd.s32 14, %s2532_s27 }
  0xe4   : > { %s500_s9 = scalar_lea.hbm %s3150_s2, %s3217_s20  ;;  %s2389_s19 = smov [#allocation2 + $0xd]  }
  0xe5   : > { %s509_s21 = sshll.u32 %s500_s9, 4  ;;  %s2762_s26 = sshll.u32 %s2389_s19, 4  ;;  %s510_s21 = int_to_ptr.hbm [resolvable:$true] %s509_s21  ;;  %s533_s26 = int_to_ptr.vmem [resolvable:$true] %s2762_s26 }
  0xe6   : > { %p517_p13 = scmp.gt.s32.totalorder %s2747_s5, 0  ;;  %s1825_s18 = sshra.s32 %s510_s21, 4  ;;  %s1826_s18 = int_to_ptr.hbm [resolvable:$true] %s1825_s18 }
  0xe7   : > { %s1827_s23 = scalar_lea.hbm %s1826_s18, 1  ;;  %p1830_p1 = scmp.lt.s32.totalorder %s1826_s18, %s3150_s2 }
  0xe8   : > { %p1828_p0 = scmp.ne.s32.totalorder %s1826_s18, %s1827_s23  ;;  %p1831_p2 = scmp.lt.s32.totalorder %s2572_s1, %s1827_s23 }
  0xea   : > { %p1832_p3 = por %p1831_p2, %p1830_p1 }
  0xec   : > { %p1833_p4 = pnand %p1832_p3, %p1828_p0 }
  0xee   : > { %1836 = shalt.err (!%p1833_p4)  }
  0xef   : > { %514 = dma.hbm_to_vmem [thread:$0]  %s510_s21, 16, %s512_s11, [#allocation4] }
  0xf0   : > { %s518_s24 = scalar_select %p517_p13, %s2747_s5, 0 }
  0xf1   : > { %p1270_p7 = scmp.lt.s32.totalorder %s2747_s5, 255  ;;  %s537_s20 = sld [smem:[#allocation6 + %s536_s12]] }
  0xf2   : > { %s557_s4 = sadd.s32 15, %s2532_s27  ;;  %s2390_s16 = smov [#allocation2 + $0xe]  }
  0xf3   : > { %s3219_s24 = smov (!%p1270_p7, %s518_s24), 255  ;;  %s2772_s3 = sshll.u32 %s2390_s16, 4  ;;  %s554_s3 = int_to_ptr.vmem [resolvable:$true] %s2772_s3 }
  0xf4   : > { %s2774_s9 = sld [smem:[#allocation6 + %s557_s4]]  ;;  %s521_s11 = scalar_lea.hbm %s3150_s2, %s3219_s24 }
  0xf5   : > { %s530_s21 = sshll.u32 %s521_s11, 4  ;;  %s531_s21 = int_to_ptr.hbm [resolvable:$true] %s530_s21 }
  0xf6   : > { %s1849_s5 = sshra.s32 %s531_s21, 4  ;;  %s1850_s5 = int_to_ptr.hbm [resolvable:$true] %s1849_s5 }
  0xf7   : > { %p538_p8 = scmp.gt.s32.totalorder %s537_s20, 0  ;;  %s1851_s12 = scalar_lea.hbm %s1850_s5, 1 }
  0xf8   : > { %p1852_p9 = scmp.ne.s32.totalorder %s1850_s5, %s1851_s12  ;;  %p1854_p10 = scmp.lt.s32.totalorder %s1850_s5, %s3150_s2 }
  0xf9   : > { %p1855_p11 = scmp.lt.s32.totalorder %s2572_s1, %s1851_s12 }
  0xfb   : > { %p1856_p12 = por %p1855_p11, %p1854_p10 }
  0xfd   : > { %p1857_p13 = pnand %p1856_p12, %p1852_p9 }
  0xff   : > { %1860 = shalt.err (!%p1857_p13)  }
 0x100   : > { %535 = dma.hbm_to_vmem [thread:$0]  %s531_s21, 16, %s533_s26, [#allocation4] }
 0x101   : > { %s539_s0 = scalar_select %p538_p8, %s537_s20, 0 }
 0x102   : > { %p1275_p0 = scmp.lt.s32.totalorder %s537_s20, 255  ;;  %p559_p1 = scmp.gt.s32.totalorder %s2774_s9, 0 }
 0x103   : > { %p1280_p2 = scmp.lt.s32.totalorder %s2774_s9, 255  ;;  %s2391_s18 = smov [#allocation2 + $0xf]  }
 0x104   : > { %s3221_s0 = smov (!%p1275_p0, %s539_s0), 255  ;;  %s2791_s11 = sshll.u32 %s2391_s18, 4  ;;  %s575_s11 = int_to_ptr.vmem [resolvable:$true] %s2791_s11 }
 0x105   : > { %s560_s24 = scalar_select %p559_p1, %s2774_s9, 0 }
 0x106   : > { %s542_s19 = scalar_lea.hbm %s3150_s2, %s3221_s0  ;;  %s578_s26 = sadd.s32 16, %s2532_s27 }
 0x107   : > { %s551_s5 = sshll.u32 %s542_s19, 4  ;;  %s2794_s21 = sld [smem:[#allocation6 + %s578_s26]]  ;;  %s552_s5 = int_to_ptr.hbm [resolvable:$true] %s551_s5 }
 0x108   : > { %s1873_s12 = sshra.s32 %s552_s5, 4  ;;  %s1874_s12 = int_to_ptr.hbm [resolvable:$true] %s1873_s12 }
 0x109   : > { %s1875_s20 = scalar_lea.hbm %s1874_s12, 1  ;;  %p1878_p4 = scmp.lt.s32.totalorder %s1874_s12, %s3150_s2 }
 0x10a   : > { %p1876_p3 = scmp.ne.s32.totalorder %s1874_s12, %s1875_s20  ;;  %p1879_p7 = scmp.lt.s32.totalorder %s2572_s1, %s1875_s20 }
 0x10c   : > { %p1880_p8 = por %p1879_p7, %p1878_p4 }
 0x10e   : > { %p1881_p9 = pnand %p1880_p8, %p1876_p3 }
 0x110   : > { %1884 = shalt.err (!%p1881_p9)  }
 0x111   : > { %556 = dma.hbm_to_vmem [thread:$0]  %s552_s5, 16, %s554_s3, [#allocation4] }
 0x112   : > { %s3223_s24 = smov (!%p1280_p2, %s560_s24), 255  ;;  %s599_s19 = sadd.s32 17, %s2532_s27 }
 0x113   : > { %s563_s16 = scalar_lea.hbm %s3150_s2, %s3223_s24  ;;  %s2392_s26 = smov [#allocation3]  }
 0x114   : > { %s572_s18 = sshll.u32 %s563_s16, 4  ;;  %s2809_s12 = sshll.u32 %s2392_s26, 4  ;;  %s573_s18 = int_to_ptr.hbm [resolvable:$true] %s572_s18  ;;  %s596_s12 = int_to_ptr.vmem [resolvable:$true] %s2809_s12 }
 0x115   : > { %p580_p10 = scmp.gt.s32.totalorder %s2794_s21, 0  ;;  %s1897_s20 = sshra.s32 %s573_s18, 4  ;;  %s1898_s20 = int_to_ptr.hbm [resolvable:$true] %s1897_s20 }
 0x116   : > { %s1899_s23 = scalar_lea.hbm %s1898_s20, 1  ;;  %p1902_p12 = scmp.lt.s32.totalorder %s1898_s20, %s3150_s2 }
 0x117   : > { %p1900_p11 = scmp.ne.s32.totalorder %s1898_s20, %s1899_s23  ;;  %p1903_p13 = scmp.lt.s32.totalorder %s2572_s1, %s1899_s23 }
 0x119   : > { %p1904_p0 = por %p1903_p13, %p1902_p12 }
 0x11b   : > { %p1905_p1 = pnand %p1904_p0, %p1900_p11 }
 0x11d   : > { %1908 = shalt.err (!%p1905_p1)  }
 0x11e   : > { %577 = dma.hbm_to_vmem [thread:$0]  %s573_s18, 16, %s575_s11, [#allocation4] }
 0x11f   : > { %s581_s9 = scalar_select %p580_p10, %s2794_s21, 0 }
 0x120   : > { %p1285_p2 = scmp.lt.s32.totalorder %s2794_s21, 255  ;;  %s600_s24 = sld [smem:[#allocation6 + %s599_s19]] }
 0x121   : > { %s620_s5 = sadd.s32 18, %s2532_s27  ;;  %s2393_s0 = smov [#allocation3 + $0x1]  }
 0x122   : > { %s3225_s9 = smov (!%p1285_p2, %s581_s9), 255  ;;  %s2819_s4 = sshll.u32 %s2393_s0, 4  ;;  %s617_s4 = int_to_ptr.vmem [resolvable:$true] %s2819_s4 }
 0x123   : > { %s2821_s16 = sld [smem:[#allocation6 + %s620_s5]]  ;;  %s584_s11 = scalar_lea.hbm %s3150_s2, %s3225_s9 }
 0x124   : > { %s593_s18 = sshll.u32 %s584_s11, 4  ;;  %s594_s18 = int_to_ptr.hbm [resolvable:$true] %s593_s18 }
 0x125   : > { %s1921_s21 = sshra.s32 %s594_s18, 4  ;;  %s1922_s21 = int_to_ptr.hbm [resolvable:$true] %s1921_s21 }
 0x126   : > { %p601_p3 = scmp.gt.s32.totalorder %s600_s24, 0  ;;  %s1923_s19 = scalar_lea.hbm %s1922_s21, 1 }
 0x127   : > { %p1924_p4 = scmp.ne.s32.totalorder %s1922_s21, %s1923_s19  ;;  %p1926_p7 = scmp.lt.s32.totalorder %s1922_s21, %s3150_s2 }
 0x128   : > { %p1927_p8 = scmp.lt.s32.totalorder %s2572_s1, %s1923_s19 }
 0x12a   : > { %p1928_p9 = por %p1927_p8, %p1926_p7 }
 0x12c   : > { %p1929_p10 = pnand %p1928_p9, %p1924_p4 }
 0x12e   : > { %1932 = shalt.err (!%p1929_p10)  }
 0x12f   : > { %598 = dma.hbm_to_vmem [thread:$0]  %s594_s18, 16, %s596_s12, [#allocation4 + $0x1] }
 0x130   : > { %s602_s3 = scalar_select %p601_p3, %s600_s24, 0 }
 0x131   : > { %p1290_p11 = scmp.lt.s32.totalorder %s600_s24, 255  ;;  %p622_p12 = scmp.gt.s32.totalorder %s2821_s16, 0 }
 0x132   : > { %p1295_p13 = scmp.lt.s32.totalorder %s2821_s16, 255  ;;  %s2394_s20 = smov [#allocation3 + $0x2]  }
 0x133   : > { %s3227_s3 = smov (!%p1290_p11, %s602_s3), 255  ;;  %s2838_s11 = sshll.u32 %s2394_s20, 4  ;;  %s638_s11 = int_to_ptr.vmem [resolvable:$true] %s2838_s11 }
 0x134   : > { %s623_s9 = scalar_select %p622_p12, %s2821_s16, 0 }
 0x135   : > { %s605_s26 = scalar_lea.hbm %s3150_s2, %s3227_s3  ;;  %s641_s12 = sadd.s32 19, %s2532_s27 }
 0x136   : > { %s614_s21 = sshll.u32 %s605_s26, 4  ;;  %s2841_s18 = sld [smem:[#allocation6 + %s641_s12]]  ;;  %s615_s21 = int_to_ptr.hbm [resolvable:$true] %s614_s21 }
 0x137   : > { %s1945_s19 = sshra.s32 %s615_s21, 4  ;;  %s1946_s19 = int_to_ptr.hbm [resolvable:$true] %s1945_s19 }
 0x138   : > { %s1947_s24 = scalar_lea.hbm %s1946_s19, 1  ;;  %p1950_p1 = scmp.lt.s32.totalorder %s1946_s19, %s3150_s2 }
 0x139   : > { %p1948_p0 = scmp.ne.s32.totalorder %s1946_s19, %s1947_s24  ;;  %p1951_p2 = scmp.lt.s32.totalorder %s2572_s1, %s1947_s24 }
 0x13b   : > { %p1952_p3 = por %p1951_p2, %p1950_p1 }
 0x13d   : > { %p1953_p4 = pnand %p1952_p3, %p1948_p0 }
 0x13f   : > { %1956 = shalt.err (!%p1953_p4)  }
 0x140   : > { %619 = dma.hbm_to_vmem [thread:$0]  %s615_s21, 16, %s617_s4, [#allocation4 + $0x1] }
 0x141   : > { %s3229_s9 = smov (!%p1295_p13, %s623_s9), 255  ;;  %s662_s26 = sadd.s32 20, %s2532_s27 }
 0x142   : > { %s626_s0 = scalar_lea.hbm %s3150_s2, %s3229_s9  ;;  %s2395_s12 = smov [#allocation3 + $0x3]  }
 0x143   : > { %s635_s20 = sshll.u32 %s626_s0, 4  ;;  %s2856_s19 = sshll.u32 %s2395_s12, 4  ;;  %s636_s20 = int_to_ptr.hbm [resolvable:$true] %s635_s20  ;;  %s659_s19 = int_to_ptr.vmem [resolvable:$true] %s2856_s19 }
 0x144   : > { %p643_p7 = scmp.gt.s32.totalorder %s2841_s18, 0  ;;  %s1969_s24 = sshra.s32 %s636_s20, 4  ;;  %s1970_s24 = int_to_ptr.hbm [resolvable:$true] %s1969_s24 }
 0x145   : > { %s1971_s23 = scalar_lea.hbm %s1970_s24, 1  ;;  %p1974_p9 = scmp.lt.s32.totalorder %s1970_s24, %s3150_s2 }
 0x146   : > { %p1972_p8 = scmp.ne.s32.totalorder %s1970_s24, %s1971_s23  ;;  %p1975_p10 = scmp.lt.s32.totalorder %s2572_s1, %s1971_s23 }
 0x148   : > { %p1976_p11 = por %p1975_p10, %p1974_p9 }
 0x14a   : > { %p1977_p12 = pnand %p1976_p11, %p1972_p8 }
 0x14c   : > { %1980 = shalt.err (!%p1977_p12)  }
 0x14d   : > { %640 = dma.hbm_to_vmem [thread:$0]  %s636_s20, 16, %s638_s11, [#allocation4 + $0x1] }
 0x14e   : > { %s644_s16 = scalar_select %p643_p7, %s2841_s18, 0 }
 0x14f   : > { %p1300_p13 = scmp.lt.s32.totalorder %s2841_s18, 255  ;;  %s663_s9 = sld [smem:[#allocation6 + %s662_s26]] }
 0x150   : > { %s683_s21 = sadd.s32 21, %s2532_s27  ;;  %s2396_s3 = smov [#allocation3 + $0x4]  }
 0x151   : > { %s3231_s16 = smov (!%p1300_p13, %s644_s16), 255  ;;  %s2866_s5 = sshll.u32 %s2396_s3, 4  ;;  %s680_s5 = int_to_ptr.vmem [resolvable:$true] %s2866_s5 }
 0x152   : > { %s2868_s0 = sld [smem:[#allocation6 + %s683_s21]]  ;;  %s647_s11 = scalar_lea.hbm %s3150_s2, %s3231_s16 }
 0x153   : > { %s656_s20 = sshll.u32 %s647_s11, 4  ;;  %s657_s20 = int_to_ptr.hbm [resolvable:$true] %s656_s20 }
 0x154   : > { %s1993_s18 = sshra.s32 %s657_s20, 4  ;;  %s1994_s18 = int_to_ptr.hbm [resolvable:$true] %s1993_s18 }
 0x155   : > { %p664_p0 = scmp.gt.s32.totalorder %s663_s9, 0  ;;  %s1995_s26 = scalar_lea.hbm %s1994_s18, 1 }
 0x156   : > { %p1996_p1 = scmp.ne.s32.totalorder %s1994_s18, %s1995_s26  ;;  %p1998_p2 = scmp.lt.s32.totalorder %s1994_s18, %s3150_s2 }
 0x157   : > { %p1999_p3 = scmp.lt.s32.totalorder %s2572_s1, %s1995_s26 }
 0x159   : > { %p2000_p4 = por %p1999_p3, %p1998_p2 }
 0x15b   : > { %p2001_p7 = pnand %p2000_p4, %p1996_p1 }
 0x15d   : > { %2004 = shalt.err (!%p2001_p7)  }
 0x15e   : > { %661 = dma.hbm_to_vmem [thread:$0]  %s657_s20, 16, %s659_s19, [#allocation4 + $0x1] }
 0x15f   : > { %s665_s4 = scalar_select %p664_p0, %s663_s9, 0 }
 0x160   : > { %p1305_p8 = scmp.lt.s32.totalorder %s663_s9, 255  ;;  %p685_p9 = scmp.gt.s32.totalorder %s2868_s0, 0 }
 0x161   : > { %p1310_p10 = scmp.lt.s32.totalorder %s2868_s0, 255  ;;  %s2397_s24 = smov [#allocation3 + $0x5]  }
 0x162   : > { %s3233_s4 = smov (!%p1305_p8, %s665_s4), 255  ;;  %s2885_s11 = sshll.u32 %s2397_s24, 4  ;;  %s701_s11 = int_to_ptr.vmem [resolvable:$true] %s2885_s11 }
 0x163   : > { %s686_s16 = scalar_select %p685_p9, %s2868_s0, 0 }
 0x164   : > { %s668_s12 = scalar_lea.hbm %s3150_s2, %s3233_s4  ;;  %s704_s19 = sadd.s32 22, %s2532_s27 }
 0x165   : > { %s677_s18 = sshll.u32 %s668_s12, 4  ;;  %s2888_s20 = sld [smem:[#allocation6 + %s704_s19]]  ;;  %s678_s18 = int_to_ptr.hbm [resolvable:$true] %s677_s18 }
 0x166   : > { %s2017_s26 = sshra.s32 %s678_s18, 4  ;;  %s2018_s26 = int_to_ptr.hbm [resolvable:$true] %s2017_s26 }
 0x167   : > { %s2019_s9 = scalar_lea.hbm %s2018_s26, 1  ;;  %p2022_p12 = scmp.lt.s32.totalorder %s2018_s26, %s3150_s2 }
 0x168   : > { %p2020_p11 = scmp.ne.s32.totalorder %s2018_s26, %s2019_s9  ;;  %p2023_p13 = scmp.lt.s32.totalorder %s2572_s1, %s2019_s9 }
 0x16a   : > { %p2024_p0 = por %p2023_p13, %p2022_p12 }
 0x16c   : > { %p2025_p1 = pnand %p2024_p0, %p2020_p11 }
 0x16e   : > { %2028 = shalt.err (!%p2025_p1)  }
 0x16f   : > { %682 = dma.hbm_to_vmem [thread:$0]  %s678_s18, 16, %s680_s5, [#allocation4 + $0x1] }
 0x170   : > { %s3235_s16 = smov (!%p1310_p10, %s686_s16), 255  ;;  %s725_s12 = sadd.s32 23, %s2532_s27 }
 0x171   : > { %s689_s3 = scalar_lea.hbm %s3150_s2, %s3235_s16  ;;  %s2398_s19 = smov [#allocation3 + $0x6]  }
 0x172   : > { %s698_s24 = sshll.u32 %s689_s3, 4  ;;  %s2903_s26 = sshll.u32 %s2398_s19, 4  ;;  %s699_s24 = int_to_ptr.hbm [resolvable:$true] %s698_s24  ;;  %s722_s26 = int_to_ptr.vmem [resolvable:$true] %s2903_s26 }
 0x173   : > { %p706_p2 = scmp.gt.s32.totalorder %s2888_s20, 0  ;;  %s2041_s9 = sshra.s32 %s699_s24, 4  ;;  %s2042_s9 = int_to_ptr.hbm [resolvable:$true] %s2041_s9 }
 0x174   : > { %s2043_s23 = scalar_lea.hbm %s2042_s9, 1  ;;  %p2046_p4 = scmp.lt.s32.totalorder %s2042_s9, %s3150_s2 }
 0x175   : > { %p2044_p3 = scmp.ne.s32.totalorder %s2042_s9, %s2043_s23  ;;  %p2047_p7 = scmp.lt.s32.totalorder %s2572_s1, %s2043_s23 }
 0x177   : > { %p2048_p8 = por %p2047_p7, %p2046_p4 }
 0x179   : > { %p2049_p9 = pnand %p2048_p8, %p2044_p3 }
 0x17b   : > { %2052 = shalt.err (!%p2049_p9)  }
 0x17c   : > { %703 = dma.hbm_to_vmem [thread:$0]  %s699_s24, 16, %s701_s11, [#allocation4 + $0x1] }
 0x17d   : > { %s707_s0 = scalar_select %p706_p2, %s2888_s20, 0 }
 0x17e   : > { %p1315_p10 = scmp.lt.s32.totalorder %s2888_s20, 255  ;;  %s726_s16 = sld [smem:[#allocation6 + %s725_s12]] }
 0x17f   : > { %s746_s18 = sadd.s32 24, %s2532_s27  ;;  %s2399_s4 = smov [#allocation3 + $0x7]  }
 0x180   : > { %s3237_s0 = smov (!%p1315_p10, %s707_s0), 255  ;;  %s2913_s21 = sshll.u32 %s2399_s4, 4  ;;  %s743_s21 = int_to_ptr.vmem [resolvable:$true] %s2913_s21 }
 0x181   : > { %s2915_s3 = sld [smem:[#allocation6 + %s746_s18]]  ;;  %s710_s11 = scalar_lea.hbm %s3150_s2, %s3237_s0 }
 0x182   : > { %s719_s24 = sshll.u32 %s710_s11, 4  ;;  %s720_s24 = int_to_ptr.hbm [resolvable:$true] %s719_s24 }
 0x183   : > { %s2065_s20 = sshra.s32 %s720_s24, 4  ;;  %s2066_s20 = int_to_ptr.hbm [resolvable:$true] %s2065_s20 }
 0x184   : > { %p727_p11 = scmp.gt.s32.totalorder %s726_s16, 0  ;;  %s2067_s12 = scalar_lea.hbm %s2066_s20, 1 }
 0x185   : > { %p2068_p12 = scmp.ne.s32.totalorder %s2066_s20, %s2067_s12  ;;  %p2070_p13 = scmp.lt.s32.totalorder %s2066_s20, %s3150_s2 }
 0x186   : > { %p2071_p0 = scmp.lt.s32.totalorder %s2572_s1, %s2067_s12 }
 0x188   : > { %p2072_p1 = por %p2071_p0, %p2070_p13 }
 0x18a   : > { %p2073_p2 = pnand %p2072_p1, %p2068_p12 }
 0x18c   : > { %2076 = shalt.err (!%p2073_p2)  }
 0x18d   : > { %724 = dma.hbm_to_vmem [thread:$0]  %s720_s24, 16, %s722_s26, [#allocation4 + $0x1] }
 0x18e   : > { %s728_s5 = scalar_select %p727_p11, %s726_s16, 0 }
 0x18f   : > { %p1320_p3 = scmp.lt.s32.totalorder %s726_s16, 255  ;;  %p748_p4 = scmp.gt.s32.totalorder %s2915_s3, 0 }
 0x190   : > { %p1325_p7 = scmp.lt.s32.totalorder %s2915_s3, 255  ;;  %s2400_s9 = smov [#allocation3 + $0x8]  }
 0x191   : > { %s3239_s5 = smov (!%p1320_p3, %s728_s5), 255  ;;  %s2932_s11 = sshll.u32 %s2400_s9, 4  ;;  %s764_s11 = int_to_ptr.vmem [resolvable:$true] %s2932_s11 }
 0x192   : > { %s749_s0 = scalar_select %p748_p4, %s2915_s3, 0 }
 0x193   : > { %s731_s19 = scalar_lea.hbm %s3150_s2, %s3239_s5  ;;  %s767_s26 = sadd.s32 25, %s2532_s27 }
 0x194   : > { %s740_s20 = sshll.u32 %s731_s19, 4  ;;  %s2935_s24 = sld [smem:[#allocation6 + %s767_s26]]  ;;  %s741_s20 = int_to_ptr.hbm [resolvable:$true] %s740_s20 }
 0x195   : > { %s2089_s12 = sshra.s32 %s741_s20, 4  ;;  %s2090_s12 = int_to_ptr.hbm [resolvable:$true] %s2089_s12 }
 0x196   : > { %s2091_s16 = scalar_lea.hbm %s2090_s12, 1  ;;  %p2094_p9 = scmp.lt.s32.totalorder %s2090_s12, %s3150_s2 }
 0x197   : > { %p2092_p8 = scmp.ne.s32.totalorder %s2090_s12, %s2091_s16  ;;  %p2095_p10 = scmp.lt.s32.totalorder %s2572_s1, %s2091_s16 }
 0x199   : > { %p2096_p11 = por %p2095_p10, %p2094_p9 }
 0x19b   : > { %p2097_p12 = pnand %p2096_p11, %p2092_p8 }
 0x19d   : > { %2100 = shalt.err (!%p2097_p12)  }
 0x19e   : > { %745 = dma.hbm_to_vmem [thread:$0]  %s741_s20, 16, %s743_s21, [#allocation4 + $0x1] }
 0x19f   : > { %s3241_s0 = smov (!%p1325_p7, %s749_s0), 255  ;;  %s788_s19 = sadd.s32 26, %s2532_s27 }
 0x1a0   : > { %s752_s4 = scalar_lea.hbm %s3150_s2, %s3241_s0  ;;  %s2401_s26 = smov [#allocation3 + $0x9]  }
 0x1a1   : > { %s761_s9 = sshll.u32 %s752_s4, 4  ;;  %s2950_s12 = sshll.u32 %s2401_s26, 4  ;;  %s762_s9 = int_to_ptr.hbm [resolvable:$true] %s761_s9  ;;  %s785_s12 = int_to_ptr.vmem [resolvable:$true] %s2950_s12 }
 0x1a2   : > { %p769_p13 = scmp.gt.s32.totalorder %s2935_s24, 0  ;;  %s2113_s16 = sshra.s32 %s762_s9, 4  ;;  %s2114_s16 = int_to_ptr.hbm [resolvable:$true] %s2113_s16 }
 0x1a3   : > { %s2115_s23 = scalar_lea.hbm %s2114_s16, 1  ;;  %p2118_p1 = scmp.lt.s32.totalorder %s2114_s16, %s3150_s2 }
 0x1a4   : > { %p2116_p0 = scmp.ne.s32.totalorder %s2114_s16, %s2115_s23  ;;  %p2119_p2 = scmp.lt.s32.totalorder %s2572_s1, %s2115_s23 }
 0x1a6   : > { %p2120_p3 = por %p2119_p2, %p2118_p1 }
 0x1a8   : > { %p2121_p4 = pnand %p2120_p3, %p2116_p0 }
 0x1aa   : > { %2124 = shalt.err (!%p2121_p4)  }
 0x1ab   : > { %766 = dma.hbm_to_vmem [thread:$0]  %s762_s9, 16, %s764_s11, [#allocation4 + $0x1] }
 0x1ac   : > { %s770_s3 = scalar_select %p769_p13, %s2935_s24, 0 }
 0x1ad   : > { %p1330_p7 = scmp.lt.s32.totalorder %s2935_s24, 255  ;;  %s789_s0 = sld [smem:[#allocation6 + %s788_s19]] }
 0x1ae   : > { %s809_s20 = sadd.s32 27, %s2532_s27  ;;  %s2402_s5 = smov [#allocation3 + $0xa]  }
 0x1af   : > { %s3243_s3 = smov (!%p1330_p7, %s770_s3), 255  ;;  %s2960_s18 = sshll.u32 %s2402_s5, 4  ;;  %s806_s18 = int_to_ptr.vmem [resolvable:$true] %s2960_s18 }
 0x1b0   : > { %s2962_s4 = sld [smem:[#allocation6 + %s809_s20]]  ;;  %s773_s11 = scalar_lea.hbm %s3150_s2, %s3243_s3 }
 0x1b1   : > { %s782_s9 = sshll.u32 %s773_s11, 4  ;;  %s783_s9 = int_to_ptr.hbm [resolvable:$true] %s782_s9 }
 0x1b2   : > { %s2137_s24 = sshra.s32 %s783_s9, 4  ;;  %s2138_s24 = int_to_ptr.hbm [resolvable:$true] %s2137_s24 }
 0x1b3   : > { %p790_p8 = scmp.gt.s32.totalorder %s789_s0, 0  ;;  %s2139_s19 = scalar_lea.hbm %s2138_s24, 1 }
 0x1b4   : > { %p2140_p9 = scmp.ne.s32.totalorder %s2138_s24, %s2139_s19  ;;  %p2142_p10 = scmp.lt.s32.totalorder %s2138_s24, %s3150_s2 }
 0x1b5   : > { %p2143_p11 = scmp.lt.s32.totalorder %s2572_s1, %s2139_s19 }
 0x1b7   : > { %p2144_p12 = por %p2143_p11, %p2142_p10 }
 0x1b9   : > { %p2145_p13 = pnand %p2144_p12, %p2140_p9 }
 0x1bb   : > { %2148 = shalt.err (!%p2145_p13)  }
 0x1bc   : > { %787 = dma.hbm_to_vmem [thread:$0]  %s783_s9, 16, %s785_s12, [#allocation4 + $0x1] }
 0x1bd   : > { %s791_s21 = scalar_select %p790_p8, %s789_s0, 0 }
 0x1be   : > { %p1335_p0 = scmp.lt.s32.totalorder %s789_s0, 255  ;;  %p811_p1 = scmp.gt.s32.totalorder %s2962_s4, 0 }
 0x1bf   : > { %p1340_p2 = scmp.lt.s32.totalorder %s2962_s4, 255  ;;  %s2403_s16 = smov [#allocation3 + $0xb]  }
 0x1c0   : > { %s3245_s21 = smov (!%p1335_p0, %s791_s21), 255  ;;  %s2979_s11 = sshll.u32 %s2403_s16, 4  ;;  %s827_s11 = int_to_ptr.vmem [resolvable:$true] %s2979_s11 }
 0x1c1   : > { %s812_s3 = scalar_select %p811_p1, %s2962_s4, 0 }
 0x1c2   : > { %s794_s26 = scalar_lea.hbm %s3150_s2, %s3245_s21  ;;  %s830_s12 = sadd.s32 28, %s2532_s27 }
 0x1c3   : > { %s803_s24 = sshll.u32 %s794_s26, 4  ;;  %s2982_s9 = sld [smem:[#allocation6 + %s830_s12]]  ;;  %s804_s24 = int_to_ptr.hbm [resolvable:$true] %s803_s24 }
 0x1c4   : > { %s2161_s19 = sshra.s32 %s804_s24, 4  ;;  %s2162_s19 = int_to_ptr.hbm [resolvable:$true] %s2161_s19 }
 0x1c5   : > { %s2163_s0 = scalar_lea.hbm %s2162_s19, 1  ;;  %p2166_p4 = scmp.lt.s32.totalorder %s2162_s19, %s3150_s2 }
 0x1c6   : > { %p2164_p3 = scmp.ne.s32.totalorder %s2162_s19, %s2163_s0  ;;  %p2167_p7 = scmp.lt.s32.totalorder %s2572_s1, %s2163_s0 }
 0x1c8   : > { %p2168_p8 = por %p2167_p7, %p2166_p4 }
 0x1ca   : > { %p2169_p9 = pnand %p2168_p8, %p2164_p3 }
 0x1cc   : > { %2172 = shalt.err (!%p2169_p9)  }
 0x1cd   : > { %808 = dma.hbm_to_vmem [thread:$0]  %s804_s24, 16, %s806_s18, [#allocation4 + $0x1] }
 0x1ce   : > { %s3247_s3 = smov (!%p1340_p2, %s812_s3), 255  ;;  %s851_s26 = sadd.s32 29, %s2532_s27 }
 0x1cf   : > { %s815_s5 = scalar_lea.hbm %s3150_s2, %s3247_s3  ;;  %s2404_s12 = smov [#allocation3 + $0xc]  }
 0x1d0   : > { %s824_s16 = sshll.u32 %s815_s5, 4  ;;  %s2997_s19 = sshll.u32 %s2404_s12, 4  ;;  %s825_s16 = int_to_ptr.hbm [resolvable:$true] %s824_s16  ;;  %s848_s19 = int_to_ptr.vmem [resolvable:$true] %s2997_s19 }
 0x1d1   : > { %p832_p10 = scmp.gt.s32.totalorder %s2982_s9, 0  ;;  %s2185_s0 = sshra.s32 %s825_s16, 4  ;;  %s2186_s0 = int_to_ptr.hbm [resolvable:$true] %s2185_s0 }
 0x1d2   : > { %s2187_s23 = scalar_lea.hbm %s2186_s0, 1  ;;  %p2190_p12 = scmp.lt.s32.totalorder %s2186_s0, %s3150_s2 }
 0x1d3   : > { %p2188_p11 = scmp.ne.s32.totalorder %s2186_s0, %s2187_s23  ;;  %p2191_p13 = scmp.lt.s32.totalorder %s2572_s1, %s2187_s23 }
 0x1d5   : > { %p2192_p0 = por %p2191_p13, %p2190_p12 }
 0x1d7   : > { %p2193_p1 = pnand %p2192_p0, %p2188_p11 }
 0x1d9   : > { %2196 = shalt.err (!%p2193_p1)  }
 0x1da   : > { %829 = dma.hbm_to_vmem [thread:$0]  %s825_s16, 16, %s827_s11, [#allocation4 + $0x1] }
 0x1db   : > { %s833_s4 = scalar_select %p832_p10, %s2982_s9, 0 }
 0x1dc   : > { %p1345_p2 = scmp.lt.s32.totalorder %s2982_s9, 255  ;;  %s852_s3 = sld [smem:[#allocation6 + %s851_s26]] }
 0x1dd   : > { %s872_s24 = sadd.s32 30, %s2532_s27  ;;  %s2405_s21 = smov [#allocation3 + $0xd]  }
 0x1de   : > { %s3249_s4 = smov (!%p1345_p2, %s833_s4), 255  ;;  %s3007_s20 = sshll.u32 %s2405_s21, 4  ;;  %s869_s20 = int_to_ptr.vmem [resolvable:$true] %s3007_s20 }
 0x1df   : > { %s3009_s5 = sld [smem:[#allocation6 + %s872_s24]]  ;;  %s836_s11 = scalar_lea.hbm %s3150_s2, %s3249_s4 }
 0x1e0   : > { %s845_s16 = sshll.u32 %s836_s11, 4  ;;  %s846_s16 = int_to_ptr.hbm [resolvable:$true] %s845_s16 }
 0x1e1   : > { %s2209_s9 = sshra.s32 %s846_s16, 4  ;;  %s2210_s9 = int_to_ptr.hbm [resolvable:$true] %s2209_s9 }
 0x1e2   : > { %p853_p3 = scmp.gt.s32.totalorder %s852_s3, 0  ;;  %s2211_s26 = scalar_lea.hbm %s2210_s9, 1 }
 0x1e3   : > { %p2212_p4 = scmp.ne.s32.totalorder %s2210_s9, %s2211_s26  ;;  %p2214_p7 = scmp.lt.s32.totalorder %s2210_s9, %s3150_s2 }
 0x1e4   : > { %p2215_p8 = scmp.lt.s32.totalorder %s2572_s1, %s2211_s26 }
 0x1e6   : > { %p2216_p9 = por %p2215_p8, %p2214_p7 }
 0x1e8   : > { %p2217_p10 = pnand %p2216_p9, %p2212_p4 }
 0x1ea   : > { %2220 = shalt.err (!%p2217_p10)  }
 0x1eb   : > { %850 = dma.hbm_to_vmem [thread:$0]  %s846_s16, 16, %s848_s19, [#allocation4 + $0x1] }
 0x1ec   : > { %s854_s18 = scalar_select %p853_p3, %s852_s3, 0 }
 0x1ed   : > { %p1350_p11 = scmp.lt.s32.totalorder %s852_s3, 255  ;;  %p874_p12 = scmp.gt.s32.totalorder %s3009_s5, 0 }
 0x1ee   : > { %p1355_p13 = scmp.lt.s32.totalorder %s3009_s5, 255  ;;  %s2406_s0 = smov [#allocation3 + $0xe]  }
 0x1ef   : > { %s3251_s18 = smov (!%p1350_p11, %s854_s18), 255  ;;  %s3026_s11 = sshll.u32 %s2406_s0, 4  ;;  %s890_s11 = int_to_ptr.vmem [resolvable:$true] %s3026_s11 }
 0x1f0   : > { %s875_s4 = scalar_select %p874_p12, %s3009_s5, 0 }
 0x1f1   : > { %s857_s12 = scalar_lea.hbm %s3150_s2, %s3251_s18  ;;  %s893_s19 = sadd.s32 31, %s2532_s27 }
 0x1f2   : > { %s866_s9 = sshll.u32 %s857_s12, 4  ;;  %s3029_s16 = sld [smem:[#allocation6 + %s893_s19]]  ;;  %s867_s9 = int_to_ptr.hbm [resolvable:$true] %s866_s9 }
 0x1f3   : > { %s2233_s26 = sshra.s32 %s867_s9, 4  ;;  %s2234_s26 = int_to_ptr.hbm [resolvable:$true] %s2233_s26 }
 0x1f4   : > { %s2235_s3 = scalar_lea.hbm %s2234_s26, 1  ;;  %p2238_p1 = scmp.lt.s32.totalorder %s2234_s26, %s3150_s2 }
 0x1f5   : > { %p2236_p0 = scmp.ne.s32.totalorder %s2234_s26, %s2235_s3  ;;  %p2239_p2 = scmp.lt.s32.totalorder %s2572_s1, %s2235_s3 }
 0x1f7   : > { %p2240_p3 = por %p2239_p2, %p2238_p1 }
 0x1f9   : > { %p2241_p4 = pnand %p2240_p3, %p2236_p0 }
 0x1fb   : > { %2244 = shalt.err (!%p2241_p4)  }
 0x1fc   : > { %871 = dma.hbm_to_vmem [thread:$0]  %s867_s9, 16, %s869_s20, [#allocation4 + $0x1] }
 0x1fd   : > { %s3253_s4 = smov (!%p1355_p13, %s875_s4), 255  ;;  %p895_p7 = scmp.gt.s32.totalorder %s3029_s16, 0 }
 0x1fe   : > { %s878_s21 = scalar_lea.hbm %s3150_s2, %s3253_s4 }
 0x1ff   : > { %s887_s12 = sshll.u32 %s878_s21, 4  ;;  %s888_s12 = int_to_ptr.hbm [resolvable:$true] %s887_s12 }
 0x200   : > { %s2257_s0 = sshra.s32 %s888_s12, 4  ;;  %s2258_s0 = int_to_ptr.hbm [resolvable:$true] %s2257_s0 }
 0x201   : > { %s2259_s19 = scalar_lea.hbm %s2258_s0, 1  ;;  %p2262_p9 = scmp.lt.s32.totalorder %s2258_s0, %s3150_s2 }
 0x202   : > { %p2260_p8 = scmp.ne.s32.totalorder %s2258_s0, %s2259_s19  ;;  %p2263_p10 = scmp.lt.s32.totalorder %s2572_s1, %s2259_s19 }
 0x204   : > { %p2264_p11 = por %p2263_p10, %p2262_p9 }
 0x206   : > { %p2265_p12 = pnand %p2264_p11, %p2260_p8 }
 0x208   : > { %2268 = shalt.err (!%p2265_p12)  }
 0x209   : > { %892 = dma.hbm_to_vmem [thread:$0]  %s888_s12, 16, %s890_s11, [#allocation4 + $0x1] }
 0x20a   : > { %s896_s20 = scalar_select %p895_p7, %s3029_s16, 0 }
 0x20b   : > { %p1360_p13 = scmp.lt.s32.totalorder %s3029_s16, 255  ;;  %s2407_s5 = smov [#allocation3 + $0xf]  }
 0x20c   : > { %s910_s4 = sshll.u32 %s2407_s5, 4  ;;  %s911_s4 = int_to_ptr.vmem [resolvable:$true] %s910_s4 }
 0x20d   : > { %s3255_s20 = smov (!%p1360_p13, %s896_s20), 255 }
 0x20e   : > { %s899_s17 = scalar_lea.hbm %s3150_s2, %s3255_s20 }
 0x20f   : > { %s908_s18 = sshll.u32 %s899_s17, 4  ;;  %s909_s18 = int_to_ptr.hbm [resolvable:$true] %s908_s18 }
 0x210   : > { %s2281_s24 = sshra.s32 %s909_s18, 4  ;;  %s2282_s24 = int_to_ptr.hbm [resolvable:$true] %s2281_s24 }
 0x211   : > { %s2283_s21 = scalar_lea.hbm %s2282_s24, 1  ;;  %p2286_p1 = scmp.lt.s32.totalorder %s2282_s24, %s3150_s2 }
 0x212   : > { %p2284_p0 = scmp.ne.s32.totalorder %s2282_s24, %s2283_s21  ;;  %p2287_p2 = scmp.lt.s32.totalorder %s2572_s1, %s2283_s21 }
 0x214   : > { %p2288_p3 = por %p2287_p2, %p2286_p1 }
 0x216   : > { %p2289_p4 = pnand %p2288_p3, %p2284_p0 }
 0x218   : > { %2292 = shalt.err (!%p2289_p4)  }
 0x219   : > { %913 = dma.hbm_to_vmem [thread:$0]  %s909_s18, 16, %s911_s4, [#allocation4 + $0x1] }
 0x21a   : > { %s3058_s16 = scalar_lea.vmem [#allocation7], %s2517_s22 }
 0x21b   : > { %2351 = dma.done.wait [#allocation4], 256 }
 0x21c   : > { %2352 = vsyncadd [#allocation4], 4294967040  ;;  %v2408_v7 = vmov 0   ;;  %v919_v8 = vld [vmem:[%s2550_s25] sm:$0xff]  ;;  %v920_v10 = vld [vmem:[%s2550_s25 + $0x8] sm:$0xff]  ;;  %v3065_v14 = vperm.slane %v2508_v0, 0 }
 0x21d   : > { %1513 = vset.pattern.permute.xlu0 %v2408_v7  ;;  %v921_v9 = vcvt.s32.f32 %v919_v8  ;;  %v922_v11 = vcvt.s32.f32 %v920_v10  ;;  %v917_v12 = vld [vmem:[#allocation2] sm:$0xff]  ;;  %v3070_v15 = vperm.slane %v239_v2, 0  ;;  %v918_v18 = vld [vmem:[#allocation2 + $0x8] sm:$0xff]  ;;  %v2409_v26 = vmov 128.0  }
 0x21e   : > { %v923_v13 = vadd.f32 %v917_v12, %v2537_v5  ;;  %v924_v21 = vadd.f32 %v918_v18, %v2542_v6  ;;  %1514 = vrcp.f32 %v2409_v26  ;;  %v3084_v55 = vperm.slane %v2524_v3, 0 }
 0x21f   : > { %930 = vperm.xlu0 %1513, %v921_v9   ;;  %v3087_v58 = vperm.slane %v2529_v4, 0 }
 0x220   : > { %v926_v16 = vadd.f32 %v3065_v14, %v923_v13  ;;  %v927_v22 = vadd.f32 %v3065_v14, %v924_v21 }
 0x224   : > { %v1515_v27 = vpop.eup %1514 }
 0x225   : > { %v948_v28 = vmul.f32 128.0, %v1515_v27  ;;  %vm952_vm0 = vweird.f32 %v1515_v27 }
 0x227   : > { %935 = vperm.xlu0 %1513, %v922_v11   ;;  %v949_v29 = vsub.f32 1.0, %v948_v28 }
 0x229   : > { %v950_v30 = vmul.f32 %v1515_v27, %v949_v29 }
 0x22b   : > { %v951_v31 = vadd.f32 %v1515_v27, %v950_v30 }
 0x22d   : > { %v3077_v32 = vsel %vm952_vm0, %v1515_v27, %v951_v31 }
 0x291   : > { %v931_v17 = vpop.permute.xlu0 %930 }
 0x292   : > { %v939_v19 = vmul.f32 %v3070_v15, %v931_v17 }
 0x294   : > { %v941_v20 = vadd.f32 %v939_v19, %v926_v16 }
 0x296   : > { %943 = vadd.xlane.f32.xlu1 %v941_v20 }
 0x299   : > { %v936_v23 = vpop.permute.xlu0 %935 }
 0x29a   : > { %v940_v24 = vmul.f32 %v3070_v15, %v936_v23 }
 0x29c   : > { %v942_v25 = vadd.f32 %v940_v24, %v927_v22 }
 0x29e   : > { %945 = vadd.xlane.f32.xlu1 %v942_v25 }
 0x309   : > { %v944_v33 = vpop.xlane.xlu1 %943 }
 0x30a   : > { %v954_v34 = vmul.f32 %v3077_v32, %v944_v33 }
 0x30c   : > { %v956_v35 = vsub.f32 %v941_v20, %v954_v34 }
 0x30e   : > { %v958_v36 = vmul.f32 %v956_v35, %v956_v35 }
 0x310   : > { %960 = vadd.xlane.f32.xlu2 %v958_v36 }
 0x311   : > { %v946_v37 = vpop.xlane.xlu1 %945 }
 0x312   : > { %v955_v38 = vmul.f32 %v3077_v32, %v946_v37 }
 0x314   : > { %v957_v39 = vsub.f32 %v942_v25, %v955_v38 }
 0x316   : > { %v959_v40 = vmul.f32 %v957_v39, %v957_v39 }
 0x318   : > { %962 = vadd.xlane.f32.xlu2 %v959_v40 }
 0x383   : > { %v961_v41 = vpop.xlane.xlu2 %960 }
 0x384   : > { %v964_v42 = vmul.f32 %v961_v41, %v3077_v32 }
 0x386   : > { %v966_v43 = vadd.f32 1e-12, %v964_v42 }
 0x388   : > { %1516 = vrsqrt.f32 %v966_v43  ;;  %vm974_vm2 = vweird.f32 %v966_v43 }
 0x38b   : > { %v963_v44 = vpop.xlane.xlu2 %962 }
 0x38c   : > { %v965_v45 = vmul.f32 %v963_v44, %v3077_v32 }
 0x38e   : > { %v1517_v46 = vpop.eup %1516  ;;  %v967_v47 = vadd.f32 1e-12, %v965_v45 }
 0x38f   : > { %v969_v48 = vmul.f32 %v1517_v46, %v966_v43  ;;  %vm975_vm1 = vweird.f32 %v1517_v46 }
 0x390   : > { %1518 = vrsqrt.f32 %v967_v47  ;;  %vm976_vm3 = vmor %vm974_vm2, %vm975_vm1  ;;  %vm984_vm5 = vweird.f32 %v967_v47 }
 0x391   : > { %v970_v49 = vmul.f32 %v1517_v46, %v969_v48 }
 0x393   : > { %v971_v50 = vmul.f32 0.5, %v970_v49 }
 0x395   : > { %v972_v51 = vsub.f32 1.5, %v971_v50 }
 0x396   : > { %v1519_v52 = vpop.eup %1518 }
 0x397   : > { %v973_v53 = vmul.f32 %v1517_v46, %v972_v51  ;;  %v979_v54 = vmul.f32 %v1519_v52, %v967_v47  ;;  %vm985_vm4 = vweird.f32 %v1519_v52 }
 0x398   : > { %vm986_vm6 = vmor %vm984_vm5, %vm985_vm4 }
 0x399   : > { %v977_v56 = vsel %vm976_vm3, %v1517_v46, %v973_v53  ;;  %v980_v57 = vmul.f32 %v1519_v52, %v979_v54 }
 0x39a   : > { %v988_v59 = vmul.f32 %v977_v56, %v956_v35 }
 0x39b   : > { %v981_v60 = vmul.f32 0.5, %v980_v57 }
 0x39c   : > { %v993_v61 = vmul.f32 %v3084_v55, %v988_v59 }
 0x39d   : > { %v982_v62 = vsub.f32 1.5, %v981_v60 }
 0x39e   : > { %v998_v63 = vadd.f32 %v3087_v58, %v993_v61 }
 0x39f   : > { %v983_v0 = vmul.f32 %v1519_v52, %v982_v62 }
 0x3a0   : > { %1000 = vst [vmem:[%s3058_s16] sm:$0xff] %v998_v63 }
 0x3a1   : > { %v987_v1 = vsel %vm986_vm6, %v1519_v52, %v983_v0 }
 0x3a2   : > { %v989_v2 = vmul.f32 %v987_v1, %v957_v39 }
 0x3a4   : > { %v994_v3 = vmul.f32 %v3084_v55, %v989_v2 }
 0x3a6   : > { %v999_v8 = vadd.f32 %v3087_v58, %v994_v3 }
 0x3a8   : > { %1001 = vst [vmem:[%s3058_s16 + $0x8] sm:$0xff] %v999_v8 }
 0x3a9   : > { %2353 = dma.done.wait [#allocation4 + $0x1], 256 }
 0x3aa   : > { %2354 = vsyncadd [#allocation4 + $0x1], 4294967040  ;;  %1520 = vset.pattern.permute.xlu0 %v2408_v7  ;;  %v1006_v4 = vld [vmem:[%s2550_s25 + $0x10] sm:$0xff]  ;;  %v1007_v10 = vld [vmem:[%s2550_s25 + $0x18] sm:$0xff]  ;;  %s1086_s25 = scalar_lea.hbm %s3155_s7, %s2532_s27  ;;  %s1087_s0 = sshll.u32 %s3058_s16, 4  ;;  %s1088_s0 = int_to_ptr.vmem [resolvable:$true] %s1087_s0 }
 0x3ab   : > { %v1008_v9 = vcvt.s32.f32 %v1006_v4  ;;  %v1009_v11 = vcvt.s32.f32 %v1007_v10  ;;  %v1004_v12 = vld [vmem:[#allocation3] sm:$0xff]  ;;  %v1005_v18 = vld [vmem:[#allocation3 + $0x8] sm:$0xff]  ;;  %s1089_s19 = sshll.u32 %s1086_s25, 4  ;;  %s3179_s26 = sand.u32 1, %s2365_s29   ;;  %s1090_s19 = int_to_ptr.hbm [resolvable:$true] %s1089_s19 }
 0x3ac   : > { %v1010_v13 = vadd.f32 %v1004_v12, %v2537_v5  ;;  %v1011_v21 = vadd.f32 %v1005_v18, %v2542_v6  ;;  %s1075_s3 = scalar_lea.sflag [#allocation8], %s3179_s26  ;;  %s2319_s20 = sshra.s32 %s1090_s19, 4  ;;  %s2320_s20 = int_to_ptr.hbm [resolvable:$true] %s2319_s20 }
 0x3ad   : > { %1016 = vperm.xlu0 %1520, %v1008_v9   ;;  %s2321_s5 = scalar_lea.hbm %s2320_s20, 32  ;;  %s2325_s9 = scalar_lea.hbm %s3155_s7, 96 }
 0x3ae   : > { %v1012_v16 = vadd.f32 %v1010_v13, %v3065_v14  ;;  %v1013_v7 = vadd.f32 %v1011_v21, %v3065_v14  ;;  %p2322_p7 = scmp.ne.s32.totalorder %s2320_s20, %s2321_s5  ;;  %p2326_p10 = scmp.lt.s32.totalorder %s2320_s20, %s3155_s7 }
 0x3af   : > { %p2327_p11 = scmp.lt.s32.totalorder %s2325_s9, %s2321_s5 }
 0x3b0   : > { %p2323_p8 = pnand %p2322_p7, %p2493_p5 }
 0x3b1   : > { %p2328_p12 = por %p2327_p11, %p2326_p10 }
 0x3b2   : > { %p2324_p9 = pneg %p2323_p8 }
 0x3b4   : > { %p2329_p13 = pnand %p2328_p12, %p2324_p9 }
 0x3b5   : > { %1021 = vperm.xlu0 %1520, %v1009_v11  }
 0x41f   : > { %v1017_v17 = vpop.permute.xlu0 %1016 }
 0x420   : > { %v1024_v19 = vmul.f32 %v1017_v17, %v3070_v15 }
 0x422   : > { %v1026_v20 = vadd.f32 %v1024_v19, %v1012_v16 }
 0x424   : > { %1028 = vadd.xlane.f32.xlu1 %v1026_v20 }
 0x427   : > { %v1022_v22 = vpop.permute.xlu0 %1021 }
 0x428   : > { %v1025_v23 = vmul.f32 %v1022_v22, %v3070_v15 }
 0x42a   : > { %v1027_v24 = vadd.f32 %v1025_v23, %v1013_v7 }
 0x42c   : > { %1030 = vadd.xlane.f32.xlu1 %v1027_v24 }
 0x497   : > { %v1029_v25 = vpop.xlane.xlu1 %1028 }
 0x498   : > { %v1032_v5 = vmul.f32 %v1029_v25, %v3077_v32 }
 0x49a   : > { %v1034_v26 = vsub.f32 %v1026_v20, %v1032_v5 }
 0x49c   : > { %v1036_v27 = vmul.f32 %v1034_v26, %v1034_v26 }
 0x49e   : > { %1038 = vadd.xlane.f32.xlu2 %v1036_v27 }
 0x49f   : > { %v1031_v28 = vpop.xlane.xlu1 %1030 }
 0x4a0   : > { %v1033_v29 = vmul.f32 %v1031_v28, %v3077_v32 }
 0x4a2   : > { %v1035_v30 = vsub.f32 %v1027_v24, %v1033_v29 }
 0x4a4   : > { %v1037_v31 = vmul.f32 %v1035_v30, %v1035_v30 }
 0x4a6   : > { %1040 = vadd.xlane.f32.xlu2 %v1037_v31 }
 0x511   : > { %v1039_v6 = vpop.xlane.xlu2 %1038 }
 0x512   : > { %v1042_v14 = vmul.f32 %v1039_v6, %v3077_v32 }
 0x514   : > { %v1044_v33 = vadd.f32 1e-12, %v1042_v14 }
 0x516   : > { %1521 = vrsqrt.f32 %v1044_v33  ;;  %vm1052_vm8 = vweird.f32 %v1044_v33 }
 0x519   : > { %v1041_v15 = vpop.xlane.xlu2 %1040 }
 0x51a   : > { %v1043_v34 = vmul.f32 %v1041_v15, %v3077_v32 }
 0x51c   : > { %v1522_v35 = vpop.eup %1521  ;;  %v1045_v36 = vadd.f32 1e-12, %v1043_v34 }
 0x51d   : > { %v1047_v37 = vmul.f32 %v1522_v35, %v1044_v33  ;;  %vm1053_vm7 = vweird.f32 %v1522_v35 }
 0x51e   : > { %1523 = vrsqrt.f32 %v1045_v36  ;;  %vm1054_vm9 = vmor %vm1052_vm8, %vm1053_vm7  ;;  %vm1062_vm11 = vweird.f32 %v1045_v36 }
 0x51f   : > { %v1048_v38 = vmul.f32 %v1522_v35, %v1047_v37 }
 0x521   : > { %v1049_v39 = vmul.f32 0.5, %v1048_v38 }
 0x523   : > { %v1050_v40 = vsub.f32 1.5, %v1049_v39 }
 0x524   : > { %v1524_v41 = vpop.eup %1523 }
 0x525   : > { %v1051_v42 = vmul.f32 %v1522_v35, %v1050_v40  ;;  %v1057_v43 = vmul.f32 %v1524_v41, %v1045_v36  ;;  %vm1063_vm10 = vweird.f32 %v1524_v41 }
 0x526   : > { %vm1064_vm12 = vmor %vm1062_vm11, %vm1063_vm10 }
 0x527   : > { %v1055_v44 = vsel %vm1054_vm9, %v1522_v35, %v1051_v42  ;;  %v1058_v45 = vmul.f32 %v1524_v41, %v1057_v43 }
 0x528   : > { %v1066_v46 = vmul.f32 %v1055_v44, %v1034_v26 }
 0x529   : > { %v1059_v32 = vmul.f32 0.5, %v1058_v45 }
 0x52a   : > { %v1068_v47 = vmul.f32 %v1066_v46, %v3084_v55 }
 0x52b   : > { %v1060_v48 = vsub.f32 1.5, %v1059_v32 }
 0x52c   : > { %v1070_v49 = vadd.f32 %v1068_v47, %v3087_v58 }
 0x52d   : > { %v1061_v50 = vmul.f32 %v1524_v41, %v1060_v48 }
 0x52e   : > { %1072 = vst [vmem:[%s3058_s16 + $0x10] sm:$0xff] %v1070_v49 }
 0x52f   : > { %v1065_v51 = vsel %vm1064_vm12, %v1524_v41, %v1061_v50 }
 0x530   : > { %v1067_v52 = vmul.f32 %v1065_v51, %v1035_v30 }
 0x532   : > { %v1069_v53 = vmul.f32 %v1067_v52, %v3084_v55 }
 0x534   : > { %v1071_v54 = vadd.f32 %v1069_v53, %v3087_v58 }
 0x536   : > { %1073 = vst [vmem:[%s3058_s16 + $0x18] sm:$0xff] %v1071_v54 }
 0x537   : > { %2332 = shalt.err (!%p2329_p13)
}
 0x538   : > { %s2410_s18 = smov 128   ;;  %s2411_s24 = smov 8  }
 0x539   : > { %1437 = dma.vmem_to_hbm [thread:$0]  (%p2493_p5), %s1088_s0, 512, %s1090_s19, %s1075_s3, %s2410_s18, %s2410_s18, %s2411_s24  }
 0x53a PF: > { %p1443_p0 = scmp.ge.s32.totalorder %s2373_s8, 2  ;;  %s1104_s21 = sand.u32 1, %s2361_s28  }
 0x53b   : > { %s1105_s11 = scalar_lea.sflag [#allocation8], %s1104_s21 }
 0x53c   : > { %p1440_p1 = pnand %p1443_p0, %p2497_p6 }
 0x53e   : > { %p1441_p2 = pneg %p1440_p1 }
 0x540   : > { %2356 = dma.done.wait (%p1441_p2), %s1105_s11, 512  }
 0x541   : > { %2358 = vsyncadd (%p1441_p2), %s1105_s11, 4294966784  ;;  %p25_p3 = scmp.ge.s32.totalorder %s2480_s10, 5   ;;  %s3180_s28 = smov %s2365_s29 }
 0x542   : > { %s3181_s29 = smov %s2369_s30  ;;  %s3182_s30 = smov %s2491_s13 }
 0x543   : > { %s3183_s8 = smov %s2480_s10  ;;  %27 = sbr.rel (!%p25_p3) target bundleno = 12 (0xc), region = 267 }
 0x548   :  { %1111 = vsyncpa [#allocation8], 1 }
 0x549   :  { %1113 = vsyncpa [#allocation8 + $0x1], 1 }
 0x54a   :  { %1114 = vsyncmov [#allocation4] }
 0x54d   :  { %s1115_s8 = vpop.sfrf %1114 }
 0x54e   :  { %p1370_p5 = scmp.ne.s32.totalorder %s1115_s8, 0 }
 0x550   :  { %1119 = shalt.err (%p1370_p5)  }
 0x551   :  { %1121 = vsyncmov [#allocation4 + $0x1] }
 0x554   :  { %s1122_s14 = vpop.sfrf %1121 }
 0x555   :  { %p1371_p6 = scmp.ne.s32.totalorder %s1122_s14, 0 }
 0x557   :  { %1126 = shalt.err (%p1371_p6)  }

// kernel: tpu_custom_call.1
= control target key start
LH: loop header
LB: loop body
LE: loop exit
PB: predicated region body
PF: predicated region fallthrough
CT: control target
= control target key end

     0   :  { %s2375_s27 = smov [#allocation6]   ;;  %s3148_s0 = inlined_call_operand.vmem [shape: s32[96], index: 0, kind: input, shape index: {}]   ;;  %s3149_s1 = inlined_call_operand.vmem [shape: s32[96,1], index: 1, kind: input, shape index: {}]   ;;  %s3150_s2 = inlined_call_operand.hbm [shape: f32[256,128], index: 2, kind: input, shape index: {}]   ;;  %s3151_s3 = inlined_call_operand.vmem [shape: f32[16,128], index: 3, kind: input, shape index: {}]   ;;  %s3152_s4 = inlined_call_operand.vmem [shape: f32[2,128], index: 4, kind: input, shape index: {}]   ;;  %s3153_s5 = inlined_call_operand.vmem [shape: f32[1,128], index: 5, kind: input, shape index: {}]   ;;  %s3154_s6 = inlined_call_operand.vmem [shape: f32[1,128], index: 6, kind: input, shape index: {}]   ;;  %s3155_s7 = inlined_call_operand.hbm [shape: f32[96,128], index: 7, kind: output, shape index: {}]  }
   0x1   :  { %3160 = sst [smem:[#allocation82_spill]] %s3149_s1  ;;  %s13_s26 = sshll.u32 %s3148_s0, 4  ;;  %s14_s26 = int_to_ptr.vmem [resolvable:$true] %s13_s26 }
   0x2   :  { %3161 = sst [smem:[#allocation83_spill]] %s3151_s3 }
   0x3   :  { %3162 = sst [smem:[#allocation84_spill]] %s3152_s4 }
   0x4   :  { %3163 = sst [smem:[#allocation85_spill]] %s3153_s5 }
   0x5   :  { %16 = dma.vmem_to_smem %s14_s26, 16, %s2375_s27, [#allocation5] }
   0x6   :  { %2349 = dma.done.wait [#allocation5], 16 }
   0x7   :  { %2350 = vsyncadd [#allocation5], 4294967280 }
   0x8   :  { %19 = sfence }
   0x9   :  { %20 = vsyncpa [#allocation8], 0 }
   0xa   :  { %22 = vsyncpa [#allocation8 + $0x1], 0  ;;  %s2455_s28 = smov 0   ;;  %s2457_s29 = smov 0  }
   0xb   :  { %s2459_s30 = smov 0   ;;  %s2461_s8 = smov 0  }
   0xc LB: > { %s2476_s0 = sadd.s32 4294967295, %s2373_s8   ;;  %s1197_s9 = sadd.s32 4294967294, %s2373_s8   ;;  %s2373_s8 = sphi %s2461_s8, %s3183_s8   ;;  %s2369_s30 = sphi %s2459_s30, %s3182_s30   ;;  %s2365_s29 = sphi %s2457_s29, %s3181_s29   ;;  %s2361_s28 = sphi %s2455_s28, %s3180_s28  }
   0xd   : > { %s2480_s10 = sadd.s32 1, %s2373_s8   ;;  %s145_s11 = sadd.s32 1, %s2369_s30 }
   0xe   : > { %s142_s12 = ssub.s32 %s2373_s8, %s2480_s10  ;;  %p155_p0 = scmp.ne.s32.totalorder %s2369_s30, %s2365_s29 }
   0xf   : > { %p143_p1 = scmp.eq.s32.totalorder %s142_s12, 0  ;;  %p156_p2 = scmp.eq.s32.totalorder %s2476_s0, 2 }
  0x10   : > { %p161_p3 = scmp.ne.s32.totalorder %s2365_s29, %s2361_s28  ;;  %p162_p4 = scmp.eq.s32.totalorder %s1197_s9, 2 }
  0x11   : > { %s2491_s13 = scalar_select %p143_p1, %s2369_s30, %s145_s11  }
  0x12   : > { %p2493_p5 = por %p156_p2, %p155_p0  ;;  %p2497_p6 = por %p162_p4, %p161_p3 }
  0x13   : > { %p1200_p7 = scmp.ge.s32.totalorder %s2373_s8, 1  ;;  %p201_p8 = scmp.lt.s32.totalorder %s2373_s8, 4 }
  0x15   : > { %p202_p9 = pnand %p1200_p7, %p201_p8 }
  0x17   : > { %205 = sbr.rel (%p202_p9) target bundleno = 1338 (0x53a), region = 40 }
  0x1c   : > { %s3156_s16 = sand.u32 1, %s2365_s29   ;;  %s1202_s17 = sshll.u32 %s2476_s0, 2  ;;  %v2529_v4 = vld [vmem:[%s3154_s6] sm:$0x1] }
  0x1d   : > { %s3166_s4 = sld [smem:[#allocation84_spill]]  ;;  %s2517_s22 = sshll.u32 %s3156_s16, 5 }
  0x1e   : > { %p230_p10 = scmp.lt.s32.totalorder %s1202_s17, 11  ;;  %s3167_s5 = sld [smem:[#allocation85_spill]] }
  0x1f   : > { %s2532_s27 = sshll.u32 %s2476_s0, 5  ;;  %s3168_s3 = sld [smem:[#allocation83_spill]] }
  0x20   : > { %s3185_s17 = smov (!%p230_p10, %s1202_s17), 11  ;;  %s244_s19 = sld [smem:[#allocation6 + %s2532_s27]] }
  0x21   : > { %s1203_s20 = sshll.u32 %s3185_s17, 3  ;;  %s2376_s21 = smov [#allocation2]  }
  0x22   : > { %s2545_s0 = sshll.u32 %s2376_s21, 4  ;;  %s3170_s1 = sld [smem:[#allocation82_spill]] }
  0x23   : > { %v2508_v0 = vld [vmem:[%s3166_s4] sm:$0x1]  ;;  %v2513_v1 = vld [vmem:[%s3166_s4 + $0x1] sm:$0x1]  ;;  %3169 = sst [smem:[#allocation79_spill]] %s2545_s0  ;;  %s263_s26 = sadd.s32 1, %s2532_s27 }
  0x24   : > { %v239_v2 = vsub.f32 %v2513_v1, %v2508_v0  ;;  %v2524_v3 = vld [vmem:[%s3167_s5] sm:$0x1]  ;;  %s2554_s9 = sld [smem:[#allocation6 + %s263_s26]]  ;;  %s2377_s11 = smov [#allocation2 + $0x1]  }
  0x25   : > { %v2537_v5 = vld [vmem:[%s3168_s3] sm:$0xff]  ;;  %v2542_v6 = vld [vmem:[%s3168_s3 + $0x8] sm:$0xff]  ;;  %s2556_s12 = sshll.u32 %s2377_s11, 4  ;;  %s284_s17 = sadd.s32 2, %s2532_s27 }
  0x26   : > { %3171 = sst [smem:[#allocation80_spill]] %s2556_s12  ;;  %p245_p11 = scmp.gt.s32.totalorder %s244_s19, 0 }
  0x27   : > { %p1205_p12 = scmp.lt.s32.totalorder %s244_s19, 255  ;;  %s285_s18 = sld [smem:[#allocation6 + %s284_s17]] }
  0x28   : > { %s2550_s25 = scalar_lea.vmem %s3170_s1, %s1203_s20  ;;  %s3187_s19 = smov (!%p245_p11, %s244_s19), 0 }
  0x29   : > { %s2378_s21 = smov [#allocation2 + $0x2]   ;;  %s305_s20 = sadd.s32 3, %s2532_s27 }
  0x2a   : > { %s2560_s23 = sshll.u32 %s2378_s21, 4  ;;  %s3189_s19 = smov (!%p1205_p12, %s3187_s19), 255 }
  0x2b   : > { %3172 = sst [smem:[#allocation81_spill]] %s2560_s23  ;;  %p265_p13 = scmp.gt.s32.totalorder %s2554_s9, 0 }
  0x2c   : > { %p1210_p0 = scmp.lt.s32.totalorder %s2554_s9, 255  ;;  %s249_s11 = scalar_lea.hbm %s3150_s2, %s3189_s19 }
  0x2d   : > { %s257_s16 = sshll.u32 %s249_s11, 4  ;;  %p286_p1 = scmp.gt.s32.totalorder %s285_s18, 0  ;;  %s258_s16 = int_to_ptr.hbm [resolvable:$true] %s257_s16 }
  0x2e   : > { %p1215_p2 = scmp.lt.s32.totalorder %s285_s18, 255  ;;  %s1537_s12 = sshra.s32 %s258_s16, 4  ;;  %s1538_s12 = int_to_ptr.hbm [resolvable:$true] %s1537_s12 }
  0x2f   : > { %s1539_s17 = scalar_lea.hbm %s1538_s12, 1  ;;  %s2572_s1 = scalar_lea.hbm %s3150_s2, 256 }
  0x30   : > { %p1540_p3 = scmp.ne.s32.totalorder %s1538_s12, %s1539_s17  ;;  %p1542_p4 = scmp.lt.s32.totalorder %s1538_s12, %s3150_s2 }
  0x31   : > { %p1543_p7 = scmp.lt.s32.totalorder %s2572_s1, %s1539_s17 }
  0x33   : > { %p1544_p8 = por %p1543_p7, %p1542_p4 }
  0x35   : > { %p1545_p9 = pnand %p1544_p8, %p1540_p3 }
  0x37   : > { %1548 = shalt.err (!%p1545_p9)  }
  0x38   : > { %s3173_s19 = sld [smem:[#allocation79_spill]] }
  0x39   : > { %s266_s0 = scalar_select %p265_p13, %s2554_s9, 0 }
  0x3a   : > { %s287_s26 = scalar_select %p286_p1, %s285_s18, 0 }
  0x3b   : > { %s3191_s0 = smov (!%p1210_p0, %s266_s0), 255  ;;  %s2590_s11 = sld [smem:[#allocation6 + %s305_s20]] }
  0x3c   : > { %s3193_s26 = smov (!%p1215_p2, %s287_s26), 255  ;;  %s269_s12 = scalar_lea.hbm %s3150_s2, %s3191_s0 }
  0x3d   : > { %s278_s17 = sshll.u32 %s269_s12, 4  ;;  %s279_s17 = int_to_ptr.hbm [resolvable:$true] %s278_s17 }
  0x3e   : > { %s3174_s24 = int_to_ptr.vmem [resolvable:$true] %s3173_s19  ;;  %s1561_s23 = sshra.s32 %s279_s17, 4  ;;  %s1562_s23 = int_to_ptr.hbm [resolvable:$true] %s1561_s23 }
  0x3f   : > { %262 = dma.hbm_to_vmem [thread:$0]  %s258_s16, 16, %s3174_s24, [#allocation4] }
  0x40   : > { %s290_s16 = scalar_lea.hbm %s3150_s2, %s3193_s26  ;;  %s1563_s5 = scalar_lea.hbm %s1562_s23, 1 }
  0x41   : > { %s299_s24 = sshll.u32 %s290_s16, 4  ;;  %p1564_p10 = scmp.ne.s32.totalorder %s1562_s23, %s1563_s5  ;;  %s300_s24 = int_to_ptr.hbm [resolvable:$true] %s299_s24 }
  0x42   : > { %p1566_p11 = scmp.lt.s32.totalorder %s1562_s23, %s3150_s2  ;;  %p1567_p12 = scmp.lt.s32.totalorder %s2572_s1, %s1563_s5 }
  0x44   : > { %p1568_p13 = por %p1567_p12, %p1566_p11 }
  0x46   : > { %p1569_p0 = pnand %p1568_p13, %p1564_p10 }
  0x48   : > { %1572 = shalt.err (!%p1569_p0)  }
  0x49   : > { %s3175_s20 = sld [smem:[#allocation80_spill]]  ;;  %s1585_s26 = sshra.s32 %s300_s24, 4  ;;  %s1586_s26 = int_to_ptr.hbm [resolvable:$true] %s1585_s26 }
  0x4a   : > { %s1587_s3 = scalar_lea.hbm %s1586_s26, 1  ;;  %p1590_p2 = scmp.lt.s32.totalorder %s1586_s26, %s3150_s2 }
  0x4b   : > { %p1588_p1 = scmp.ne.s32.totalorder %s1586_s26, %s1587_s3  ;;  %p1591_p3 = scmp.lt.s32.totalorder %s2572_s1, %s1587_s3 }
  0x4d   : > { %p1592_p4 = por %p1591_p3, %p1590_p2 }
  0x4f   : > { %s3176_s0 = int_to_ptr.vmem [resolvable:$true] %s3175_s20  ;;  %p1593_p7 = pnand %p1592_p4, %p1588_p1 }
  0x50   : > { %283 = dma.hbm_to_vmem [thread:$0]  %s279_s17, 16, %s3176_s0, [#allocation4] }
  0x51   : > { %1596 = shalt.err (!%p1593_p7)  }
  0x52   : > { %s3177_s5 = sld [smem:[#allocation81_spill]]  ;;  %p307_p8 = scmp.gt.s32.totalorder %s2590_s11, 0 }
  0x53   : > { %p1220_p9 = scmp.lt.s32.totalorder %s2590_s11, 255  ;;  %s326_s17 = sadd.s32 4, %s2532_s27 }
  0x54   : > { %s3195_s11 = smov (!%p307_p8, %s2590_s11), 0  ;;  %s2379_s21 = smov [#allocation2 + $0x3]  }
  0x55   : > { %s322_s19 = sshll.u32 %s2379_s21, 4  ;;  %s327_s16 = sld [smem:[#allocation6 + %s326_s17]]  ;;  %s323_s19 = int_to_ptr.vmem [resolvable:$true] %s322_s19 }
  0x56   : > { %s3197_s11 = smov (!%p1220_p9, %s3195_s11), 255  ;;  %s347_s9 = sadd.s32 5, %s2532_s27 }
  0x57   : > { %s311_s0 = scalar_lea.hbm %s3150_s2, %s3197_s11  ;;  %s2380_s3 = smov [#allocation2 + $0x4]  }
  0x58   : > { %s3178_s23 = int_to_ptr.vmem [resolvable:$true] %s3177_s5  ;;  %s320_s26 = sshll.u32 %s311_s0, 4  ;;  %s321_s26 = int_to_ptr.hbm [resolvable:$true] %s320_s26 }
  0x59   : > { %304 = dma.hbm_to_vmem [thread:$0]  %s300_s24, 16, %s3178_s23, [#allocation4] }
  0x5a   : > { %s2615_s4 = sshll.u32 %s2380_s3, 4  ;;  %s2617_s24 = sld [smem:[#allocation6 + %s347_s9]]  ;;  %s344_s4 = int_to_ptr.vmem [resolvable:$true] %s2615_s4 }
  0x5b   : > { %s1609_s12 = sshra.s32 %s321_s26, 4  ;;  %s1610_s12 = int_to_ptr.hbm [resolvable:$true] %s1609_s12 }
  0x5c   : > { %s1611_s5 = scalar_lea.hbm %s1610_s12, 1  ;;  %p1614_p11 = scmp.lt.s32.totalorder %s1610_s12, %s3150_s2 }
  0x5d   : > { %p1612_p10 = scmp.ne.s32.totalorder %s1610_s12, %s1611_s5  ;;  %p1615_p12 = scmp.lt.s32.totalorder %s2572_s1, %s1611_s5 }
  0x5f   : > { %p1616_p13 = por %p1615_p12, %p1614_p11 }
  0x61   : > { %p1617_p0 = pnand %p1616_p13, %p1612_p10 }
  0x63   : > { %1620 = shalt.err (!%p1617_p0)  }
  0x64   : > { %325 = dma.hbm_to_vmem [thread:$0]  %s321_s26, 16, %s323_s19, [#allocation4] }
  0x65   : > { %p328_p1 = scmp.gt.s32.totalorder %s327_s16, 0  ;;  %p1225_p2 = scmp.lt.s32.totalorder %s327_s16, 255 }
  0x66   : > { %s368_s11 = sadd.s32 6, %s2532_s27  ;;  %s2381_s21 = smov [#allocation2 + $0x5]  }
  0x67   : > { %s3199_s16 = smov (!%p328_p1, %s327_s16), 0  ;;  %s2624_s9 = sshll.u32 %s2381_s21, 4  ;;  %s365_s9 = int_to_ptr.vmem [resolvable:$true] %s2624_s9 }
  0x68   : > { %s2626_s18 = sld [smem:[#allocation6 + %s368_s11]]  ;;  %s3201_s16 = smov (!%p1225_p2, %s3199_s16), 255 }
  0x69   : > { %p349_p3 = scmp.gt.s32.totalorder %s2617_s24, 0  ;;  %s332_s0 = scalar_lea.hbm %s3150_s2, %s3201_s16 }
  0x6a   : > { %p1230_p4 = scmp.lt.s32.totalorder %s2617_s24, 255  ;;  %s341_s26 = sshll.u32 %s332_s0, 4  ;;  %s342_s26 = int_to_ptr.hbm [resolvable:$true] %s341_s26 }
  0x6b   : > { %s1633_s3 = sshra.s32 %s342_s26, 4  ;;  %s1634_s3 = int_to_ptr.hbm [resolvable:$true] %s1633_s3 }
  0x6c   : > { %s1635_s12 = scalar_lea.hbm %s1634_s3, 1  ;;  %p1638_p8 = scmp.lt.s32.totalorder %s1634_s3, %s3150_s2 }
  0x6d   : > { %p1636_p7 = scmp.ne.s32.totalorder %s1634_s3, %s1635_s12  ;;  %p1639_p9 = scmp.lt.s32.totalorder %s2572_s1, %s1635_s12 }
  0x6f   : > { %p1640_p10 = por %p1639_p9, %p1638_p8 }
  0x71   : > { %p1641_p11 = pnand %p1640_p10, %p1636_p7 }
  0x73   : > { %1644 = shalt.err (!%p1641_p11)  }
  0x74   : > { %346 = dma.hbm_to_vmem [thread:$0]  %s342_s26, 16, %s344_s4, [#allocation4] }
  0x75   : > { %s350_s16 = scalar_select %p349_p3, %s2617_s24, 0 }
  0x76   : > { %p370_p12 = scmp.gt.s32.totalorder %s2626_s18, 0  ;;  %s2382_s17 = smov [#allocation2 + $0x6]  }
  0x77   : > { %s2643_s11 = sshll.u32 %s2382_s17, 4  ;;  %s3203_s16 = smov (!%p1230_p4, %s350_s16), 255  ;;  %s386_s11 = int_to_ptr.vmem [resolvable:$true] %s2643_s11 }
  0x78   : > { %s371_s21 = scalar_select %p370_p12, %s2626_s18, 0 }
  0x79   : > { %s353_s4 = scalar_lea.hbm %s3150_s2, %s3203_s16  ;;  %p1235_p13 = scmp.lt.s32.totalorder %s2626_s18, 255 }
  0x7a   : > { %s362_s0 = sshll.u32 %s353_s4, 4  ;;  %s389_s26 = sadd.s32 7, %s2532_s27  ;;  %s363_s0 = int_to_ptr.hbm [resolvable:$true] %s362_s0 }
  0x7b   : > { %s2653_s3 = sld [smem:[#allocation6 + %s389_s26]]  ;;  %s1657_s12 = sshra.s32 %s363_s0, 4  ;;  %s1658_s12 = int_to_ptr.hbm [resolvable:$true] %s1657_s12 }
  0x7c   : > { %s1659_s5 = scalar_lea.hbm %s1658_s12, 1  ;;  %p1662_p1 = scmp.lt.s32.totalorder %s1658_s12, %s3150_s2 }
  0x7d   : > { %p1660_p0 = scmp.ne.s32.totalorder %s1658_s12, %s1659_s5  ;;  %p1663_p2 = scmp.lt.s32.totalorder %s2572_s1, %s1659_s5 }
  0x7f   : > { %p1664_p3 = por %p1663_p2, %p1662_p1 }
  0x81   : > { %p1665_p4 = pnand %p1664_p3, %p1660_p0 }
  0x83   : > { %1668 = shalt.err (!%p1665_p4)  }
  0x84   : > { %367 = dma.hbm_to_vmem [thread:$0]  %s363_s0, 16, %s365_s9, [#allocation4] }
  0x85   : > { %s3205_s21 = smov (!%p1235_p13, %s371_s21), 255  ;;  %s410_s19 = sadd.s32 8, %s2532_s27 }
  0x86   : > { %s374_s20 = scalar_lea.hbm %s3150_s2, %s3205_s21  ;;  %s2383_s26 = smov [#allocation2 + $0x7]  }
  0x87   : > { %s383_s4 = sshll.u32 %s374_s20, 4  ;;  %s2668_s12 = sshll.u32 %s2383_s26, 4  ;;  %s384_s4 = int_to_ptr.hbm [resolvable:$true] %s383_s4  ;;  %s407_s12 = int_to_ptr.vmem [resolvable:$true] %s2668_s12 }
  0x88   : > { %p391_p7 = scmp.gt.s32.totalorder %s2653_s3, 0  ;;  %s1681_s5 = sshra.s32 %s384_s4, 4  ;;  %s1682_s5 = int_to_ptr.hbm [resolvable:$true] %s1681_s5 }
  0x89   : > { %s1683_s23 = scalar_lea.hbm %s1682_s5, 1  ;;  %p1686_p9 = scmp.lt.s32.totalorder %s1682_s5, %s3150_s2 }
  0x8a   : > { %p1684_p8 = scmp.ne.s32.totalorder %s1682_s5, %s1683_s23  ;;  %p1687_p10 = scmp.lt.s32.totalorder %s2572_s1, %s1683_s23 }
  0x8c   : > { %p1688_p11 = por %p1687_p10, %p1686_p9 }
  0x8e   : > { %p1689_p12 = pnand %p1688_p11, %p1684_p8 }
  0x90   : > { %1692 = shalt.err (!%p1689_p12)  }
  0x91   : > { %388 = dma.hbm_to_vmem [thread:$0]  %s384_s4, 16, %s386_s11, [#allocation4] }
  0x92   : > { %s392_s18 = scalar_select %p391_p7, %s2653_s3, 0 }
  0x93   : > { %p1240_p13 = scmp.lt.s32.totalorder %s2653_s3, 255  ;;  %s411_s21 = sld [smem:[#allocation6 + %s410_s19]] }
  0x94   : > { %s431_s0 = sadd.s32 9, %s2532_s27  ;;  %s2384_s24 = smov [#allocation2 + $0x8]  }
  0x95   : > { %s3207_s18 = smov (!%p1240_p13, %s392_s18), 255  ;;  %s2678_s16 = sshll.u32 %s2384_s24, 4  ;;  %s428_s16 = int_to_ptr.vmem [resolvable:$true] %s2678_s16 }
  0x96   : > { %s2680_s20 = sld [smem:[#allocation6 + %s431_s0]]  ;;  %s395_s11 = scalar_lea.hbm %s3150_s2, %s3207_s18 }
  0x97   : > { %s404_s4 = sshll.u32 %s395_s11, 4  ;;  %s405_s4 = int_to_ptr.hbm [resolvable:$true] %s404_s4 }
  0x98   : > { %s1705_s3 = sshra.s32 %s405_s4, 4  ;;  %s1706_s3 = int_to_ptr.hbm [resolvable:$true] %s1705_s3 }
  0x99   : > { %p412_p0 = scmp.gt.s32.totalorder %s411_s21, 0  ;;  %s1707_s19 = scalar_lea.hbm %s1706_s3, 1 }
  0x9a   : > { %p1708_p1 = scmp.ne.s32.totalorder %s1706_s3, %s1707_s19  ;;  %p1710_p2 = scmp.lt.s32.totalorder %s1706_s3, %s3150_s2 }
  0x9b   : > { %p1711_p3 = scmp.lt.s32.totalorder %s2572_s1, %s1707_s19 }
  0x9d   : > { %p1712_p4 = por %p1711_p3, %p1710_p2 }
  0x9f   : > { %p1713_p7 = pnand %p1712_p4, %p1708_p1 }
  0xa1   : > { %1716 = shalt.err (!%p1713_p7)  }
  0xa2   : > { %409 = dma.hbm_to_vmem [thread:$0]  %s405_s4, 16, %s407_s12, [#allocation4] }
  0xa3   : > { %s413_s9 = scalar_select %p412_p0, %s411_s21, 0 }
  0xa4   : > { %p1245_p8 = scmp.lt.s32.totalorder %s411_s21, 255  ;;  %p433_p9 = scmp.gt.s32.totalorder %s2680_s20, 0 }
  0xa5   : > { %p1250_p10 = scmp.lt.s32.totalorder %s2680_s20, 255  ;;  %s2385_s5 = smov [#allocation2 + $0x9]  }
  0xa6   : > { %s3209_s9 = smov (!%p1245_p8, %s413_s9), 255  ;;  %s2697_s11 = sshll.u32 %s2385_s5, 4  ;;  %s449_s11 = int_to_ptr.vmem [resolvable:$true] %s2697_s11 }
  0xa7   : > { %s434_s18 = scalar_select %p433_p9, %s2680_s20, 0 }
  0xa8   : > { %s416_s26 = scalar_lea.hbm %s3150_s2, %s3209_s9  ;;  %s452_s12 = sadd.s32 10, %s2532_s27 }
  0xa9   : > { %s425_s3 = sshll.u32 %s416_s26, 4  ;;  %s2700_s4 = sld [smem:[#allocation6 + %s452_s12]]  ;;  %s426_s3 = int_to_ptr.hbm [resolvable:$true] %s425_s3 }
  0xaa   : > { %s1729_s19 = sshra.s32 %s426_s3, 4  ;;  %s1730_s19 = int_to_ptr.hbm [resolvable:$true] %s1729_s19 }
  0xab   : > { %s1731_s21 = scalar_lea.hbm %s1730_s19, 1  ;;  %p1734_p12 = scmp.lt.s32.totalorder %s1730_s19, %s3150_s2 }
  0xac   : > { %p1732_p11 = scmp.ne.s32.totalorder %s1730_s19, %s1731_s21  ;;  %p1735_p13 = scmp.lt.s32.totalorder %s2572_s1, %s1731_s21 }
  0xae   : > { %p1736_p0 = por %p1735_p13, %p1734_p12 }
  0xb0   : > { %p1737_p1 = pnand %p1736_p0, %p1732_p11 }
  0xb2   : > { %1740 = shalt.err (!%p1737_p1)  }
  0xb3   : > { %430 = dma.hbm_to_vmem [thread:$0]  %s426_s3, 16, %s428_s16, [#allocation4] }
  0xb4   : > { %s3211_s18 = smov (!%p1250_p10, %s434_s18), 255  ;;  %s473_s26 = sadd.s32 11, %s2532_s27 }
  0xb5   : > { %s437_s24 = scalar_lea.hbm %s3150_s2, %s3211_s18  ;;  %s2386_s12 = smov [#allocation2 + $0xa]  }
  0xb6   : > { %s446_s5 = sshll.u32 %s437_s24, 4  ;;  %s2715_s19 = sshll.u32 %s2386_s12, 4  ;;  %s447_s5 = int_to_ptr.hbm [resolvable:$true] %s446_s5  ;;  %s470_s19 = int_to_ptr.vmem [resolvable:$true] %s2715_s19 }
  0xb7   : > { %p454_p2 = scmp.gt.s32.totalorder %s2700_s4, 0  ;;  %s1753_s21 = sshra.s32 %s447_s5, 4  ;;  %s1754_s21 = int_to_ptr.hbm [resolvable:$true] %s1753_s21 }
  0xb8   : > { %s1755_s23 = scalar_lea.hbm %s1754_s21, 1  ;;  %p1758_p4 = scmp.lt.s32.totalorder %s1754_s21, %s3150_s2 }
  0xb9   : > { %p1756_p3 = scmp.ne.s32.totalorder %s1754_s21, %s1755_s23  ;;  %p1759_p7 = scmp.lt.s32.totalorder %s2572_s1, %s1755_s23 }
  0xbb   : > { %p1760_p8 = por %p1759_p7, %p1758_p4 }
  0xbd   : > { %p1761_p9 = pnand %p1760_p8, %p1756_p3 }
  0xbf   : > { %1764 = shalt.err (!%p1761_p9)  }
  0xc0   : > { %451 = dma.hbm_to_vmem [thread:$0]  %s447_s5, 16, %s449_s11, [#allocation4] }
  0xc1   : > { %s455_s20 = scalar_select %p454_p2, %s2700_s4, 0 }
  0xc2   : > { %p1255_p10 = scmp.lt.s32.totalorder %s2700_s4, 255  ;;  %s474_s18 = sld [smem:[#allocation6 + %s473_s26]] }
  0xc3   : > { %s494_s3 = sadd.s32 12, %s2532_s27  ;;  %s2387_s9 = smov [#allocation2 + $0xb]  }
  0xc4   : > { %s3213_s20 = smov (!%p1255_p10, %s455_s20), 255  ;;  %s2725_s0 = sshll.u32 %s2387_s9, 4  ;;  %s491_s0 = int_to_ptr.vmem [resolvable:$true] %s2725_s0 }
  0xc5   : > { %s2727_s24 = sld [smem:[#allocation6 + %s494_s3]]  ;;  %s458_s11 = scalar_lea.hbm %s3150_s2, %s3213_s20 }
  0xc6   : > { %s467_s5 = sshll.u32 %s458_s11, 4  ;;  %s468_s5 = int_to_ptr.hbm [resolvable:$true] %s467_s5 }
  0xc7   : > { %s1777_s4 = sshra.s32 %s468_s5, 4  ;;  %s1778_s4 = int_to_ptr.hbm [resolvable:$true] %s1777_s4 }
  0xc8   : > { %p475_p11 = scmp.gt.s32.totalorder %s474_s18, 0  ;;  %s1779_s26 = scalar_lea.hbm %s1778_s4, 1 }
  0xc9   : > { %p1780_p12 = scmp.ne.s32.totalorder %s1778_s4, %s1779_s26  ;;  %p1782_p13 = scmp.lt.s32.totalorder %s1778_s4, %s3150_s2 }
  0xca   : > { %p1783_p0 = scmp.lt.s32.totalorder %s2572_s1, %s1779_s26 }
  0xcc   : > { %p1784_p1 = por %p1783_p0, %p1782_p13 }
  0xce   : > { %p1785_p2 = pnand %p1784_p1, %p1780_p12 }
  0xd0   : > { %1788 = shalt.err (!%p1785_p2)  }
  0xd1   : > { %472 = dma.hbm_to_vmem [thread:$0]  %s468_s5, 16, %s470_s19, [#allocation4] }
  0xd2   : > { %s476_s16 = scalar_select %p475_p11, %s474_s18, 0 }
  0xd3   : > { %p1260_p3 = scmp.lt.s32.totalorder %s474_s18, 255  ;;  %p496_p4 = scmp.gt.s32.totalorder %s2727_s24, 0 }
  0xd4   : > { %p1265_p7 = scmp.lt.s32.totalorder %s2727_s24, 255  ;;  %s2388_s21 = smov [#allocation2 + $0xc]  }
  0xd5   : > { %s3215_s16 = smov (!%p1260_p3, %s476_s16), 255  ;;  %s2744_s11 = sshll.u32 %s2388_s21, 4  ;;  %s512_s11 = int_to_ptr.vmem [resolvable:$true] %s2744_s11 }
  0xd6   : > { %s497_s20 = scalar_select %p496_p4, %s2727_s24, 0 }
  0xd7   : > { %s479_s12 = scalar_lea.hbm %s3150_s2, %s3215_s16  ;;  %s515_s19 = sadd.s32 13, %s2532_s27 }
  0xd8   : > { %s488_s4 = sshll.u32 %s479_s12, 4  ;;  %s2747_s5 = sld [smem:[#allocation6 + %s515_s19]]  ;;  %s489_s4 = int_to_ptr.hbm [resolvable:$true] %s488_s4 }
  0xd9   : > { %s1801_s26 = sshra.s32 %s489_s4, 4  ;;  %s1802_s26 = int_to_ptr.hbm [resolvable:$true] %s1801_s26 }
  0xda   : > { %s1803_s18 = scalar_lea.hbm %s1802_s26, 1  ;;  %p1806_p9 = scmp.lt.s32.totalorder %s1802_s26, %s3150_s2 }
  0xdb   : > { %p1804_p8 = scmp.ne.s32.totalorder %s1802_s26, %s1803_s18  ;;  %p1807_p10 = scmp.lt.s32.totalorder %s2572_s1, %s1803_s18 }
  0xdd   : > { %p1808_p11 = por %p1807_p10, %p1806_p9 }
  0xdf   : > { %p1809_p12 = pnand %p1808_p11, %p1804_p8 }
  0xe1   : > { %1812 = shalt.err (!%p1809_p12)  }
  0xe2   : > { %493 = dma.hbm_to_vmem [thread:$0]  %s489_s4, 16, %s491_s0, [#allocation4] }
  0xe3   : > { %s3217_s20 = smov (!%p1265_p7, %s497_s20), 255  ;;  %s536_s12 = sadd.s32 14, %s2532_s27 }
  0xe4   : > { %s500_s9 = scalar_lea.hbm %s3150_s2, %s3217_s20  ;;  %s2389_s19 = smov [#allocation2 + $0xd]  }
  0xe5   : > { %s509_s21 = sshll.u32 %s500_s9, 4  ;;  %s2762_s26 = sshll.u32 %s2389_s19, 4  ;;  %s510_s21 = int_to_ptr.hbm [resolvable:$true] %s509_s21  ;;  %s533_s26 = int_to_ptr.vmem [resolvable:$true] %s2762_s26 }
  0xe6   : > { %p517_p13 = scmp.gt.s32.totalorder %s2747_s5, 0  ;;  %s1825_s18 = sshra.s32 %s510_s21, 4  ;;  %s1826_s18 = int_to_ptr.hbm [resolvable:$true] %s1825_s18 }
  0xe7   : > { %s1827_s23 = scalar_lea.hbm %s1826_s18, 1  ;;  %p1830_p1 = scmp.lt.s32.totalorder %s1826_s18, %s3150_s2 }
  0xe8   : > { %p1828_p0 = scmp.ne.s32.totalorder %s1826_s18, %s1827_s23  ;;  %p1831_p2 = scmp.lt.s32.totalorder %s2572_s1, %s1827_s23 }
  0xea   : > { %p1832_p3 = por %p1831_p2, %p1830_p1 }
  0xec   : > { %p1833_p4 = pnand %p1832_p3, %p1828_p0 }
  0xee   : > { %1836 = shalt.err (!%p1833_p4)  }
  0xef   : > { %514 = dma.hbm_to_vmem [thread:$0]  %s510_s21, 16, %s512_s11, [#allocation4] }
  0xf0   : > { %s518_s24 = scalar_select %p517_p13, %s2747_s5, 0 }
  0xf1   : > { %p1270_p7 = scmp.lt.s32.totalorder %s2747_s5, 255  ;;  %s537_s20 = sld [smem:[#allocation6 + %s536_s12]] }
  0xf2   : > { %s557_s4 = sadd.s32 15, %s2532_s27  ;;  %s2390_s16 = smov [#allocation2 + $0xe]  }
  0xf3   : > { %s3219_s24 = smov (!%p1270_p7, %s518_s24), 255  ;;  %s2772_s3 = sshll.u32 %s2390_s16, 4  ;;  %s554_s3 = int_to_ptr.vmem [resolvable:$true] %s2772_s3 }
  0xf4   : > { %s2774_s9 = sld [smem:[#allocation6 + %s557_s4]]  ;;  %s521_s11 = scalar_lea.hbm %s3150_s2, %s3219_s24 }
  0xf5   : > { %s530_s21 = sshll.u32 %s521_s11, 4  ;;  %s531_s21 = int_to_ptr.hbm [resolvable:$true] %s530_s21 }
  0xf6   : > { %s1849_s5 = sshra.s32 %s531_s21, 4  ;;  %s1850_s5 = int_to_ptr.hbm [resolvable:$true] %s1849_s5 }
  0xf7   : > { %p538_p8 = scmp.gt.s32.totalorder %s537_s20, 0  ;;  %s1851_s12 = scalar_lea.hbm %s1850_s5, 1 }
  0xf8   : > { %p1852_p9 = scmp.ne.s32.totalorder %s1850_s5, %s1851_s12  ;;  %p1854_p10 = scmp.lt.s32.totalorder %s1850_s5, %s3150_s2 }
  0xf9   : > { %p1855_p11 = scmp.lt.s32.totalorder %s2572_s1, %s1851_s12 }
  0xfb   : > { %p1856_p12 = por %p1855_p11, %p1854_p10 }
  0xfd   : > { %p1857_p13 = pnand %p1856_p12, %p1852_p9 }
  0xff   : > { %1860 = shalt.err (!%p1857_p13)  }
 0x100   : > { %535 = dma.hbm_to_vmem [thread:$0]  %s531_s21, 16, %s533_s26, [#allocation4] }
 0x101   : > { %s539_s0 = scalar_select %p538_p8, %s537_s20, 0 }
 0x102   : > { %p1275_p0 = scmp.lt.s32.totalorder %s537_s20, 255  ;;  %p559_p1 = scmp.gt.s32.totalorder %s2774_s9, 0 }
 0x103   : > { %p1280_p2 = scmp.lt.s32.totalorder %s2774_s9, 255  ;;  %s2391_s18 = smov [#allocation2 + $0xf]  }
 0x104   : > { %s3221_s0 = smov (!%p1275_p0, %s539_s0), 255  ;;  %s2791_s11 = sshll.u32 %s2391_s18, 4  ;;  %s575_s11 = int_to_ptr.vmem [resolvable:$true] %s2791_s11 }
 0x105   : > { %s560_s24 = scalar_select %p559_p1, %s2774_s9, 0 }
 0x106   : > { %s542_s19 = scalar_lea.hbm %s3150_s2, %s3221_s0  ;;  %s578_s26 = sadd.s32 16, %s2532_s27 }
 0x107   : > { %s551_s5 = sshll.u32 %s542_s19, 4  ;;  %s2794_s21 = sld [smem:[#allocation6 + %s578_s26]]  ;;  %s552_s5 = int_to_ptr.hbm [resolvable:$true] %s551_s5 }
 0x108   : > { %s1873_s12 = sshra.s32 %s552_s5, 4  ;;  %s1874_s12 = int_to_ptr.hbm [resolvable:$true] %s1873_s12 }
 0x109   : > { %s1875_s20 = scalar_lea.hbm %s1874_s12, 1  ;;  %p1878_p4 = scmp.lt.s32.totalorder %s1874_s12, %s3150_s2 }
 0x10a   : > { %p1876_p3 = scmp.ne.s32.totalorder %s1874_s12, %s1875_s20  ;;  %p1879_p7 = scmp.lt.s32.totalorder %s2572_s1, %s1875_s20 }
 0x10c   : > { %p1880_p8 = por %p1879_p7, %p1878_p4 }
 0x10e   : > { %p1881_p9 = pnand %p1880_p8, %p1876_p3 }
 0x110   : > { %1884 = shalt.err (!%p1881_p9)  }
 0x111   : > { %556 = dma.hbm_to_vmem [thread:$0]  %s552_s5, 16, %s554_s3, [#allocation4] }
 0x112   : > { %s3223_s24 = smov (!%p1280_p2, %s560_s24), 255  ;;  %s599_s19 = sadd.s32 17, %s2532_s27 }
 0x113   : > { %s563_s16 = scalar_lea.hbm %s3150_s2, %s3223_s24  ;;  %s2392_s26 = smov [#allocation3]  }
 0x114   : > { %s572_s18 = sshll.u32 %s563_s16, 4  ;;  %s2809_s12 = sshll.u32 %s2392_s26, 4  ;;  %s573_s18 = int_to_ptr.hbm [resolvable:$true] %s572_s18  ;;  %s596_s12 = int_to_ptr.vmem [resolvable:$true] %s2809_s12 }
 0x115   : > { %p580_p10 = scmp.gt.s32.totalorder %s2794_s21, 0  ;;  %s1897_s20 = sshra.s32 %s573_s18, 4  ;;  %s1898_s20 = int_to_ptr.hbm [resolvable:$true] %s1897_s20 }
 0x116   : > { %s1899_s23 = scalar_lea.hbm %s1898_s20, 1  ;;  %p1902_p12 = scmp.lt.s32.totalorder %s1898_s20, %s3150_s2 }
 0x117   : > { %p1900_p11 = scmp.ne.s32.totalorder %s1898_s20, %s1899_s23  ;;  %p1903_p13 = scmp.lt.s32.totalorder %s2572_s1, %s1899_s23 }
 0x119   : > { %p1904_p0 = por %p1903_p13, %p1902_p12 }
 0x11b   : > { %p1905_p1 = pnand %p1904_p0, %p1900_p11 }
 0x11d   : > { %1908 = shalt.err (!%p1905_p1)  }
 0x11e   : > { %577 = dma.hbm_to_vmem [thread:$0]  %s573_s18, 16, %s575_s11, [#allocation4] }
 0x11f   : > { %s581_s9 = scalar_select %p580_p10, %s2794_s21, 0 }
 0x120   : > { %p1285_p2 = scmp.lt.s32.totalorder %s2794_s21, 255  ;;  %s600_s24 = sld [smem:[#allocation6 + %s599_s19]] }
 0x121   : > { %s620_s5 = sadd.s32 18, %s2532_s27  ;;  %s2393_s0 = smov [#allocation3 + $0x1]  }
 0x122   : > { %s3225_s9 = smov (!%p1285_p2, %s581_s9), 255  ;;  %s2819_s4 = sshll.u32 %s2393_s0, 4  ;;  %s617_s4 = int_to_ptr.vmem [resolvable:$true] %s2819_s4 }
 0x123   : > { %s2821_s16 = sld [smem:[#allocation6 + %s620_s5]]  ;;  %s584_s11 = scalar_lea.hbm %s3150_s2, %s3225_s9 }
 0x124   : > { %s593_s18 = sshll.u32 %s584_s11, 4  ;;  %s594_s18 = int_to_ptr.hbm [resolvable:$true] %s593_s18 }
 0x125   : > { %s1921_s21 = sshra.s32 %s594_s18, 4  ;;  %s1922_s21 = int_to_ptr.hbm [resolvable:$true] %s1921_s21 }
 0x126   : > { %p601_p3 = scmp.gt.s32.totalorder %s600_s24, 0  ;;  %s1923_s19 = scalar_lea.hbm %s1922_s21, 1 }
 0x127   : > { %p1924_p4 = scmp.ne.s32.totalorder %s1922_s21, %s1923_s19  ;;  %p1926_p7 = scmp.lt.s32.totalorder %s1922_s21, %s3150_s2 }
 0x128   : > { %p1927_p8 = scmp.lt.s32.totalorder %s2572_s1, %s1923_s19 }
 0x12a   : > { %p1928_p9 = por %p1927_p8, %p1926_p7 }
 0x12c   : > { %p1929_p10 = pnand %p1928_p9, %p1924_p4 }
 0x12e   : > { %1932 = shalt.err (!%p1929_p10)  }
 0x12f   : > { %598 = dma.hbm_to_vmem [thread:$0]  %s594_s18, 16, %s596_s12, [#allocation4 + $0x1] }
 0x130   : > { %s602_s3 = scalar_select %p601_p3, %s600_s24, 0 }
 0x131   : > { %p1290_p11 = scmp.lt.s32.totalorder %s600_s24, 255  ;;  %p622_p12 = scmp.gt.s32.totalorder %s2821_s16, 0 }
 0x132   : > { %p1295_p13 = scmp.lt.s32.totalorder %s2821_s16, 255  ;;  %s2394_s20 = smov [#allocation3 + $0x2]  }
 0x133   : > { %s3227_s3 = smov (!%p1290_p11, %s602_s3), 255  ;;  %s2838_s11 = sshll.u32 %s2394_s20, 4  ;;  %s638_s11 = int_to_ptr.vmem [resolvable:$true] %s2838_s11 }
 0x134   : > { %s623_s9 = scalar_select %p622_p12, %s2821_s16, 0 }
 0x135   : > { %s605_s26 = scalar_lea.hbm %s3150_s2, %s3227_s3  ;;  %s641_s12 = sadd.s32 19, %s2532_s27 }
 0x136   : > { %s614_s21 = sshll.u32 %s605_s26, 4  ;;  %s2841_s18 = sld [smem:[#allocation6 + %s641_s12]]  ;;  %s615_s21 = int_to_ptr.hbm [resolvable:$true] %s614_s21 }
 0x137   : > { %s1945_s19 = sshra.s32 %s615_s21, 4  ;;  %s1946_s19 = int_to_ptr.hbm [resolvable:$true] %s1945_s19 }
 0x138   : > { %s1947_s24 = scalar_lea.hbm %s1946_s19, 1  ;;  %p1950_p1 = scmp.lt.s32.totalorder %s1946_s19, %s3150_s2 }
 0x139   : > { %p1948_p0 = scmp.ne.s32.totalorder %s1946_s19, %s1947_s24  ;;  %p1951_p2 = scmp.lt.s32.totalorder %s2572_s1, %s1947_s24 }
 0x13b   : > { %p1952_p3 = por %p1951_p2, %p1950_p1 }
 0x13d   : > { %p1953_p4 = pnand %p1952_p3, %p1948_p0 }
 0x13f   : > { %1956 = shalt.err (!%p1953_p4)  }
 0x140   : > { %619 = dma.hbm_to_vmem [thread:$0]  %s615_s21, 16, %s617_s4, [#allocation4 + $0x1] }
 0x141   : > { %s3229_s9 = smov (!%p1295_p13, %s623_s9), 255  ;;  %s662_s26 = sadd.s32 20, %s2532_s27 }
 0x142   : > { %s626_s0 = scalar_lea.hbm %s3150_s2, %s3229_s9  ;;  %s2395_s12 = smov [#allocation3 + $0x3]  }
 0x143   : > { %s635_s20 = sshll.u32 %s626_s0, 4  ;;  %s2856_s19 = sshll.u32 %s2395_s12, 4  ;;  %s636_s20 = int_to_ptr.hbm [resolvable:$true] %s635_s20  ;;  %s659_s19 = int_to_ptr.vmem [resolvable:$true] %s2856_s19 }
 0x144   : > { %p643_p7 = scmp.gt.s32.totalorder %s2841_s18, 0  ;;  %s1969_s24 = sshra.s32 %s636_s20, 4  ;;  %s1970_s24 = int_to_ptr.hbm [resolvable:$true] %s1969_s24 }
 0x145   : > { %s1971_s23 = scalar_lea.hbm %s1970_s24, 1  ;;  %p1974_p9 = scmp.lt.s32.totalorder %s1970_s24, %s3150_s2 }
 0x146   : > { %p1972_p8 = scmp.ne.s32.totalorder %s1970_s24, %s1971_s23  ;;  %p1975_p10 = scmp.lt.s32.totalorder %s2572_s1, %s1971_s23 }
 0x148   : > { %p1976_p11 = por %p1975_p10, %p1974_p9 }
 0x14a   : > { %p1977_p12 = pnand %p1976_p11, %p1972_p8 }
 0x14c   : > { %1980 = shalt.err (!%p1977_p12)  }
 0x14d   : > { %640 = dma.hbm_to_vmem [thread:$0]  %s636_s20, 16, %s638_s11, [#allocation4 + $0x1] }
 0x14e   : > { %s644_s16 = scalar_select %p643_p7, %s2841_s18, 0 }
 0x14f   : > { %p1300_p13 = scmp.lt.s32.totalorder %s2841_s18, 255  ;;  %s663_s9 = sld [smem:[#allocation6 + %s662_s26]] }
 0x150   : > { %s683_s21 = sadd.s32 21, %s2532_s27  ;;  %s2396_s3 = smov [#allocation3 + $0x4]  }
 0x151   : > { %s3231_s16 = smov (!%p1300_p13, %s644_s16), 255  ;;  %s2866_s5 = sshll.u32 %s2396_s3, 4  ;;  %s680_s5 = int_to_ptr.vmem [resolvable:$true] %s2866_s5 }
 0x152   : > { %s2868_s0 = sld [smem:[#allocation6 + %s683_s21]]  ;;  %s647_s11 = scalar_lea.hbm %s3150_s2, %s3231_s16 }
 0x153   : > { %s656_s20 = sshll.u32 %s647_s11, 4  ;;  %s657_s20 = int_to_ptr.hbm [resolvable:$true] %s656_s20 }
 0x154   : > { %s1993_s18 = sshra.s32 %s657_s20, 4  ;;  %s1994_s18 = int_to_ptr.hbm [resolvable:$true] %s1993_s18 }
 0x155   : > { %p664_p0 = scmp.gt.s32.totalorder %s663_s9, 0  ;;  %s1995_s26 = scalar_lea.hbm %s1994_s18, 1 }
 0x156   : > { %p1996_p1 = scmp.ne.s32.totalorder %s1994_s18, %s1995_s26  ;;  %p1998_p2 = scmp.lt.s32.totalorder %s1994_s18, %s3150_s2 }
 0x157   : > { %p1999_p3 = scmp.lt.s32.totalorder %s2572_s1, %s1995_s26 }
 0x159   : > { %p2000_p4 = por %p1999_p3, %p1998_p2 }
 0x15b   : > { %p2001_p7 = pnand %p2000_p4, %p1996_p1 }
 0x15d   : > { %2004 = shalt.err (!%p2001_p7)  }
 0x15e   : > { %661 = dma.hbm_to_vmem [thread:$0]  %s657_s20, 16, %s659_s19, [#allocation4 + $0x1] }
 0x15f   : > { %s665_s4 = scalar_select %p664_p0, %s663_s9, 0 }
 0x160   : > { %p1305_p8 = scmp.lt.s32.totalorder %s663_s9, 255  ;;  %p685_p9 = scmp.gt.s32.totalorder %s2868_s0, 0 }
 0x161   : > { %p1310_p10 = scmp.lt.s32.totalorder %s2868_s0, 255  ;;  %s2397_s24 = smov [#allocation3 + $0x5]  }
 0x162   : > { %s3233_s4 = smov (!%p1305_p8, %s665_s4), 255  ;;  %s2885_s11 = sshll.u32 %s2397_s24, 4  ;;  %s701_s11 = int_to_ptr.vmem [resolvable:$true] %s2885_s11 }
 0x163   : > { %s686_s16 = scalar_select %p685_p9, %s2868_s0, 0 }
 0x164   : > { %s668_s12 = scalar_lea.hbm %s3150_s2, %s3233_s4  ;;  %s704_s19 = sadd.s32 22, %s2532_s27 }
 0x165   : > { %s677_s18 = sshll.u32 %s668_s12, 4  ;;  %s2888_s20 = sld [smem:[#allocation6 + %s704_s19]]  ;;  %s678_s18 = int_to_ptr.hbm [resolvable:$true] %s677_s18 }
 0x166   : > { %s2017_s26 = sshra.s32 %s678_s18, 4  ;;  %s2018_s26 = int_to_ptr.hbm [resolvable:$true] %s2017_s26 }
 0x167   : > { %s2019_s9 = scalar_lea.hbm %s2018_s26, 1  ;;  %p2022_p12 = scmp.lt.s32.totalorder %s2018_s26, %s3150_s2 }
 0x168   : > { %p2020_p11 = scmp.ne.s32.totalorder %s2018_s26, %s2019_s9  ;;  %p2023_p13 = scmp.lt.s32.totalorder %s2572_s1, %s2019_s9 }
 0x16a   : > { %p2024_p0 = por %p2023_p13, %p2022_p12 }
 0x16c   : > { %p2025_p1 = pnand %p2024_p0, %p2020_p11 }
 0x16e   : > { %2028 = shalt.err (!%p2025_p1)  }
 0x16f   : > { %682 = dma.hbm_to_vmem [thread:$0]  %s678_s18, 16, %s680_s5, [#allocation4 + $0x1] }
 0x170   : > { %s3235_s16 = smov (!%p1310_p10, %s686_s16), 255  ;;  %s725_s12 = sadd.s32 23, %s2532_s27 }
 0x171   : > { %s689_s3 = scalar_lea.hbm %s3150_s2, %s3235_s16  ;;  %s2398_s19 = smov [#allocation3 + $0x6]  }
 0x172   : > { %s698_s24 = sshll.u32 %s689_s3, 4  ;;  %s2903_s26 = sshll.u32 %s2398_s19, 4  ;;  %s699_s24 = int_to_ptr.hbm [resolvable:$true] %s698_s24  ;;  %s722_s26 = int_to_ptr.vmem [resolvable:$true] %s2903_s26 }
 0x173   : > { %p706_p2 = scmp.gt.s32.totalorder %s2888_s20, 0  ;;  %s2041_s9 = sshra.s32 %s699_s24, 4  ;;  %s2042_s9 = int_to_ptr.hbm [resolvable:$true] %s2041_s9 }
 0x174   : > { %s2043_s23 = scalar_lea.hbm %s2042_s9, 1  ;;  %p2046_p4 = scmp.lt.s32.totalorder %s2042_s9, %s3150_s2 }
 0x175   : > { %p2044_p3 = scmp.ne.s32.totalorder %s2042_s9, %s2043_s23  ;;  %p2047_p7 = scmp.lt.s32.totalorder %s2572_s1, %s2043_s23 }
 0x177   : > { %p2048_p8 = por %p2047_p7, %p2046_p4 }
 0x179   : > { %p2049_p9 = pnand %p2048_p8, %p2044_p3 }
 0x17b   : > { %2052 = shalt.err (!%p2049_p9)  }
 0x17c   : > { %703 = dma.hbm_to_vmem [thread:$0]  %s699_s24, 16, %s701_s11, [#allocation4 + $0x1] }
 0x17d   : > { %s707_s0 = scalar_select %p706_p2, %s2888_s20, 0 }
 0x17e   : > { %p1315_p10 = scmp.lt.s32.totalorder %s2888_s20, 255  ;;  %s726_s16 = sld [smem:[#allocation6 + %s725_s12]] }
 0x17f   : > { %s746_s18 = sadd.s32 24, %s2532_s27  ;;  %s2399_s4 = smov [#allocation3 + $0x7]  }
 0x180   : > { %s3237_s0 = smov (!%p1315_p10, %s707_s0), 255  ;;  %s2913_s21 = sshll.u32 %s2399_s4, 4  ;;  %s743_s21 = int_to_ptr.vmem [resolvable:$true] %s2913_s21 }
 0x181   : > { %s2915_s3 = sld [smem:[#allocation6 + %s746_s18]]  ;;  %s710_s11 = scalar_lea.hbm %s3150_s2, %s3237_s0 }
 0x182   : > { %s719_s24 = sshll.u32 %s710_s11, 4  ;;  %s720_s24 = int_to_ptr.hbm [resolvable:$true] %s719_s24 }
 0x183   : > { %s2065_s20 = sshra.s32 %s720_s24, 4  ;;  %s2066_s20 = int_to_ptr.hbm [resolvable:$true] %s2065_s20 }
 0x184   : > { %p727_p11 = scmp.gt.s32.totalorder %s726_s16, 0  ;;  %s2067_s12 = scalar_lea.hbm %s2066_s20, 1 }
 0x185   : > { %p2068_p12 = scmp.ne.s32.totalorder %s2066_s20, %s2067_s12  ;;  %p2070_p13 = scmp.lt.s32.totalorder %s2066_s20, %s3150_s2 }
 0x186   : > { %p2071_p0 = scmp.lt.s32.totalorder %s2572_s1, %s2067_s12 }
 0x188   : > { %p2072_p1 = por %p2071_p0, %p2070_p13 }
 0x18a   : > { %p2073_p2 = pnand %p2072_p1, %p2068_p12 }
 0x18c   : > { %2076 = shalt.err (!%p2073_p2)  }
 0x18d   : > { %724 = dma.hbm_to_vmem [thread:$0]  %s720_s24, 16, %s722_s26, [#allocation4 + $0x1] }
 0x18e   : > { %s728_s5 = scalar_select %p727_p11, %s726_s16, 0 }
 0x18f   : > { %p1320_p3 = scmp.lt.s32.totalorder %s726_s16, 255  ;;  %p748_p4 = scmp.gt.s32.totalorder %s2915_s3, 0 }
 0x190   : > { %p1325_p7 = scmp.lt.s32.totalorder %s2915_s3, 255  ;;  %s2400_s9 = smov [#allocation3 + $0x8]  }
 0x191   : > { %s3239_s5 = smov (!%p1320_p3, %s728_s5), 255  ;;  %s2932_s11 = sshll.u32 %s2400_s9, 4  ;;  %s764_s11 = int_to_ptr.vmem [resolvable:$true] %s2932_s11 }
 0x192   : > { %s749_s0 = scalar_select %p748_p4, %s2915_s3, 0 }
 0x193   : > { %s731_s19 = scalar_lea.hbm %s3150_s2, %s3239_s5  ;;  %s767_s26 = sadd.s32 25, %s2532_s27 }
 0x194   : > { %s740_s20 = sshll.u32 %s731_s19, 4  ;;  %s2935_s24 = sld [smem:[#allocation6 + %s767_s26]]  ;;  %s741_s20 = int_to_ptr.hbm [resolvable:$true] %s740_s20 }
 0x195   : > { %s2089_s12 = sshra.s32 %s741_s20, 4  ;;  %s2090_s12 = int_to_ptr.hbm [resolvable:$true] %s2089_s12 }
 0x196   : > { %s2091_s16 = scalar_lea.hbm %s2090_s12, 1  ;;  %p2094_p9 = scmp.lt.s32.totalorder %s2090_s12, %s3150_s2 }
 0x197   : > { %p2092_p8 = scmp.ne.s32.totalorder %s2090_s12, %s2091_s16  ;;  %p2095_p10 = scmp.lt.s32.totalorder %s2572_s1, %s2091_s16 }
 0x199   : > { %p2096_p11 = por %p2095_p10, %p2094_p9 }
 0x19b   : > { %p2097_p12 = pnand %p2096_p11, %p2092_p8 }
 0x19d   : > { %2100 = shalt.err (!%p2097_p12)  }
 0x19e   : > { %745 = dma.hbm_to_vmem [thread:$0]  %s741_s20, 16, %s743_s21, [#allocation4 + $0x1] }
 0x19f   : > { %s3241_s0 = smov (!%p1325_p7, %s749_s0), 255  ;;  %s788_s19 = sadd.s32 26, %s2532_s27 }
 0x1a0   : > { %s752_s4 = scalar_lea.hbm %s3150_s2, %s3241_s0  ;;  %s2401_s26 = smov [#allocation3 + $0x9]  }
 0x1a1   : > { %s761_s9 = sshll.u32 %s752_s4, 4  ;;  %s2950_s12 = sshll.u32 %s2401_s26, 4  ;;  %s762_s9 = int_to_ptr.hbm [resolvable:$true] %s761_s9  ;;  %s785_s12 = int_to_ptr.vmem [resolvable:$true] %s2950_s12 }
 0x1a2   : > { %p769_p13 = scmp.gt.s32.totalorder %s2935_s24, 0  ;;  %s2113_s16 = sshra.s32 %s762_s9, 4  ;;  %s2114_s16 = int_to_ptr.hbm [resolvable:$true] %s2113_s16 }
 0x1a3   : > { %s2115_s23 = scalar_lea.hbm %s2114_s16, 1  ;;  %p2118_p1 = scmp.lt.s32.totalorder %s2114_s16, %s3150_s2 }
 0x1a4   : > { %p2116_p0 = scmp.ne.s32.totalorder %s2114_s16, %s2115_s23  ;;  %p2119_p2 = scmp.lt.s32.totalorder %s2572_s1, %s2115_s23 }
 0x1a6   : > { %p2120_p3 = por %p2119_p2, %p2118_p1 }
 0x1a8   : > { %p2121_p4 = pnand %p2120_p3, %p2116_p0 }
 0x1aa   : > { %2124 = shalt.err (!%p2121_p4)  }
 0x1ab   : > { %766 = dma.hbm_to_vmem [thread:$0]  %s762_s9, 16, %s764_s11, [#allocation4 + $0x1] }
 0x1ac   : > { %s770_s3 = scalar_select %p769_p13, %s2935_s24, 0 }
 0x1ad   : > { %p1330_p7 = scmp.lt.s32.totalorder %s2935_s24, 255  ;;  %s789_s0 = sld [smem:[#allocation6 + %s788_s19]] }
 0x1ae   : > { %s809_s20 = sadd.s32 27, %s2532_s27  ;;  %s2402_s5 = smov [#allocation3 + $0xa]  }
 0x1af   : > { %s3243_s3 = smov (!%p1330_p7, %s770_s3), 255  ;;  %s2960_s18 = sshll.u32 %s2402_s5, 4  ;;  %s806_s18 = int_to_ptr.vmem [resolvable:$true] %s2960_s18 }
 0x1b0   : > { %s2962_s4 = sld [smem:[#allocation6 + %s809_s20]]  ;;  %s773_s11 = scalar_lea.hbm %s3150_s2, %s3243_s3 }
 0x1b1   : > { %s782_s9 = sshll.u32 %s773_s11, 4  ;;  %s783_s9 = int_to_ptr.hbm [resolvable:$true] %s782_s9 }
 0x1b2   : > { %s2137_s24 = sshra.s32 %s783_s9, 4  ;;  %s2138_s24 = int_to_ptr.hbm [resolvable:$true] %s2137_s24 }
 0x1b3   : > { %p790_p8 = scmp.gt.s32.totalorder %s789_s0, 0  ;;  %s2139_s19 = scalar_lea.hbm %s2138_s24, 1 }
 0x1b4   : > { %p2140_p9 = scmp.ne.s32.totalorder %s2138_s24, %s2139_s19  ;;  %p2142_p10 = scmp.lt.s32.totalorder %s2138_s24, %s3150_s2 }
 0x1b5   : > { %p2143_p11 = scmp.lt.s32.totalorder %s2572_s1, %s2139_s19 }
 0x1b7   : > { %p2144_p12 = por %p2143_p11, %p2142_p10 }
 0x1b9   : > { %p2145_p13 = pnand %p2144_p12, %p2140_p9 }
 0x1bb   : > { %2148 = shalt.err (!%p2145_p13)  }
 0x1bc   : > { %787 = dma.hbm_to_vmem [thread:$0]  %s783_s9, 16, %s785_s12, [#allocation4 + $0x1] }
 0x1bd   : > { %s791_s21 = scalar_select %p790_p8, %s789_s0, 0 }
 0x1be   : > { %p1335_p0 = scmp.lt.s32.totalorder %s789_s0, 255  ;;  %p811_p1 = scmp.gt.s32.totalorder %s2962_s4, 0 }
 0x1bf   : > { %p1340_p2 = scmp.lt.s32.totalorder %s2962_s4, 255  ;;  %s2403_s16 = smov [#allocation3 + $0xb]  }
 0x1c0   : > { %s3245_s21 = smov (!%p1335_p0, %s791_s21), 255  ;;  %s2979_s11 = sshll.u32 %s2403_s16, 4  ;;  %s827_s11 = int_to_ptr.vmem [resolvable:$true] %s2979_s11 }
 0x1c1   : > { %s812_s3 = scalar_select %p811_p1, %s2962_s4, 0 }
 0x1c2   : > { %s794_s26 = scalar_lea.hbm %s3150_s2, %s3245_s21  ;;  %s830_s12 = sadd.s32 28, %s2532_s27 }
 0x1c3   : > { %s803_s24 = sshll.u32 %s794_s26, 4  ;;  %s2982_s9 = sld [smem:[#allocation6 + %s830_s12]]  ;;  %s804_s24 = int_to_ptr.hbm [resolvable:$true] %s803_s24 }
 0x1c4   : > { %s2161_s19 = sshra.s32 %s804_s24, 4  ;;  %s2162_s19 = int_to_ptr.hbm [resolvable:$true] %s2161_s19 }
 0x1c5   : > { %s2163_s0 = scalar_lea.hbm %s2162_s19, 1  ;;  %p2166_p4 = scmp.lt.s32.totalorder %s2162_s19, %s3150_s2 }
 0x1c6   : > { %p2164_p3 = scmp.ne.s32.totalorder %s2162_s19, %s2163_s0  ;;  %p2167_p7 = scmp.lt.s32.totalorder %s2572_s1, %s2163_s0 }
 0x1c8   : > { %p2168_p8 = por %p2167_p7, %p2166_p4 }
 0x1ca   : > { %p2169_p9 = pnand %p2168_p8, %p2164_p3 }
 0x1cc   : > { %2172 = shalt.err (!%p2169_p9)  }
 0x1cd   : > { %808 = dma.hbm_to_vmem [thread:$0]  %s804_s24, 16, %s806_s18, [#allocation4 + $0x1] }
 0x1ce   : > { %s3247_s3 = smov (!%p1340_p2, %s812_s3), 255  ;;  %s851_s26 = sadd.s32 29, %s2532_s27 }
 0x1cf   : > { %s815_s5 = scalar_lea.hbm %s3150_s2, %s3247_s3  ;;  %s2404_s12 = smov [#allocation3 + $0xc]  }
 0x1d0   : > { %s824_s16 = sshll.u32 %s815_s5, 4  ;;  %s2997_s19 = sshll.u32 %s2404_s12, 4  ;;  %s825_s16 = int_to_ptr.hbm [resolvable:$true] %s824_s16  ;;  %s848_s19 = int_to_ptr.vmem [resolvable:$true] %s2997_s19 }
 0x1d1   : > { %p832_p10 = scmp.gt.s32.totalorder %s2982_s9, 0  ;;  %s2185_s0 = sshra.s32 %s825_s16, 4  ;;  %s2186_s0 = int_to_ptr.hbm [resolvable:$true] %s2185_s0 }
 0x1d2   : > { %s2187_s23 = scalar_lea.hbm %s2186_s0, 1  ;;  %p2190_p12 = scmp.lt.s32.totalorder %s2186_s0, %s3150_s2 }
 0x1d3   : > { %p2188_p11 = scmp.ne.s32.totalorder %s2186_s0, %s2187_s23  ;;  %p2191_p13 = scmp.lt.s32.totalorder %s2572_s1, %s2187_s23 }
 0x1d5   : > { %p2192_p0 = por %p2191_p13, %p2190_p12 }
 0x1d7   : > { %p2193_p1 = pnand %p2192_p0, %p2188_p11 }
 0x1d9   : > { %2196 = shalt.err (!%p2193_p1)  }
 0x1da   : > { %829 = dma.hbm_to_vmem [thread:$0]  %s825_s16, 16, %s827_s11, [#allocation4 + $0x1] }
 0x1db   : > { %s833_s4 = scalar_select %p832_p10, %s2982_s9, 0 }
 0x1dc   : > { %p1345_p2 = scmp.lt.s32.totalorder %s2982_s9, 255  ;;  %s852_s3 = sld [smem:[#allocation6 + %s851_s26]] }
 0x1dd   : > { %s872_s24 = sadd.s32 30, %s2532_s27  ;;  %s2405_s21 = smov [#allocation3 + $0xd]  }
 0x1de   : > { %s3249_s4 = smov (!%p1345_p2, %s833_s4), 255  ;;  %s3007_s20 = sshll.u32 %s2405_s21, 4  ;;  %s869_s20 = int_to_ptr.vmem [resolvable:$true] %s3007_s20 }
 0x1df   : > { %s3009_s5 = sld [smem:[#allocation6 + %s872_s24]]  ;;  %s836_s11 = scalar_lea.hbm %s3150_s2, %s3249_s4 }
 0x1e0   : > { %s845_s16 = sshll.u32 %s836_s11, 4  ;;  %s846_s16 = int_to_ptr.hbm [resolvable:$true] %s845_s16 }
 0x1e1   : > { %s2209_s9 = sshra.s32 %s846_s16, 4  ;;  %s2210_s9 = int_to_ptr.hbm [resolvable:$true] %s2209_s9 }
 0x1e2   : > { %p853_p3 = scmp.gt.s32.totalorder %s852_s3, 0  ;;  %s2211_s26 = scalar_lea.hbm %s2210_s9, 1 }
 0x1e3   : > { %p2212_p4 = scmp.ne.s32.totalorder %s2210_s9, %s2211_s26  ;;  %p2214_p7 = scmp.lt.s32.totalorder %s2210_s9, %s3150_s2 }
 0x1e4   : > { %p2215_p8 = scmp.lt.s32.totalorder %s2572_s1, %s2211_s26 }
 0x1e6   : > { %p2216_p9 = por %p2215_p8, %p2214_p7 }
 0x1e8   : > { %p2217_p10 = pnand %p2216_p9, %p2212_p4 }
 0x1ea   : > { %2220 = shalt.err (!%p2217_p10)  }
 0x1eb   : > { %850 = dma.hbm_to_vmem [thread:$0]  %s846_s16, 16, %s848_s19, [#allocation4 + $0x1] }
 0x1ec   : > { %s854_s18 = scalar_select %p853_p3, %s852_s3, 0 }
 0x1ed   : > { %p1350_p11 = scmp.lt.s32.totalorder %s852_s3, 255  ;;  %p874_p12 = scmp.gt.s32.totalorder %s3009_s5, 0 }
 0x1ee   : > { %p1355_p13 = scmp.lt.s32.totalorder %s3009_s5, 255  ;;  %s2406_s0 = smov [#allocation3 + $0xe]  }
 0x1ef   : > { %s3251_s18 = smov (!%p1350_p11, %s854_s18), 255  ;;  %s3026_s11 = sshll.u32 %s2406_s0, 4  ;;  %s890_s11 = int_to_ptr.vmem [resolvable:$true] %s3026_s11 }
 0x1f0   : > { %s875_s4 = scalar_select %p874_p12, %s3009_s5, 0 }
 0x1f1   : > { %s857_s12 = scalar_lea.hbm %s3150_s2, %s3251_s18  ;;  %s893_s19 = sadd.s32 31, %s2532_s27 }
 0x1f2   : > { %s866_s9 = sshll.u32 %s857_s12, 4  ;;  %s3029_s16 = sld [smem:[#allocation6 + %s893_s19]]  ;;  %s867_s9 = int_to_ptr.hbm [resolvable:$true] %s866_s9 }
 0x1f3   : > { %s2233_s26 = sshra.s32 %s867_s9, 4  ;;  %s2234_s26 = int_to_ptr.hbm [resolvable:$true] %s2233_s26 }
 0x1f4   : > { %s2235_s3 = scalar_lea.hbm %s2234_s26, 1  ;;  %p2238_p1 = scmp.lt.s32.totalorder %s2234_s26, %s3150_s2 }
 0x1f5   : > { %p2236_p0 = scmp.ne.s32.totalorder %s2234_s26, %s2235_s3  ;;  %p2239_p2 = scmp.lt.s32.totalorder %s2572_s1, %s2235_s3 }
 0x1f7   : > { %p2240_p3 = por %p2239_p2, %p2238_p1 }
 0x1f9   : > { %p2241_p4 = pnand %p2240_p3, %p2236_p0 }
 0x1fb   : > { %2244 = shalt.err (!%p2241_p4)  }
 0x1fc   : > { %871 = dma.hbm_to_vmem [thread:$0]  %s867_s9, 16, %s869_s20, [#allocation4 + $0x1] }
 0x1fd   : > { %s3253_s4 = smov (!%p1355_p13, %s875_s4), 255  ;;  %p895_p7 = scmp.gt.s32.totalorder %s3029_s16, 0 }
 0x1fe   : > { %s878_s21 = scalar_lea.hbm %s3150_s2, %s3253_s4 }
 0x1ff   : > { %s887_s12 = sshll.u32 %s878_s21, 4  ;;  %s888_s12 = int_to_ptr.hbm [resolvable:$true] %s887_s12 }
 0x200   : > { %s2257_s0 = sshra.s32 %s888_s12, 4  ;;  %s2258_s0 = int_to_ptr.hbm [resolvable:$true] %s2257_s0 }
 0x201   : > { %s2259_s19 = scalar_lea.hbm %s2258_s0, 1  ;;  %p2262_p9 = scmp.lt.s32.totalorder %s2258_s0, %s3150_s2 }
 0x202   : > { %p2260_p8 = scmp.ne.s32.totalorder %s2258_s0, %s2259_s19  ;;  %p2263_p10 = scmp.lt.s32.totalorder %s2572_s1, %s2259_s19 }
 0x204   : > { %p2264_p11 = por %p2263_p10, %p2262_p9 }
 0x206   : > { %p2265_p12 = pnand %p2264_p11, %p2260_p8 }
 0x208   : > { %2268 = shalt.err (!%p2265_p12)  }
 0x209   : > { %892 = dma.hbm_to_vmem [thread:$0]  %s888_s12, 16, %s890_s11, [#allocation4 + $0x1] }
 0x20a   : > { %s896_s20 = scalar_select %p895_p7, %s3029_s16, 0 }
 0x20b   : > { %p1360_p13 = scmp.lt.s32.totalorder %s3029_s16, 255  ;;  %s2407_s5 = smov [#allocation3 + $0xf]  }
 0x20c   : > { %s910_s4 = sshll.u32 %s2407_s5, 4  ;;  %s911_s4 = int_to_ptr.vmem [resolvable:$true] %s910_s4 }
 0x20d   : > { %s3255_s20 = smov (!%p1360_p13, %s896_s20), 255 }
 0x20e   : > { %s899_s17 = scalar_lea.hbm %s3150_s2, %s3255_s20 }
 0x20f   : > { %s908_s18 = sshll.u32 %s899_s17, 4  ;;  %s909_s18 = int_to_ptr.hbm [resolvable:$true] %s908_s18 }
 0x210   : > { %s2281_s24 = sshra.s32 %s909_s18, 4  ;;  %s2282_s24 = int_to_ptr.hbm [resolvable:$true] %s2281_s24 }
 0x211   : > { %s2283_s21 = scalar_lea.hbm %s2282_s24, 1  ;;  %p2286_p1 = scmp.lt.s32.totalorder %s2282_s24, %s3150_s2 }
 0x212   : > { %p2284_p0 = scmp.ne.s32.totalorder %s2282_s24, %s2283_s21  ;;  %p2287_p2 = scmp.lt.s32.totalorder %s2572_s1, %s2283_s21 }
 0x214   : > { %p2288_p3 = por %p2287_p2, %p2286_p1 }
 0x216   : > { %p2289_p4 = pnand %p2288_p3, %p2284_p0 }
 0x218   : > { %2292 = shalt.err (!%p2289_p4)  }
 0x219   : > { %913 = dma.hbm_to_vmem [thread:$0]  %s909_s18, 16, %s911_s4, [#allocation4 + $0x1] }
 0x21a   : > { %s3058_s16 = scalar_lea.vmem [#allocation7], %s2517_s22 }
 0x21b   : > { %2351 = dma.done.wait [#allocation4], 256 }
 0x21c   : > { %2352 = vsyncadd [#allocation4], 4294967040  ;;  %v2408_v7 = vmov 0   ;;  %v919_v8 = vld [vmem:[%s2550_s25] sm:$0xff]  ;;  %v920_v10 = vld [vmem:[%s2550_s25 + $0x8] sm:$0xff]  ;;  %v3065_v14 = vperm.slane %v2508_v0, 0 }
 0x21d   : > { %1513 = vset.pattern.permute.xlu0 %v2408_v7  ;;  %v921_v9 = vcvt.s32.f32 %v919_v8  ;;  %v922_v11 = vcvt.s32.f32 %v920_v10  ;;  %v917_v12 = vld [vmem:[#allocation2] sm:$0xff]  ;;  %v3070_v15 = vperm.slane %v239_v2, 0  ;;  %v918_v18 = vld [vmem:[#allocation2 + $0x8] sm:$0xff]  ;;  %v2409_v26 = vmov 128.0  }
 0x21e   : > { %v923_v13 = vadd.f32 %v917_v12, %v2537_v5  ;;  %v924_v21 = vadd.f32 %v918_v18, %v2542_v6  ;;  %1514 = vrcp.f32 %v2409_v26  ;;  %v3084_v55 = vperm.slane %v2524_v3, 0 }
 0x21f   : > { %930 = vperm.xlu0 %1513, %v921_v9   ;;  %v3087_v58 = vperm.slane %v2529_v4, 0 }
 0x220   : > { %v926_v16 = vadd.f32 %v3065_v14, %v923_v13  ;;  %v927_v22 = vadd.f32 %v3065_v14, %v924_v21 }
 0x224   : > { %v1515_v27 = vpop.eup %1514 }
 0x225   : > { %v948_v28 = vmul.f32 128.0, %v1515_v27  ;;  %vm952_vm0 = vweird.f32 %v1515_v27 }
 0x227   : > { %935 = vperm.xlu0 %1513, %v922_v11   ;;  %v949_v29 = vsub.f32 1.0, %v948_v28 }
 0x229   : > { %v950_v30 = vmul.f32 %v1515_v27, %v949_v29 }
 0x22b   : > { %v951_v31 = vadd.f32 %v1515_v27, %v950_v30 }
 0x22d   : > { %v3077_v32 = vsel %vm952_vm0, %v1515_v27, %v951_v31 }
 0x291   : > { %v931_v17 = vpop.permute.xlu0 %930 }
 0x292   : > { %v939_v19 = vmul.f32 %v3070_v15, %v931_v17 }
 0x294   : > { %v941_v20 = vadd.f32 %v939_v19, %v926_v16 }
 0x296   : > { %943 = vadd.xlane.f32.xlu1 %v941_v20 }
 0x299   : > { %v936_v23 = vpop.permute.xlu0 %935 }
 0x29a   : > { %v940_v24 = vmul.f32 %v3070_v15, %v936_v23 }
 0x29c   : > { %v942_v25 = vadd.f32 %v940_v24, %v927_v22 }
 0x29e   : > { %945 = vadd.xlane.f32.xlu1 %v942_v25 }
 0x309   : > { %v944_v33 = vpop.xlane.xlu1 %943 }
 0x30a   : > { %v954_v34 = vmul.f32 %v3077_v32, %v944_v33 }
 0x30c   : > { %v956_v35 = vsub.f32 %v941_v20, %v954_v34 }
 0x30e   : > { %v958_v36 = vmul.f32 %v956_v35, %v956_v35 }
 0x310   : > { %960 = vadd.xlane.f32.xlu2 %v958_v36 }
 0x311   : > { %v946_v37 = vpop.xlane.xlu1 %945 }
 0x312   : > { %v955_v38 = vmul.f32 %v3077_v32, %v946_v37 }
 0x314   : > { %v957_v39 = vsub.f32 %v942_v25, %v955_v38 }
 0x316   : > { %v959_v40 = vmul.f32 %v957_v39, %v957_v39 }
 0x318   : > { %962 = vadd.xlane.f32.xlu2 %v959_v40 }
 0x383   : > { %v961_v41 = vpop.xlane.xlu2 %960 }
 0x384   : > { %v964_v42 = vmul.f32 %v961_v41, %v3077_v32 }
 0x386   : > { %v966_v43 = vadd.f32 1e-12, %v964_v42 }
 0x388   : > { %1516 = vrsqrt.f32 %v966_v43  ;;  %vm974_vm2 = vweird.f32 %v966_v43 }
 0x38b   : > { %v963_v44 = vpop.xlane.xlu2 %962 }
 0x38c   : > { %v965_v45 = vmul.f32 %v963_v44, %v3077_v32 }
 0x38e   : > { %v1517_v46 = vpop.eup %1516  ;;  %v967_v47 = vadd.f32 1e-12, %v965_v45 }
 0x38f   : > { %v969_v48 = vmul.f32 %v1517_v46, %v966_v43  ;;  %vm975_vm1 = vweird.f32 %v1517_v46 }
 0x390   : > { %1518 = vrsqrt.f32 %v967_v47  ;;  %vm976_vm3 = vmor %vm974_vm2, %vm975_vm1  ;;  %vm984_vm5 = vweird.f32 %v967_v47 }
 0x391   : > { %v970_v49 = vmul.f32 %v1517_v46, %v969_v48 }
 0x393   : > { %v971_v50 = vmul.f32 0.5, %v970_v49 }
 0x395   : > { %v972_v51 = vsub.f32 1.5, %v971_v50 }
 0x396   : > { %v1519_v52 = vpop.eup %1518 }
 0x397   : > { %v973_v53 = vmul.f32 %v1517_v46, %v972_v51  ;;  %v979_v54 = vmul.f32 %v1519_v52, %v967_v47  ;;  %vm985_vm4 = vweird.f32 %v1519_v52 }
 0x398   : > { %vm986_vm6 = vmor %vm984_vm5, %vm985_vm4 }
 0x399   : > { %v977_v56 = vsel %vm976_vm3, %v1517_v46, %v973_v53  ;;  %v980_v57 = vmul.f32 %v1519_v52, %v979_v54 }
 0x39a   : > { %v988_v59 = vmul.f32 %v977_v56, %v956_v35 }
 0x39b   : > { %v981_v60 = vmul.f32 0.5, %v980_v57 }
 0x39c   : > { %v993_v61 = vmul.f32 %v3084_v55, %v988_v59 }
 0x39d   : > { %v982_v62 = vsub.f32 1.5, %v981_v60 }
 0x39e   : > { %v998_v63 = vadd.f32 %v3087_v58, %v993_v61 }
 0x39f   : > { %v983_v0 = vmul.f32 %v1519_v52, %v982_v62 }
 0x3a0   : > { %1000 = vst [vmem:[%s3058_s16] sm:$0xff] %v998_v63 }
 0x3a1   : > { %v987_v1 = vsel %vm986_vm6, %v1519_v52, %v983_v0 }
 0x3a2   : > { %v989_v2 = vmul.f32 %v987_v1, %v957_v39 }
 0x3a4   : > { %v994_v3 = vmul.f32 %v3084_v55, %v989_v2 }
 0x3a6   : > { %v999_v8 = vadd.f32 %v3087_v58, %v994_v3 }
 0x3a8   : > { %1001 = vst [vmem:[%s3058_s16 + $0x8] sm:$0xff] %v999_v8 }
 0x3a9   : > { %2353 = dma.done.wait [#allocation4 + $0x1], 256 }
 0x3aa   : > { %2354 = vsyncadd [#allocation4 + $0x1], 4294967040  ;;  %1520 = vset.pattern.permute.xlu0 %v2408_v7  ;;  %v1006_v4 = vld [vmem:[%s2550_s25 + $0x10] sm:$0xff]  ;;  %v1007_v10 = vld [vmem:[%s2550_s25 + $0x18] sm:$0xff]  ;;  %s1086_s25 = scalar_lea.hbm %s3155_s7, %s2532_s27  ;;  %s1087_s0 = sshll.u32 %s3058_s16, 4  ;;  %s1088_s0 = int_to_ptr.vmem [resolvable:$true] %s1087_s0 }
 0x3ab   : > { %v1008_v9 = vcvt.s32.f32 %v1006_v4  ;;  %v1009_v11 = vcvt.s32.f32 %v1007_v10  ;;  %v1004_v12 = vld [vmem:[#allocation3] sm:$0xff]  ;;  %v1005_v18 = vld [vmem:[#allocation3 + $0x8] sm:$0xff]  ;;  %s1089_s19 = sshll.u32 %s1086_s25, 4  ;;  %s3179_s26 = sand.u32 1, %s2365_s29   ;;  %s1090_s19 = int_to_ptr.hbm [resolvable:$true] %s1089_s19 }
 0x3ac   : > { %v1010_v13 = vadd.f32 %v1004_v12, %v2537_v5  ;;  %v1011_v21 = vadd.f32 %v1005_v18, %v2542_v6  ;;  %s1075_s3 = scalar_lea.sflag [#allocation8], %s3179_s26  ;;  %s2319_s20 = sshra.s32 %s1090_s19, 4  ;;  %s2320_s20 = int_to_ptr.hbm [resolvable:$true] %s2319_s20 }
 0x3ad   : > { %1016 = vperm.xlu0 %1520, %v1008_v9   ;;  %s2321_s5 = scalar_lea.hbm %s2320_s20, 32  ;;  %s2325_s9 = scalar_lea.hbm %s3155_s7, 96 }
 0x3ae   : > { %v1012_v16 = vadd.f32 %v1010_v13, %v3065_v14  ;;  %v1013_v7 = vadd.f32 %v1011_v21, %v3065_v14  ;;  %p2322_p7 = scmp.ne.s32.totalorder %s2320_s20, %s2321_s5  ;;  %p2326_p10 = scmp.lt.s32.totalorder %s2320_s20, %s3155_s7 }
 0x3af   : > { %p2327_p11 = scmp.lt.s32.totalorder %s2325_s9, %s2321_s5 }
 0x3b0   : > { %p2323_p8 = pnand %p2322_p7, %p2493_p5 }
 0x3b1   : > { %p2328_p12 = por %p2327_p11, %p2326_p10 }
 0x3b2   : > { %p2324_p9 = pneg %p2323_p8 }
 0x3b4   : > { %p2329_p13 = pnand %p2328_p12, %p2324_p9 }
 0x3b5   : > { %1021 = vperm.xlu0 %1520, %v1009_v11  }
 0x41f   : > { %v1017_v17 = vpop.permute.xlu0 %1016 }
 0x420   : > { %v1024_v19 = vmul.f32 %v1017_v17, %v3070_v15 }
 0x422   : > { %v1026_v20 = vadd.f32 %v1024_v19, %v1012_v16 }
 0x424   : > { %1028 = vadd.xlane.f32.xlu1 %v1026_v20 }
 0x427   : > { %v1022_v22 = vpop.permute.xlu0 %1021 }
 0x428   : > { %v1025_v23 = vmul.f32 %v1022_v22, %v3070_v15 }
 0x42a   : > { %v1027_v24 = vadd.f32 %v1025_v23, %v1013_v7 }
 0x42c   : > { %1030 = vadd.xlane.f32.xlu1 %v1027_v24 }
 0x497   : > { %v1029_v25 = vpop.xlane.xlu1 %1028 }
 0x498   : > { %v1032_v5 = vmul.f32 %v1029_v25, %v3077_v32 }
 0x49a   : > { %v1034_v26 = vsub.f32 %v1026_v20, %v1032_v5 }
 0x49c   : > { %v1036_v27 = vmul.f32 %v1034_v26, %v1034_v26 }
 0x49e   : > { %1038 = vadd.xlane.f32.xlu2 %v1036_v27 }
 0x49f   : > { %v1031_v28 = vpop.xlane.xlu1 %1030 }
 0x4a0   : > { %v1033_v29 = vmul.f32 %v1031_v28, %v3077_v32 }
 0x4a2   : > { %v1035_v30 = vsub.f32 %v1027_v24, %v1033_v29 }
 0x4a4   : > { %v1037_v31 = vmul.f32 %v1035_v30, %v1035_v30 }
 0x4a6   : > { %1040 = vadd.xlane.f32.xlu2 %v1037_v31 }
 0x511   : > { %v1039_v6 = vpop.xlane.xlu2 %1038 }
 0x512   : > { %v1042_v14 = vmul.f32 %v1039_v6, %v3077_v32 }
 0x514   : > { %v1044_v33 = vadd.f32 1e-12, %v1042_v14 }
 0x516   : > { %1521 = vrsqrt.f32 %v1044_v33  ;;  %vm1052_vm8 = vweird.f32 %v1044_v33 }
 0x519   : > { %v1041_v15 = vpop.xlane.xlu2 %1040 }
 0x51a   : > { %v1043_v34 = vmul.f32 %v1041_v15, %v3077_v32 }
 0x51c   : > { %v1522_v35 = vpop.eup %1521  ;;  %v1045_v36 = vadd.f32 1e-12, %v1043_v34 }
 0x51d   : > { %v1047_v37 = vmul.f32 %v1522_v35, %v1044_v33  ;;  %vm1053_vm7 = vweird.f32 %v1522_v35 }
 0x51e   : > { %1523 = vrsqrt.f32 %v1045_v36  ;;  %vm1054_vm9 = vmor %vm1052_vm8, %vm1053_vm7  ;;  %vm1062_vm11 = vweird.f32 %v1045_v36 }
 0x51f   : > { %v1048_v38 = vmul.f32 %v1522_v35, %v1047_v37 }
 0x521   : > { %v1049_v39 = vmul.f32 0.5, %v1048_v38 }
 0x523   : > { %v1050_v40 = vsub.f32 1.5, %v1049_v39 }
 0x524   : > { %v1524_v41 = vpop.eup %1523 }
 0x525   : > { %v1051_v42 = vmul.f32 %v1522_v35, %v1050_v40  ;;  %v1057_v43 = vmul.f32 %v1524_v41, %v1045_v36  ;;  %vm1063_vm10 = vweird.f32 %v1524_v41 }
 0x526   : > { %vm1064_vm12 = vmor %vm1062_vm11, %vm1063_vm10 }
 0x527   : > { %v1055_v44 = vsel %vm1054_vm9, %v1522_v35, %v1051_v42  ;;  %v1058_v45 = vmul.f32 %v1524_v41, %v1057_v43 }
 0x528   : > { %v1066_v46 = vmul.f32 %v1055_v44, %v1034_v26 }
 0x529   : > { %v1059_v32 = vmul.f32 0.5, %v1058_v45 }
 0x52a   : > { %v1068_v47 = vmul.f32 %v1066_v46, %v3084_v55 }
 0x52b   : > { %v1060_v48 = vsub.f32 1.5, %v1059_v32 }
 0x52c   : > { %v1070_v49 = vadd.f32 %v1068_v47, %v3087_v58 }
 0x52d   : > { %v1061_v50 = vmul.f32 %v1524_v41, %v1060_v48 }
 0x52e   : > { %1072 = vst [vmem:[%s3058_s16 + $0x10] sm:$0xff] %v1070_v49 }
 0x52f   : > { %v1065_v51 = vsel %vm1064_vm12, %v1524_v41, %v1061_v50 }
 0x530   : > { %v1067_v52 = vmul.f32 %v1065_v51, %v1035_v30 }
 0x532   : > { %v1069_v53 = vmul.f32 %v1067_v52, %v3084_v55 }
 0x534   : > { %v1071_v54 = vadd.f32 %v1069_v53, %v3087_v58 }
 0x536   : > { %1073 = vst [vmem:[%s3058_s16 + $0x18] sm:$0xff] %v1071_v54 }
 0x537   : > { %2332 = shalt.err (!%p2329_p13)
}
 0x538   : > { %s2410_s18 = smov 128   ;;  %s2411_s24 = smov 8  }
 0x539   : > { %1437 = dma.vmem_to_hbm [thread:$0]  (%p2493_p5), %s1088_s0, 512, %s1090_s19, %s1075_s3, %s2410_s18, %s2410_s18, %s2411_s24  }
 0x53a PF: > { %p1443_p0 = scmp.ge.s32.totalorder %s2373_s8, 2  ;;  %s1104_s21 = sand.u32 1, %s2361_s28  }
 0x53b   : > { %s1105_s11 = scalar_lea.sflag [#allocation8], %s1104_s21 }
 0x53c   : > { %p1440_p1 = pnand %p1443_p0, %p2497_p6 }
 0x53e   : > { %p1441_p2 = pneg %p1440_p1 }
 0x540   : > { %2356 = dma.done.wait (%p1441_p2), %s1105_s11, 512  }
 0x541   : > { %2358 = vsyncadd (%p1441_p2), %s1105_s11, 4294966784  ;;  %p25_p3 = scmp.ge.s32.totalorder %s2480_s10, 5   ;;  %s3180_s28 = smov %s2365_s29 }
 0x542   : > { %s3181_s29 = smov %s2369_s30  ;;  %s3182_s30 = smov %s2491_s13 }
 0x543   : > { %s3183_s8 = smov %s2480_s10  ;;  %27 = sbr.rel (!%p25_p3) target bundleno = 12 (0xc), region = 267 }
 0x548   :  { %1111 = vsyncpa [#allocation8], 1 }
 0x549   :  { %1113 = vsyncpa [#allocation8 + $0x1], 1 }
 0x54a   :  { %1114 = vsyncmov [#allocation4] }
 0x54d   :  { %s1115_s8 = vpop.sfrf %1114 }
 0x54e   :  { %p1370_p5 = scmp.ne.s32.totalorder %s1115_s8, 0 }
 0x550   :  { %1119 = shalt.err (%p1370_p5)  }
 0x551   :  { %1121 = vsyncmov [#allocation4 + $0x1] }
 0x554   :  { %s1122_s14 = vpop.sfrf %1121 }
 0x555   :  { %p1371_p6 = scmp.ne.s32.totalorder %s1122_s14, 0 }
 0x557   :  { %1126 = shalt.err (%p1371_p6)  }

</bundles_post_ra>
